<compile_context>
chip_gen: v6e
topology: v6e:2x2x1
jax: 0.10.0
libtpu: 0.0.40
codegen_flags: <defaults>
</compile_context>

<pallas_src>
import functools
import math

import jax
import jax.numpy as jnp
from jax import lax
from jax.experimental import pallas as pl
from jax.experimental.pallas import tpu as pltpu

_EPS = 1e-5

_T_KEYS = ("emb_w", "emb_b", "pos", "wqkv", "wo",
           "ffn_w1", "ffn_b1", "ffn_w2", "ffn_b2",
           "ln1_g", "ln1_b", "ln2_g", "ln2_b")
_C_KEYS = _T_KEYS + ("seg_table",)
_F_KEYS = ("wq", "bq", "wk", "bk", "wv", "bv",
           "ffn_w1", "ffn_b1", "ffn_w2", "ffn_b2",
           "ln1_g", "ln1_b", "ln2_g", "ln2_b", "fc_w3", "fc_b")


# ----------------------------- in-kernel helpers -----------------------------

def _layernorm(z, gamma, beta, eps):
    """LayerNorm over the full (T, H) slab (d2l norm_shape=(T, H)), one sample."""
    mean = jnp.mean(z, axis=(0, 1), keepdims=True)
    var = jnp.mean(jnp.square(z - mean), axis=(0, 1), keepdims=True)
    return (z - mean) * lax.rsqrt(var + eps) * gamma + beta


def _split_heads(x, nh, dh):
    """(T, H) -> (nh, T, dh): static lane slices stacked on a new leading axis
    (one relayout per projection; all later ops are head-batched)."""
    return jnp.stack([x[:, h * dh:(h + 1) * dh] for h in range(nh)], axis=0)


def _mha(q, k, v, nh, scale, mask):
    """Head-batched attention.  q: (Tq, H); k, v: (Tk, H); returns (Tq, H).
    `scale` multiplies the raw scores; `mask` is None or a (1, 1, Tk) bool."""
    Tq, H = q.shape
    dh = H // nh
    qh = _split_heads(q, nh, dh)                       # (nh, Tq, dh)
    kh = _split_heads(k, nh, dh)                       # (nh, Tk, dh)
    vh = _split_heads(v, nh, dh)                       # (nh, Tk, dh)
    s = jnp.einsum("hqd,hkd->hqk", qh, kh,
                   preferred_element_type=jnp.float32) * scale
    if mask is not None:
        s = jnp.where(mask, s, -1e6)                   # d2l masked_softmax fill
    s = s - jnp.max(s, axis=-1, keepdims=True)
    e = jnp.exp(s)
    p = e * pl.reciprocal(jnp.sum(e, axis=-1, keepdims=True), approx=True)
    o = jnp.einsum("hqk,hkd->hqd", p, vh,
                   preferred_element_type=jnp.float32)  # (nh, Tq, dh)
    return jnp.concatenate([o[h] for h in range(nh)], axis=1)      # (Tq, H)


def _encoder(x, p, pos_add, mask, nh, eps):
    """d2l-style encoder stack for one sample.
    x: (T, Din); pos_add: (T, H) additive positional(+segment) term."""
    H = p["emb_w"].shape[1]
    L = p["wqkv"].shape[0]
    # fused embedding: relu(x W + b) * sqrt(H) + positional (+ segment)
    h = jnp.dot(x, p["emb_w"][...], preferred_element_type=jnp.float32) + p["emb_b"][...]
    h = jnp.maximum(h, 0.0) * math.sqrt(H) + pos_add
    scale = 1.0 / math.sqrt(H // nh)                   # d2l DotProductAttention
    for l in range(L):                                 # weights resident in VMEM
        q = jnp.dot(h, p["wqkv"][l, 0], preferred_element_type=jnp.float32)
        k = jnp.dot(h, p["wqkv"][l, 1], preferred_element_type=jnp.float32)
        v = jnp.dot(h, p["wqkv"][l, 2], preferred_element_type=jnp.float32)
        attn = _mha(q, k, v, nh, scale, mask)
        attn = jnp.dot(attn, p["wo"][l], preferred_element_type=jnp.float32)
        z = _layernorm(h + attn, p["ln1_g"][l], p["ln1_b"][l], eps)
        f = jnp.maximum(
            jnp.dot(z, p["ffn_w1"][l], preferred_element_type=jnp.float32)
            + p["ffn_b1"][l], 0.0)
        f = jnp.dot(f, p["ffn_w2"][l], preferred_element_type=jnp.float32) + p["ffn_b2"][l]
        h = _layernorm(z + f, p["ln2_g"][l], p["ln2_b"][l], eps)
    return h


# --------------------------------- the kernel ---------------------------------

def _traffic_scope_kernel(vl_ref, seg_ref, xt_ref, xc_ref, *refs,
                          nh, eps, n_t, n_c):
    o_ref = refs[-1]
    tp = dict(zip(_T_KEYS, refs[:n_t]))
    cp = dict(zip(_C_KEYS, refs[n_t:n_t + n_c]))
    fp = dict(zip(_F_KEYS, refs[n_t + n_c:-1]))

    b = pl.program_id(0)
    T = xt_ref.shape[1]
    S = xc_ref.shape[1]

    # ---- temporal encoder: masked self-attention (scale 1/sqrt(d_head)) ----
    vl = vl_ref[b]
    key_idx = lax.broadcasted_iota(jnp.int32, (1, 1, T), 2)
    t_mask = key_idx < vl                    # built once; reused by all layers/heads
    t_feat = _encoder(xt_ref[0], tp, tp["pos"][...], t_mask, nh, eps)     # (T, Ht)

    # ---- contextual encoder: positional + segment embedding, no masking ----
    seg_rows = [cp["seg_table"][pl.ds(seg_ref[b, s], 1), :] for s in range(S)]
    seg_add = jnp.concatenate(seg_rows, axis=0)                           # (S, Hc)
    c_feat = _encoder(xc_ref[0], cp, cp["pos"][...] + seg_add, None, nh, eps)

    # ---- fusion encoder: scores are *multiplied* by sqrt(num_hiddens) ----
    Hf = fp["wq"].shape[1]
    q = jnp.dot(t_feat, fp["wq"][...], preferred_element_type=jnp.float32) + fp["bq"][...]
    k = jnp.dot(c_feat, fp["wk"][...], preferred_element_type=jnp.float32) + fp["bk"][...]
    v = jnp.dot(c_feat, fp["wv"][...], preferred_element_type=jnp.float32) + fp["bv"][...]
    attn = _mha(q, k, v, nh, math.sqrt(Hf), None)                         # (T, Hf)
    z = _layernorm(q + attn, fp["ln1_g"][...], fp["ln1_b"][...], eps)
    f = jnp.maximum(
        jnp.dot(z, fp["ffn_w1"][...], preferred_element_type=jnp.float32)
        + fp["ffn_b1"][...], 0.0)
    f = jnp.dot(f, fp["ffn_w2"][...], preferred_element_type=jnp.float32) + fp["ffn_b2"][...]
    fused = _layernorm(z + f, fp["ln2_g"][...], fp["ln2_b"][...], eps)    # (T, Hf)

    # ---- classifier head: flatten(T*Hf) @ fc + softmax ----
    # fc_w3 is (T, Hf, C): sum_{t,h} fused[t,h] * fc_w3[t,h,:]  (VPU mult+reduce)
    prod = fused[:, :, None] * fp["fc_w3"][...]                           # (T, Hf, C)
    logits = jnp.sum(jnp.sum(prod, axis=0), axis=0, keepdims=True) + fp["fc_b"][...]
    logits = logits - jnp.max(logits, axis=-1, keepdims=True)
    e = jnp.exp(logits)
    # exact division here so output probabilities sum to 1 at f32 precision
    o_ref[...] = (e / jnp.sum(e, axis=-1, keepdims=True)).reshape(1, 1, -1)


# ------------------------------- kernel wrapper -------------------------------

def _const_index_map(ndim):
    zeros = (0,) * ndim
    return lambda b, *_: zeros


def _batch_index_map(ndim):
    tail = (0,) * (ndim - 1)
    return lambda b, *_: (b,) + tail


def traffic_scope_fwd(params, temporal_data, temporal_valid_len,
                      contextual_data, contextual_segments, nh):
    B = temporal_data.shape[0]
    C = params["fusion"]["fc_b"].shape[-1]

    t_ops = [params["temporal"][k] for k in _T_KEYS]
    c_ops = [params["contextual"][k] for k in _C_KEYS]
    f_ops = [params["fusion"][k] for k in _F_KEYS]
    weight_ops = t_ops + c_ops + f_ops

    def data_spec(a):
        return pl.BlockSpec((1,) + tuple(a.shape[1:]), _batch_index_map(a.ndim))

    def weight_spec(a):   # constant block index -> stays resident in VMEM
        return pl.BlockSpec(tuple(a.shape), _const_index_map(a.ndim))

    in_specs = ([data_spec(temporal_data), data_spec(contextual_data)]
                + [weight_spec(a) for a in weight_ops])
    out_spec = pl.BlockSpec((1, 1, C), _batch_index_map(3))

    grid_spec = pltpu.PrefetchScalarGridSpec(
        num_scalar_prefetch=2, grid=(B,),
        in_specs=in_specs, out_specs=out_spec)

    kern = functools.partial(_traffic_scope_kernel, nh=nh, eps=_EPS,
                             n_t=len(_T_KEYS), n_c=len(_C_KEYS))

    out = pl.pallas_call(
        kern,
        grid_spec=grid_spec,
        out_shape=jax.ShapeDtypeStruct((B, 1, C), jnp.float32),
        compiler_params=pltpu.CompilerParams(
            dimension_semantics=("parallel",)),   # batch shards across TCs on v7x
    )(temporal_valid_len.astype(jnp.int32),
      contextual_segments.astype(jnp.int32),
      temporal_data, contextual_data, *weight_ops)
    return out.reshape(B, C)
    # TODO(synk): per-layer attention-weight / feature caching
    # (get_*_attention_weights / get_*_features) is not exposed; only the
    # classification probabilities are returned.


# --------------------------- deterministic parameters ---------------------------

def positional_encoding(T, H):
    pos = jnp.arange(T, dtype=jnp.float32)[:, None]
    div = jnp.power(10000.0, jnp.arange(0, H, 2, dtype=jnp.float32) / H)
    ang = pos / div
    P = jnp.zeros((T, H), jnp.float32)
    P = P.at[:, 0::2].set(jnp.sin(ang))
    P = P.at[:, 1::2].set(jnp.cos(ang))
    return P


def _rnd(key, shape, std=0.05):
    return jax.random.normal(key, shape, jnp.float32) * std


def _init_encoder(key, L, din, H, ffn_h, T):
    ks = jax.random.split(key, 5)
    return dict(
        emb_w=_rnd(ks[0], (din, H)), emb_b=jnp.zeros((1, H), jnp.float32),
        pos=positional_encoding(T, H),
        wqkv=_rnd(ks[1], (L, 3, H, H)),        # use_bias=False -> no qkv/o biases
        wo=_rnd(ks[2], (L, H, H)),
        ffn_w1=_rnd(ks[3], (L, H, ffn_h)),
        ffn_b1=jnp.zeros((L, 1, ffn_h), jnp.float32),
        ffn_w2=_rnd(ks[4], (L, ffn_h, H)),
        ffn_b2=jnp.zeros((L, 1, H), jnp.float32),
        ln1_g=jnp.ones((L, T, H), jnp.float32), ln1_b=jnp.zeros((L, T, H), jnp.float32),
        ln2_g=jnp.ones((L, T, H), jnp.float32), ln2_b=jnp.zeros((L, T, H), jnp.float32))


def init_params(key, cfg):
    T, P, F = cfg["temporal_seq_len"], cfg["packet_len"], cfg["freqs_size"]
    S = cfg["agg_scale_num"] * cfg["agg_points_num"]
    L, C = cfg["num_layers"], cfg["num_classes"]
    k_t, k_c, k_seg, k_f, k_fc = jax.random.split(key, 5)

    temporal = _init_encoder(k_t, L, P, P, 2 * P, T)
    contextual = _init_encoder(k_c, L, F, F, 2 * F, S)
    contextual["seg_table"] = _rnd(k_seg, (cfg["agg_scale_num"], F))

    kf = jax.random.split(k_f, 5)
    fusion = dict(
        wq=_rnd(kf[0], (P, P)), bq=jnp.zeros((1, P), jnp.float32),
        wk=_rnd(kf[1], (F, P)), bk=jnp.zeros((1, P), jnp.float32),
        wv=_rnd(kf[2], (F, P)), bv=jnp.zeros((1, P), jnp.float32),
        ffn_w1=_rnd(kf[3], (P, 2 * P)), ffn_b1=jnp.zeros((1, 2 * P), jnp.float32),
        ffn_w2=_rnd(kf[4], (2 * P, P)), ffn_b2=jnp.zeros((1, P), jnp.float32),
        ln1_g=jnp.ones((T, P), jnp.float32), ln1_b=jnp.zeros((T, P), jnp.float32),
        ln2_g=jnp.ones((T, P), jnp.float32), ln2_b=jnp.zeros((T, P), jnp.float32),
        # fc weight stored pre-reshaped to (T, H, C):
        #   flatten(x) @ fc_w == sum_{t,h} x[t,h] * fc_w3[t,h,:]
        fc_w3=_rnd(k_fc, (T, P, C)), fc_b=jnp.zeros((1, C), jnp.float32))

    return dict(temporal=temporal, contextual=contextual, fusion=fusion)


# ------------------------------------ main ------------------------------------

if __name__ == "__main__":
    cfg = dict(temporal_seq_len=8, packet_len=32, freqs_size=32,
               agg_scale_num=2, agg_points_num=4, num_heads=2,
               num_layers=2, num_classes=5)
    B = 2
    ctx_seq = cfg["agg_scale_num"] * cfg["agg_points_num"]

    key = jax.random.PRNGKey(0)
    k_p, k_t, k_c, k_s = jax.random.split(key, 4)
    params = init_params(k_p, cfg)

    temporal_data = jax.random.normal(
        k_t, (B, cfg["temporal_seq_len"], cfg["packet_len"]), jnp.float32)
    temporal_valid_len = jnp.array([cfg["temporal_seq_len"], 5], dtype=jnp.int32)
    contextual_data = jax.random.normal(
        k_c, (B, ctx_seq, cfg["freqs_size"]), jnp.float32)
    contextual_segments = jax.random.randint(
        k_s, (B, ctx_seq), 0, cfg["agg_scale_num"])

    fwd = jax.jit(functools.partial(traffic_scope_fwd, nh=cfg["num_heads"]))
    out = fwd(params, temporal_data, temporal_valid_len,
              contextual_data, contextual_segments)
    out = jax.block_until_ready(out)

    assert out.shape == (B, cfg["num_classes"])
    assert bool(jnp.all(jnp.isfinite(out)))
    assert bool(jnp.allclose(jnp.sum(out, axis=-1), 1.0, atol=1e-5))
    print("KERNEL_OK")
</pallas_src>

<mosaic_0001>
module attributes {stable_mosaic.version = 11 : i64} {
  func.func @_traffic_scope_kernel(%arg0: i32, %arg1: memref<2xi32, #tpu.memory_space<smem>>, %arg2: memref<2x8xi32, #tpu.memory_space<smem>>, %arg3: memref<1x8x32xf32, #tpu.memory_space<vmem>>, %arg4: memref<1x8x32xf32, #tpu.memory_space<vmem>>, %arg5: memref<32x32xf32, #tpu.memory_space<vmem>>, %arg6: memref<1x32xf32, #tpu.memory_space<vmem>>, %arg7: memref<8x32xf32, #tpu.memory_space<vmem>>, %arg8: memref<2x3x32x32xf32, #tpu.memory_space<vmem>>, %arg9: memref<2x32x32xf32, #tpu.memory_space<vmem>>, %arg10: memref<2x32x64xf32, #tpu.memory_space<vmem>>, %arg11: memref<2x1x64xf32, #tpu.memory_space<vmem>>, %arg12: memref<2x64x32xf32, #tpu.memory_space<vmem>>, %arg13: memref<2x1x32xf32, #tpu.memory_space<vmem>>, %arg14: memref<2x8x32xf32, #tpu.memory_space<vmem>>, %arg15: memref<2x8x32xf32, #tpu.memory_space<vmem>>, %arg16: memref<2x8x32xf32, #tpu.memory_space<vmem>>, %arg17: memref<2x8x32xf32, #tpu.memory_space<vmem>>, %arg18: memref<32x32xf32, #tpu.memory_space<vmem>>, %arg19: memref<1x32xf32, #tpu.memory_space<vmem>>, %arg20: memref<8x32xf32, #tpu.memory_space<vmem>>, %arg21: memref<2x3x32x32xf32, #tpu.memory_space<vmem>>, %arg22: memref<2x32x32xf32, #tpu.memory_space<vmem>>, %arg23: memref<2x32x64xf32, #tpu.memory_space<vmem>>, %arg24: memref<2x1x64xf32, #tpu.memory_space<vmem>>, %arg25: memref<2x64x32xf32, #tpu.memory_space<vmem>>, %arg26: memref<2x1x32xf32, #tpu.memory_space<vmem>>, %arg27: memref<2x8x32xf32, #tpu.memory_space<vmem>>, %arg28: memref<2x8x32xf32, #tpu.memory_space<vmem>>, %arg29: memref<2x8x32xf32, #tpu.memory_space<vmem>>, %arg30: memref<2x8x32xf32, #tpu.memory_space<vmem>>, %arg31: memref<2x32xf32, #tpu.memory_space<vmem>>, %arg32: memref<32x32xf32, #tpu.memory_space<vmem>>, %arg33: memref<1x32xf32, #tpu.memory_space<vmem>>, %arg34: memref<32x32xf32, #tpu.memory_space<vmem>>, %arg35: memref<1x32xf32, #tpu.memory_space<vmem>>, %arg36: memref<32x32xf32, #tpu.memory_space<vmem>>, %arg37: memref<1x32xf32, #tpu.memory_space<vmem>>, %arg38: memref<32x64xf32, #tpu.memory_space<vmem>>, %arg39: memref<1x64xf32, #tpu.memory_space<vmem>>, %arg40: memref<64x32xf32, #tpu.memory_space<vmem>>, %arg41: memref<1x32xf32, #tpu.memory_space<vmem>>, %arg42: memref<8x32xf32, #tpu.memory_space<vmem>>, %arg43: memref<8x32xf32, #tpu.memory_space<vmem>>, %arg44: memref<8x32xf32, #tpu.memory_space<vmem>>, %arg45: memref<8x32xf32, #tpu.memory_space<vmem>>, %arg46: memref<8x32x5xf32, #tpu.memory_space<vmem>>, %arg47: memref<1x5xf32, #tpu.memory_space<vmem>>, %arg48: memref<1x1x5xf32, #tpu.memory_space<vmem>>) attributes {dimension_semantics = [#tpu.dimension_semantics<parallel>], iteration_bounds = array<i64: 2>, scalar_prefetch = 2 : i64, scratch_operands = 0 : i64, tpu.core_type = #tpu.core_type<tc>, window_params = [{transform_indices = @transform_0, window_bounds = array<i64: 1, 8, 32>}, {transform_indices = @transform_1, window_bounds = array<i64: 1, 8, 32>}, {pipeline_mode = #tpu.pipeline_mode<synchronous>, transform_indices = @transform_2, window_bounds = array<i64: 32, 32>}, {pipeline_mode = #tpu.pipeline_mode<synchronous>, transform_indices = @transform_3, window_bounds = array<i64: 1, 32>}, {pipeline_mode = #tpu.pipeline_mode<synchronous>, transform_indices = @transform_4, window_bounds = array<i64: 8, 32>}, {pipeline_mode = #tpu.pipeline_mode<synchronous>, transform_indices = @transform_5, window_bounds = array<i64: 2, 3, 32, 32>}, {pipeline_mode = #tpu.pipeline_mode<synchronous>, transform_indices = @transform_6, window_bounds = array<i64: 2, 32, 32>}, {pipeline_mode = #tpu.pipeline_mode<synchronous>, transform_indices = @transform_7, window_bounds = array<i64: 2, 32, 64>}, {pipeline_mode = #tpu.pipeline_mode<synchronous>, transform_indices = @transform_8, window_bounds = array<i64: 2, 1, 64>}, {pipeline_mode = #tpu.pipeline_mode<synchronous>, transform_indices = @transform_9, window_bounds = array<i64: 2, 64, 32>}, {pipeline_mode = #tpu.pipeline_mode<synchronous>, transform_indices = @transform_10, window_bounds = array<i64: 2, 1, 32>}, {pipeline_mode = #tpu.pipeline_mode<synchronous>, transform_indices = @transform_11, window_bounds = array<i64: 2, 8, 32>}, {pipeline_mode = #tpu.pipeline_mode<synchronous>, transform_indices = @transform_12, window_bounds = array<i64: 2, 8, 32>}, {pipeline_mode = #tpu.pipeline_mode<synchronous>, transform_indices = @transform_13, window_bounds = array<i64: 2, 8, 32>}, {pipeline_mode = #tpu.pipeline_mode<synchronous>, transform_indices = @transform_14, window_bounds = array<i64: 2, 8, 32>}, {pipeline_mode = #tpu.pipeline_mode<synchronous>, transform_indices = @transform_15, window_bounds = array<i64: 32, 32>}, {pipeline_mode = #tpu.pipeline_mode<synchronous>, transform_indices = @transform_16, window_bounds = array<i64: 1, 32>}, {pipeline_mode = #tpu.pipeline_mode<synchronous>, transform_indices = @transform_17, window_bounds = array<i64: 8, 32>}, {pipeline_mode = #tpu.pipeline_mode<synchronous>, transform_indices = @transform_18, window_bounds = array<i64: 2, 3, 32, 32>}, {pipeline_mode = #tpu.pipeline_mode<synchronous>, transform_indices = @transform_19, window_bounds = array<i64: 2, 32, 32>}, {pipeline_mode = #tpu.pipeline_mode<synchronous>, transform_indices = @transform_20, window_bounds = array<i64: 2, 32, 64>}, {pipeline_mode = #tpu.pipeline_mode<synchronous>, transform_indices = @transform_21, window_bounds = array<i64: 2, 1, 64>}, {pipeline_mode = #tpu.pipeline_mode<synchronous>, transform_indices = @transform_22, window_bounds = array<i64: 2, 64, 32>}, {pipeline_mode = #tpu.pipeline_mode<synchronous>, transform_indices = @transform_23, window_bounds = array<i64: 2, 1, 32>}, {pipeline_mode = #tpu.pipeline_mode<synchronous>, transform_indices = @transform_24, window_bounds = array<i64: 2, 8, 32>}, {pipeline_mode = #tpu.pipeline_mode<synchronous>, transform_indices = @transform_25, window_bounds = array<i64: 2, 8, 32>}, {pipeline_mode = #tpu.pipeline_mode<synchronous>, transform_indices = @transform_26, window_bounds = array<i64: 2, 8, 32>}, {pipeline_mode = #tpu.pipeline_mode<synchronous>, transform_indices = @transform_27, window_bounds = array<i64: 2, 8, 32>}, {pipeline_mode = #tpu.pipeline_mode<synchronous>, transform_indices = @transform_28, window_bounds = array<i64: 2, 32>}, {pipeline_mode = #tpu.pipeline_mode<synchronous>, transform_indices = @transform_29, window_bounds = array<i64: 32, 32>}, {pipeline_mode = #tpu.pipeline_mode<synchronous>, transform_indices = @transform_30, window_bounds = array<i64: 1, 32>}, {pipeline_mode = #tpu.pipeline_mode<synchronous>, transform_indices = @transform_31, window_bounds = array<i64: 32, 32>}, {pipeline_mode = #tpu.pipeline_mode<synchronous>, transform_indices = @transform_32, window_bounds = array<i64: 1, 32>}, {pipeline_mode = #tpu.pipeline_mode<synchronous>, transform_indices = @transform_33, window_bounds = array<i64: 32, 32>}, {pipeline_mode = #tpu.pipeline_mode<synchronous>, transform_indices = @transform_34, window_bounds = array<i64: 1, 32>}, {pipeline_mode = #tpu.pipeline_mode<synchronous>, transform_indices = @transform_35, window_bounds = array<i64: 32, 64>}, {pipeline_mode = #tpu.pipeline_mode<synchronous>, transform_indices = @transform_36, window_bounds = array<i64: 1, 64>}, {pipeline_mode = #tpu.pipeline_mode<synchronous>, transform_indices = @transform_37, window_bounds = array<i64: 64, 32>}, {pipeline_mode = #tpu.pipeline_mode<synchronous>, transform_indices = @transform_38, window_bounds = array<i64: 1, 32>}, {pipeline_mode = #tpu.pipeline_mode<synchronous>, transform_indices = @transform_39, window_bounds = array<i64: 8, 32>}, {pipeline_mode = #tpu.pipeline_mode<synchronous>, transform_indices = @transform_40, window_bounds = array<i64: 8, 32>}, {pipeline_mode = #tpu.pipeline_mode<synchronous>, transform_indices = @transform_41, window_bounds = array<i64: 8, 32>}, {pipeline_mode = #tpu.pipeline_mode<synchronous>, transform_indices = @transform_42, window_bounds = array<i64: 8, 32>}, {pipeline_mode = #tpu.pipeline_mode<synchronous>, transform_indices = @transform_43, window_bounds = array<i64: 8, 32, 5>}, {pipeline_mode = #tpu.pipeline_mode<synchronous>, transform_indices = @transform_44, window_bounds = array<i64: 1, 5>}, {transform_indices = @transform_45, window_bounds = array<i64: 1, 1, 5>}]} {
    %0 = arith.index_cast %arg0 : i32 to index
    %1 = memref.load %arg1[%0] : memref<2xi32, #tpu.memory_space<smem>>
    %2 = tpu.iota {dimensions = array<i32: 2>} : vector<1x1x8xi32>
    %3 = vector.broadcast %1 : i32 to vector<1x1x8xi32>
    %4 = arith.cmpi slt, %2, %3 : vector<1x1x8xi32>
    %c0 = arith.constant 0 : index
    %c0_0 = arith.constant 0 : index
    %c0_1 = arith.constant 0 : index
    %5 = vector.load %arg3[%c0, %c0_0, %c0_1] : memref<1x8x32xf32, #tpu.memory_space<vmem>>, vector<1x8x32xf32>
    %6 = vector.shape_cast %5 : vector<1x8x32xf32> to vector<8x32xf32>
    %c0_2 = arith.constant 0 : index
    %c0_3 = arith.constant 0 : index
    %7 = vector.load %arg7[%c0_2, %c0_3] : memref<8x32xf32, #tpu.memory_space<vmem>>, vector<8x32xf32>
    %c0_4 = arith.constant 0 : index
    %c0_5 = arith.constant 0 : index
    %8 = vector.load %arg5[%c0_4, %c0_5] : memref<32x32xf32, #tpu.memory_space<vmem>>, vector<32x32xf32>
    %cst = arith.constant dense<0.000000e+00> : vector<8x32xf32>
    %9 = tpu.matmul %6, %8, %cst {dimension_numbers = #tpu.dot_dimension_numbers<[1], [0], [0], [1], [0, 0, 1, 1], [], []>} : vector<8x32xf32>, vector<32x32xf32>, vector<8x32xf32> -> vector<8x32xf32>
    %c0_6 = arith.constant 0 : index
    %c0_7 = arith.constant 0 : index
    %10 = vector.load %arg6[%c0_6, %c0_7] : memref<1x32xf32, #tpu.memory_space<vmem>>, vector<1x32xf32>
    %11 = vector.broadcast %10 : vector<1x32xf32> to vector<8x32xf32>
    %12 = arith.addf %9, %11 : vector<8x32xf32>
    %cst_8 = arith.constant 0.000000e+00 : f32
    %13 = vector.broadcast %cst_8 : f32 to vector<8x32xf32>
    %14 = arith.maximumf %12, %13 : vector<8x32xf32>
    %cst_9 = arith.constant 5.65685415 : f32
    %15 = vector.broadcast %cst_9 : f32 to vector<8x32xf32>
    %16 = arith.mulf %14, %15 : vector<8x32xf32>
    %17 = arith.addf %16, %7 : vector<8x32xf32>
    %c0_10 = arith.constant 0 : index
    %c0_11 = arith.constant 0 : index
    %c0_12 = arith.constant 0 : index
    %c0_13 = arith.constant 0 : index
    %18 = vector.load %arg8[%c0_10, %c0_11, %c0_12, %c0_13] : memref<2x3x32x32xf32, #tpu.memory_space<vmem>>, vector<1x1x32x32xf32>
    %19 = vector.shape_cast %18 : vector<1x1x32x32xf32> to vector<32x32xf32>
    %cst_14 = arith.constant dense<0.000000e+00> : vector<8x32xf32>
    %20 = tpu.matmul %17, %19, %cst_14 {dimension_numbers = #tpu.dot_dimension_numbers<[1], [0], [0], [1], [0, 0, 1, 1], [], []>} : vector<8x32xf32>, vector<32x32xf32>, vector<8x32xf32> -> vector<8x32xf32>
    %c0_15 = arith.constant 0 : index
    %c1 = arith.constant 1 : index
    %c0_16 = arith.constant 0 : index
    %c0_17 = arith.constant 0 : index
    %21 = vector.load %arg8[%c0_15, %c1, %c0_16, %c0_17] : memref<2x3x32x32xf32, #tpu.memory_space<vmem>>, vector<1x1x32x32xf32>
    %22 = vector.shape_cast %21 : vector<1x1x32x32xf32> to vector<32x32xf32>
    %cst_18 = arith.constant dense<0.000000e+00> : vector<8x32xf32>
    %23 = tpu.matmul %17, %22, %cst_18 {dimension_numbers = #tpu.dot_dimension_numbers<[1], [0], [0], [1], [0, 0, 1, 1], [], []>} : vector<8x32xf32>, vector<32x32xf32>, vector<8x32xf32> -> vector<8x32xf32>
    %c0_19 = arith.constant 0 : index
    %c2 = arith.constant 2 : index
    %c0_20 = arith.constant 0 : index
    %c0_21 = arith.constant 0 : index
    %24 = vector.load %arg8[%c0_19, %c2, %c0_20, %c0_21] : memref<2x3x32x32xf32, #tpu.memory_space<vmem>>, vector<1x1x32x32xf32>
    %25 = vector.shape_cast %24 : vector<1x1x32x32xf32> to vector<32x32xf32>
    %cst_22 = arith.constant dense<0.000000e+00> : vector<8x32xf32>
    %26 = tpu.matmul %17, %25, %cst_22 {dimension_numbers = #tpu.dot_dimension_numbers<[1], [0], [0], [1], [0, 0, 1, 1], [], []>} : vector<8x32xf32>, vector<32x32xf32>, vector<8x32xf32> -> vector<8x32xf32>
    %27 = vector.extract_strided_slice %20 {offsets = [0, 0], sizes = [8, 16], strides = [1, 1]} : vector<8x32xf32> to vector<8x16xf32>
    %28 = vector.extract_strided_slice %20 {offsets = [0, 16], sizes = [8, 16], strides = [1, 1]} : vector<8x32xf32> to vector<8x16xf32>
    %29 = vector.shape_cast %27 : vector<8x16xf32> to vector<1x8x16xf32>
    %30 = vector.shape_cast %28 : vector<8x16xf32> to vector<1x8x16xf32>
    %31 = tpu.concatenate %29, %30 in 0 : vector<1x8x16xf32>, vector<1x8x16xf32> -> vector<2x8x16xf32>
    %32 = vector.extract_strided_slice %23 {offsets = [0, 0], sizes = [8, 16], strides = [1, 1]} : vector<8x32xf32> to vector<8x16xf32>
    %33 = vector.extract_strided_slice %23 {offsets = [0, 16], sizes = [8, 16], strides = [1, 1]} : vector<8x32xf32> to vector<8x16xf32>
    %34 = vector.shape_cast %32 : vector<8x16xf32> to vector<1x8x16xf32>
    %35 = vector.shape_cast %33 : vector<8x16xf32> to vector<1x8x16xf32>
    %36 = tpu.concatenate %34, %35 in 0 : vector<1x8x16xf32>, vector<1x8x16xf32> -> vector<2x8x16xf32>
    %37 = vector.extract_strided_slice %26 {offsets = [0, 0], sizes = [8, 16], strides = [1, 1]} : vector<8x32xf32> to vector<8x16xf32>
    %38 = vector.extract_strided_slice %26 {offsets = [0, 16], sizes = [8, 16], strides = [1, 1]} : vector<8x32xf32> to vector<8x16xf32>
    %39 = vector.shape_cast %37 : vector<8x16xf32> to vector<1x8x16xf32>
    %40 = vector.shape_cast %38 : vector<8x16xf32> to vector<1x8x16xf32>
    %41 = tpu.concatenate %39, %40 in 0 : vector<1x8x16xf32>, vector<1x8x16xf32> -> vector<2x8x16xf32>
    "tpu.trace_start"() <{level = 10 : i32, message = "hqd,hkd->hqk"}> : () -> ()
    %cst_23 = arith.constant dense<0.000000e+00> : vector<2x8x8xf32>
    %42 = tpu.matmul %31, %36, %cst_23 {dimension_numbers = #tpu.dot_dimension_numbers<[2], [2], [1], [1], [0, 0, 0, 1, 1, 1], [0], [0]>} : vector<2x8x16xf32>, vector<2x8x16xf32>, vector<2x8x8xf32> -> vector<2x8x8xf32>
    "tpu.trace_stop"() : () -> ()
    %cst_24 = arith.constant 2.500000e-01 : f32
    %43 = vector.broadcast %cst_24 : f32 to vector<2x8x8xf32>
    %44 = arith.mulf %42, %43 : vector<2x8x8xf32>
    %cst_25 = arith.constant -1.000000e+06 : f32
    %45 = vector.shape_cast %4 : vector<1x1x8xi1> to vector<1x1x8xi1>
    %46 = vector.broadcast %45 : vector<1x1x8xi1> to vector<2x8x8xi1>
    %47 = vector.broadcast %cst_25 : f32 to vector<2x8x8xf32>
    %48 = arith.select %46, %44, %47 : vector<2x8x8xi1>, vector<2x8x8xf32>
    %cst_26 = arith.constant dense<0xFF800000> : vector<2x8xf32>
    %49 = vector.multi_reduction <maximumf>, %48, %cst_26 [2] : vector<2x8x8xf32> to vector<2x8xf32>
    %50 = vector.shape_cast %49 : vector<2x8xf32> to vector<2x8x1xf32>
    %51 = vector.broadcast %50 : vector<2x8x1xf32> to vector<2x8x8xf32>
    %52 = arith.subf %48, %51 : vector<2x8x8xf32>
    %53 = math.exp %52 : vector<2x8x8xf32>
    %cst_27 = arith.constant dense<0.000000e+00> : vector<2x8xf32>
    %54 = vector.multi_reduction <add>, %53, %cst_27 [2] : vector<2x8x8xf32> to vector<2x8xf32>
    %55 = vector.shape_cast %54 : vector<2x8xf32> to vector<2x8x1xf32>
    %56 = tpu.reciprocal %55 {approx = true} : vector<2x8x1xf32> -> vector<2x8x1xf32>
    %57 = vector.broadcast %56 : vector<2x8x1xf32> to vector<2x8x8xf32>
    %58 = arith.mulf %53, %57 : vector<2x8x8xf32>
    "tpu.trace_start"() <{level = 10 : i32, message = "hqk,hkd->hqd"}> : () -> ()
    %cst_28 = arith.constant dense<0.000000e+00> : vector<2x8x16xf32>
    %59 = tpu.matmul %58, %41, %cst_28 {dimension_numbers = #tpu.dot_dimension_numbers<[2], [1], [1], [2], [0, 0, 0, 1, 1, 2], [0], [0]>} : vector<2x8x8xf32>, vector<2x8x16xf32>, vector<2x8x16xf32> -> vector<2x8x16xf32>
    "tpu.trace_stop"() : () -> ()
    %60 = vector.extract_strided_slice %59 {offsets = [0, 0, 0], sizes = [1, 8, 16], strides = [1, 1, 1]} : vector<2x8x16xf32> to vector<1x8x16xf32>
    %61 = vector.shape_cast %60 : vector<1x8x16xf32> to vector<8x16xf32>
    %62 = vector.extract_strided_slice %59 {offsets = [1, 0, 0], sizes = [1, 8, 16], strides = [1, 1, 1]} : vector<2x8x16xf32> to vector<1x8x16xf32>
    %63 = vector.shape_cast %62 : vector<1x8x16xf32> to vector<8x16xf32>
    %64 = tpu.concatenate %61, %63 in 1 : vector<8x16xf32>, vector<8x16xf32> -> vector<8x32xf32>
    %c0_29 = arith.constant 0 : index
    %c0_30 = arith.constant 0 : index
    %c0_31 = arith.constant 0 : index
    %65 = vector.load %arg9[%c0_29, %c0_30, %c0_31] : memref<2x32x32xf32, #tpu.memory_space<vmem>>, vector<1x32x32xf32>
    %66 = vector.shape_cast %65 : vector<1x32x32xf32> to vector<32x32xf32>
    %cst_32 = arith.constant dense<0.000000e+00> : vector<8x32xf32>
    %67 = tpu.matmul %64, %66, %cst_32 {dimension_numbers = #tpu.dot_dimension_numbers<[1], [0], [0], [1], [0, 0, 1, 1], [], []>} : vector<8x32xf32>, vector<32x32xf32>, vector<8x32xf32> -> vector<8x32xf32>
    %68 = arith.addf %17, %67 : vector<8x32xf32>
    %c0_33 = arith.constant 0 : index
    %c0_34 = arith.constant 0 : index
    %c0_35 = arith.constant 0 : index
    %69 = vector.load %arg14[%c0_33, %c0_34, %c0_35] : memref<2x8x32xf32, #tpu.memory_space<vmem>>, vector<1x8x32xf32>
    %70 = vector.shape_cast %69 : vector<1x8x32xf32> to vector<8x32xf32>
    %c0_36 = arith.constant 0 : index
    %c0_37 = arith.constant 0 : index
    %c0_38 = arith.constant 0 : index
    %71 = vector.load %arg15[%c0_36, %c0_37, %c0_38] : memref<2x8x32xf32, #tpu.memory_space<vmem>>, vector<1x8x32xf32>
    %72 = vector.shape_cast %71 : vector<1x8x32xf32> to vector<8x32xf32>
    %73 = vector.shape_cast %68 : vector<8x32xf32> to vector<1x8x32xf32>
    %cst_39 = arith.constant dense<0.000000e+00> : vector<1xf32>
    %74 = vector.multi_reduction <add>, %73, %cst_39 [1, 2] : vector<1x8x32xf32> to vector<1xf32>
    %75 = vector.shape_cast %74 : vector<1xf32> to vector<1x1x1xf32>
    %76 = vector.extract %75[0, 0, 0] : f32 from vector<1x1x1xf32>
    %77 = vector.broadcast %76 : f32 to vector<1x1xf32>
    %cst_40 = arith.constant 2.560000e+02 : f32
    %78 = vector.broadcast %cst_40 : f32 to vector<1x1xf32>
    %79 = arith.divf %77, %78 : vector<1x1xf32>
    %80 = vector.broadcast %79 : vector<1x1xf32> to vector<8x32xf32>
    %81 = arith.subf %68, %80 : vector<8x32xf32>
    %82 = arith.mulf %81, %81 : vector<8x32xf32>
    %83 = vector.shape_cast %82 : vector<8x32xf32> to vector<1x8x32xf32>
    %cst_41 = arith.constant dense<0.000000e+00> : vector<1xf32>
    %84 = vector.multi_reduction <add>, %83, %cst_41 [1, 2] : vector<1x8x32xf32> to vector<1xf32>
    %85 = vector.shape_cast %84 : vector<1xf32> to vector<1x1x1xf32>
    %86 = vector.extract %85[0, 0, 0] : f32 from vector<1x1x1xf32>
    %87 = vector.broadcast %86 : f32 to vector<1x1xf32>
    %cst_42 = arith.constant 2.560000e+02 : f32
    %88 = vector.broadcast %cst_42 : f32 to vector<1x1xf32>
    %89 = arith.divf %87, %88 : vector<1x1xf32>
    %90 = vector.broadcast %79 : vector<1x1xf32> to vector<8x32xf32>
    %91 = arith.subf %68, %90 : vector<8x32xf32>
    %cst_43 = arith.constant 9.99999974E-6 : f32
    %92 = vector.broadcast %cst_43 : f32 to vector<1x1xf32>
    %93 = arith.addf %89, %92 : vector<1x1xf32>
    %94 = math.rsqrt %93 : vector<1x1xf32>
    %95 = vector.broadcast %94 : vector<1x1xf32> to vector<8x32xf32>
    %96 = arith.mulf %91, %95 : vector<8x32xf32>
    %97 = arith.mulf %96, %70 : vector<8x32xf32>
    %98 = arith.addf %97, %72 : vector<8x32xf32>
    %c0_44 = arith.constant 0 : index
    %c0_45 = arith.constant 0 : index
    %c0_46 = arith.constant 0 : index
    %99 = vector.load %arg10[%c0_44, %c0_45, %c0_46] : memref<2x32x64xf32, #tpu.memory_space<vmem>>, vector<1x32x64xf32>
    %100 = vector.shape_cast %99 : vector<1x32x64xf32> to vector<32x64xf32>
    %cst_47 = arith.constant dense<0.000000e+00> : vector<8x64xf32>
    %101 = tpu.matmul %98, %100, %cst_47 {dimension_numbers = #tpu.dot_dimension_numbers<[1], [0], [0], [1], [0, 0, 1, 1], [], []>} : vector<8x32xf32>, vector<32x64xf32>, vector<8x64xf32> -> vector<8x64xf32>
    %c0_48 = arith.constant 0 : index
    %c0_49 = arith.constant 0 : index
    %c0_50 = arith.constant 0 : index
    %102 = vector.load %arg11[%c0_48, %c0_49, %c0_50] : memref<2x1x64xf32, #tpu.memory_space<vmem>>, vector<1x1x64xf32>
    %103 = vector.shape_cast %102 : vector<1x1x64xf32> to vector<1x64xf32>
    %104 = vector.broadcast %103 : vector<1x64xf32> to vector<8x64xf32>
    %105 = arith.addf %101, %104 : vector<8x64xf32>
    %cst_51 = arith.constant 0.000000e+00 : f32
    %106 = vector.broadcast %cst_51 : f32 to vector<8x64xf32>
    %107 = arith.maximumf %105, %106 : vector<8x64xf32>
    %c0_52 = arith.constant 0 : index
    %c0_53 = arith.constant 0 : index
    %c0_54 = arith.constant 0 : index
    %108 = vector.load %arg12[%c0_52, %c0_53, %c0_54] : memref<2x64x32xf32, #tpu.memory_space<vmem>>, vector<1x64x32xf32>
    %109 = vector.shape_cast %108 : vector<1x64x32xf32> to vector<64x32xf32>
    %cst_55 = arith.constant dense<0.000000e+00> : vector<8x32xf32>
    %110 = tpu.matmul %107, %109, %cst_55 {dimension_numbers = #tpu.dot_dimension_numbers<[1], [0], [0], [1], [0, 0, 1, 1], [], []>} : vector<8x64xf32>, vector<64x32xf32>, vector<8x32xf32> -> vector<8x32xf32>
    %c0_56 = arith.constant 0 : index
    %c0_57 = arith.constant 0 : index
    %c0_58 = arith.constant 0 : index
    %111 = vector.load %arg13[%c0_56, %c0_57, %c0_58] : memref<2x1x32xf32, #tpu.memory_space<vmem>>, vector<1x1x32xf32>
    %112 = vector.shape_cast %111 : vector<1x1x32xf32> to vector<1x32xf32>
    %113 = vector.broadcast %112 : vector<1x32xf32> to vector<8x32xf32>
    %114 = arith.addf %110, %113 : vector<8x32xf32>
    %115 = arith.addf %98, %114 : vector<8x32xf32>
    %c0_59 = arith.constant 0 : index
    %c0_60 = arith.constant 0 : index
    %c0_61 = arith.constant 0 : index
    %116 = vector.load %arg16[%c0_59, %c0_60, %c0_61] : memref<2x8x32xf32, #tpu.memory_space<vmem>>, vector<1x8x32xf32>
    %117 = vector.shape_cast %116 : vector<1x8x32xf32> to vector<8x32xf32>
    %c0_62 = arith.constant 0 : index
    %c0_63 = arith.constant 0 : index
    %c0_64 = arith.constant 0 : index
    %118 = vector.load %arg17[%c0_62, %c0_63, %c0_64] : memref<2x8x32xf32, #tpu.memory_space<vmem>>, vector<1x8x32xf32>
    %119 = vector.shape_cast %118 : vector<1x8x32xf32> to vector<8x32xf32>
    %120 = vector.shape_cast %115 : vector<8x32xf32> to vector<1x8x32xf32>
    %cst_65 = arith.constant dense<0.000000e+00> : vector<1xf32>
    %121 = vector.multi_reduction <add>, %120, %cst_65 [1, 2] : vector<1x8x32xf32> to vector<1xf32>
    %122 = vector.shape_cast %121 : vector<1xf32> to vector<1x1x1xf32>
    %123 = vector.extract %122[0, 0, 0] : f32 from vector<1x1x1xf32>
    %124 = vector.broadcast %123 : f32 to vector<1x1xf32>
    %cst_66 = arith.constant 2.560000e+02 : f32
    %125 = vector.broadcast %cst_66 : f32 to vector<1x1xf32>
    %126 = arith.divf %124, %125 : vector<1x1xf32>
    %127 = vector.broadcast %126 : vector<1x1xf32> to vector<8x32xf32>
    %128 = arith.subf %115, %127 : vector<8x32xf32>
    %129 = arith.mulf %128, %128 : vector<8x32xf32>
    %130 = vector.shape_cast %129 : vector<8x32xf32> to vector<1x8x32xf32>
    %cst_67 = arith.constant dense<0.000000e+00> : vector<1xf32>
    %131 = vector.multi_reduction <add>, %130, %cst_67 [1, 2] : vector<1x8x32xf32> to vector<1xf32>
    %132 = vector.shape_cast %131 : vector<1xf32> to vector<1x1x1xf32>
    %133 = vector.extract %132[0, 0, 0] : f32 from vector<1x1x1xf32>
    %134 = vector.broadcast %133 : f32 to vector<1x1xf32>
    %cst_68 = arith.constant 2.560000e+02 : f32
    %135 = vector.broadcast %cst_68 : f32 to vector<1x1xf32>
    %136 = arith.divf %134, %135 : vector<1x1xf32>
    %137 = vector.broadcast %126 : vector<1x1xf32> to vector<8x32xf32>
    %138 = arith.subf %115, %137 : vector<8x32xf32>
    %cst_69 = arith.constant 9.99999974E-6 : f32
    %139 = vector.broadcast %cst_69 : f32 to vector<1x1xf32>
    %140 = arith.addf %136, %139 : vector<1x1xf32>
    %141 = math.rsqrt %140 : vector<1x1xf32>
    %142 = vector.broadcast %141 : vector<1x1xf32> to vector<8x32xf32>
    %143 = arith.mulf %138, %142 : vector<8x32xf32>
    %144 = arith.mulf %143, %117 : vector<8x32xf32>
    %145 = arith.addf %144, %119 : vector<8x32xf32>
    %c1_70 = arith.constant 1 : index
    %c0_71 = arith.constant 0 : index
    %c0_72 = arith.constant 0 : index
    %c0_73 = arith.constant 0 : index
    %146 = vector.load %arg8[%c1_70, %c0_71, %c0_72, %c0_73] : memref<2x3x32x32xf32, #tpu.memory_space<vmem>>, vector<1x1x32x32xf32>
    %147 = vector.shape_cast %146 : vector<1x1x32x32xf32> to vector<32x32xf32>
    %cst_74 = arith.constant dense<0.000000e+00> : vector<8x32xf32>
    %148 = tpu.matmul %145, %147, %cst_74 {dimension_numbers = #tpu.dot_dimension_numbers<[1], [0], [0], [1], [0, 0, 1, 1], [], []>} : vector<8x32xf32>, vector<32x32xf32>, vector<8x32xf32> -> vector<8x32xf32>
    %c1_75 = arith.constant 1 : index
    %c1_76 = arith.constant 1 : index
    %c0_77 = arith.constant 0 : index
    %c0_78 = arith.constant 0 : index
    %149 = vector.load %arg8[%c1_75, %c1_76, %c0_77, %c0_78] : memref<2x3x32x32xf32, #tpu.memory_space<vmem>>, vector<1x1x32x32xf32>
    %150 = vector.shape_cast %149 : vector<1x1x32x32xf32> to vector<32x32xf32>
    %cst_79 = arith.constant dense<0.000000e+00> : vector<8x32xf32>
    %151 = tpu.matmul %145, %150, %cst_79 {dimension_numbers = #tpu.dot_dimension_numbers<[1], [0], [0], [1], [0, 0, 1, 1], [], []>} : vector<8x32xf32>, vector<32x32xf32>, vector<8x32xf32> -> vector<8x32xf32>
    %c1_80 = arith.constant 1 : index
    %c2_81 = arith.constant 2 : index
    %c0_82 = arith.constant 0 : index
    %c0_83 = arith.constant 0 : index
    %152 = vector.load %arg8[%c1_80, %c2_81, %c0_82, %c0_83] : memref<2x3x32x32xf32, #tpu.memory_space<vmem>>, vector<1x1x32x32xf32>
    %153 = vector.shape_cast %152 : vector<1x1x32x32xf32> to vector<32x32xf32>
    %cst_84 = arith.constant dense<0.000000e+00> : vector<8x32xf32>
    %154 = tpu.matmul %145, %153, %cst_84 {dimension_numbers = #tpu.dot_dimension_numbers<[1], [0], [0], [1], [0, 0, 1, 1], [], []>} : vector<8x32xf32>, vector<32x32xf32>, vector<8x32xf32> -> vector<8x32xf32>
    %155 = vector.extract_strided_slice %148 {offsets = [0, 0], sizes = [8, 16], strides = [1, 1]} : vector<8x32xf32> to vector<8x16xf32>
    %156 = vector.extract_strided_slice %148 {offsets = [0, 16], sizes = [8, 16], strides = [1, 1]} : vector<8x32xf32> to vector<8x16xf32>
    %157 = vector.shape_cast %155 : vector<8x16xf32> to vector<1x8x16xf32>
    %158 = vector.shape_cast %156 : vector<8x16xf32> to vector<1x8x16xf32>
    %159 = tpu.concatenate %157, %158 in 0 : vector<1x8x16xf32>, vector<1x8x16xf32> -> vector<2x8x16xf32>
    %160 = vector.extract_strided_slice %151 {offsets = [0, 0], sizes = [8, 16], strides = [1, 1]} : vector<8x32xf32> to vector<8x16xf32>
    %161 = vector.extract_strided_slice %151 {offsets = [0, 16], sizes = [8, 16], strides = [1, 1]} : vector<8x32xf32> to vector<8x16xf32>
    %162 = vector.shape_cast %160 : vector<8x16xf32> to vector<1x8x16xf32>
    %163 = vector.shape_cast %161 : vector<8x16xf32> to vector<1x8x16xf32>
    %164 = tpu.concatenate %162, %163 in 0 : vector<1x8x16xf32>, vector<1x8x16xf32> -> vector<2x8x16xf32>
    %165 = vector.extract_strided_slice %154 {offsets = [0, 0], sizes = [8, 16], strides = [1, 1]} : vector<8x32xf32> to vector<8x16xf32>
    %166 = vector.extract_strided_slice %154 {offsets = [0, 16], sizes = [8, 16], strides = [1, 1]} : vector<8x32xf32> to vector<8x16xf32>
    %167 = vector.shape_cast %165 : vector<8x16xf32> to vector<1x8x16xf32>
    %168 = vector.shape_cast %166 : vector<8x16xf32> to vector<1x8x16xf32>
    %169 = tpu.concatenate %167, %168 in 0 : vector<1x8x16xf32>, vector<1x8x16xf32> -> vector<2x8x16xf32>
    "tpu.trace_start"() <{level = 10 : i32, message = "hqd,hkd->hqk"}> : () -> ()
    %cst_85 = arith.constant dense<0.000000e+00> : vector<2x8x8xf32>
    %170 = tpu.matmul %159, %164, %cst_85 {dimension_numbers = #tpu.dot_dimension_numbers<[2], [2], [1], [1], [0, 0, 0, 1, 1, 1], [0], [0]>} : vector<2x8x16xf32>, vector<2x8x16xf32>, vector<2x8x8xf32> -> vector<2x8x8xf32>
    "tpu.trace_stop"() : () -> ()
    %cst_86 = arith.constant 2.500000e-01 : f32
    %171 = vector.broadcast %cst_86 : f32 to vector<2x8x8xf32>
    %172 = arith.mulf %170, %171 : vector<2x8x8xf32>
    %cst_87 = arith.constant -1.000000e+06 : f32
    %173 = vector.shape_cast %4 : vector<1x1x8xi1> to vector<1x1x8xi1>
    %174 = vector.broadcast %173 : vector<1x1x8xi1> to vector<2x8x8xi1>
    %175 = vector.broadcast %cst_87 : f32 to vector<2x8x8xf32>
    %176 = arith.select %174, %172, %175 : vector<2x8x8xi1>, vector<2x8x8xf32>
    %cst_88 = arith.constant dense<0xFF800000> : vector<2x8xf32>
    %177 = vector.multi_reduction <maximumf>, %176, %cst_88 [2] : vector<2x8x8xf32> to vector<2x8xf32>
    %178 = vector.shape_cast %177 : vector<2x8xf32> to vector<2x8x1xf32>
    %179 = vector.broadcast %178 : vector<2x8x1xf32> to vector<2x8x8xf32>
    %180 = arith.subf %176, %179 : vector<2x8x8xf32>
    %181 = math.exp %180 : vector<2x8x8xf32>
    %cst_89 = arith.constant dense<0.000000e+00> : vector<2x8xf32>
    %182 = vector.multi_reduction <add>, %181, %cst_89 [2] : vector<2x8x8xf32> to vector<2x8xf32>
    %183 = vector.shape_cast %182 : vector<2x8xf32> to vector<2x8x1xf32>
    %184 = tpu.reciprocal %183 {approx = true} : vector<2x8x1xf32> -> vector<2x8x1xf32>
    %185 = vector.broadcast %184 : vector<2x8x1xf32> to vector<2x8x8xf32>
    %186 = arith.mulf %181, %185 : vector<2x8x8xf32>
    "tpu.trace_start"() <{level = 10 : i32, message = "hqk,hkd->hqd"}> : () -> ()
    %cst_90 = arith.constant dense<0.000000e+00> : vector<2x8x16xf32>
    %187 = tpu.matmul %186, %169, %cst_90 {dimension_numbers = #tpu.dot_dimension_numbers<[2], [1], [1], [2], [0, 0, 0, 1, 1, 2], [0], [0]>} : vector<2x8x8xf32>, vector<2x8x16xf32>, vector<2x8x16xf32> -> vector<2x8x16xf32>
    "tpu.trace_stop"() : () -> ()
    %188 = vector.extract_strided_slice %187 {offsets = [0, 0, 0], sizes = [1, 8, 16], strides = [1, 1, 1]} : vector<2x8x16xf32> to vector<1x8x16xf32>
    %189 = vector.shape_cast %188 : vector<1x8x16xf32> to vector<8x16xf32>
    %190 = vector.extract_strided_slice %187 {offsets = [1, 0, 0], sizes = [1, 8, 16], strides = [1, 1, 1]} : vector<2x8x16xf32> to vector<1x8x16xf32>
    %191 = vector.shape_cast %190 : vector<1x8x16xf32> to vector<8x16xf32>
    %192 = tpu.concatenate %189, %191 in 1 : vector<8x16xf32>, vector<8x16xf32> -> vector<8x32xf32>
    %c1_91 = arith.constant 1 : index
    %c0_92 = arith.constant 0 : index
    %c0_93 = arith.constant 0 : index
    %193 = vector.load %arg9[%c1_91, %c0_92, %c0_93] : memref<2x32x32xf32, #tpu.memory_space<vmem>>, vector<1x32x32xf32>
    %194 = vector.shape_cast %193 : vector<1x32x32xf32> to vector<32x32xf32>
    %cst_94 = arith.constant dense<0.000000e+00> : vector<8x32xf32>
    %195 = tpu.matmul %192, %194, %cst_94 {dimension_numbers = #tpu.dot_dimension_numbers<[1], [0], [0], [1], [0, 0, 1, 1], [], []>} : vector<8x32xf32>, vector<32x32xf32>, vector<8x32xf32> -> vector<8x32xf32>
    %196 = arith.addf %145, %195 : vector<8x32xf32>
    %c1_95 = arith.constant 1 : index
    %c0_96 = arith.constant 0 : index
    %c0_97 = arith.constant 0 : index
    %197 = vector.load %arg14[%c1_95, %c0_96, %c0_97] : memref<2x8x32xf32, #tpu.memory_space<vmem>>, vector<1x8x32xf32>
    %198 = vector.shape_cast %197 : vector<1x8x32xf32> to vector<8x32xf32>
    %c1_98 = arith.constant 1 : index
    %c0_99 = arith.constant 0 : index
    %c0_100 = arith.constant 0 : index
    %199 = vector.load %arg15[%c1_98, %c0_99, %c0_100] : memref<2x8x32xf32, #tpu.memory_space<vmem>>, vector<1x8x32xf32>
    %200 = vector.shape_cast %199 : vector<1x8x32xf32> to vector<8x32xf32>
    %201 = vector.shape_cast %196 : vector<8x32xf32> to vector<1x8x32xf32>
    %cst_101 = arith.constant dense<0.000000e+00> : vector<1xf32>
    %202 = vector.multi_reduction <add>, %201, %cst_101 [1, 2] : vector<1x8x32xf32> to vector<1xf32>
    %203 = vector.shape_cast %202 : vector<1xf32> to vector<1x1x1xf32>
    %204 = vector.extract %203[0, 0, 0] : f32 from vector<1x1x1xf32>
    %205 = vector.broadcast %204 : f32 to vector<1x1xf32>
    %cst_102 = arith.constant 2.560000e+02 : f32
    %206 = vector.broadcast %cst_102 : f32 to vector<1x1xf32>
    %207 = arith.divf %205, %206 : vector<1x1xf32>
    %208 = vector.broadcast %207 : vector<1x1xf32> to vector<8x32xf32>
    %209 = arith.subf %196, %208 : vector<8x32xf32>
    %210 = arith.mulf %209, %209 : vector<8x32xf32>
    %211 = vector.shape_cast %210 : vector<8x32xf32> to vector<1x8x32xf32>
    %cst_103 = arith.constant dense<0.000000e+00> : vector<1xf32>
    %212 = vector.multi_reduction <add>, %211, %cst_103 [1, 2] : vector<1x8x32xf32> to vector<1xf32>
    %213 = vector.shape_cast %212 : vector<1xf32> to vector<1x1x1xf32>
    %214 = vector.extract %213[0, 0, 0] : f32 from vector<1x1x1xf32>
    %215 = vector.broadcast %214 : f32 to vector<1x1xf32>
    %cst_104 = arith.constant 2.560000e+02 : f32
    %216 = vector.broadcast %cst_104 : f32 to vector<1x1xf32>
    %217 = arith.divf %215, %216 : vector<1x1xf32>
    %218 = vector.broadcast %207 : vector<1x1xf32> to vector<8x32xf32>
    %219 = arith.subf %196, %218 : vector<8x32xf32>
    %cst_105 = arith.constant 9.99999974E-6 : f32
    %220 = vector.broadcast %cst_105 : f32 to vector<1x1xf32>
    %221 = arith.addf %217, %220 : vector<1x1xf32>
    %222 = math.rsqrt %221 : vector<1x1xf32>
    %223 = vector.broadcast %222 : vector<1x1xf32> to vector<8x32xf32>
    %224 = arith.mulf %219, %223 : vector<8x32xf32>
    %225 = arith.mulf %224, %198 : vector<8x32xf32>
    %226 = arith.addf %225, %200 : vector<8x32xf32>
    %c1_106 = arith.constant 1 : index
    %c0_107 = arith.constant 0 : index
    %c0_108 = arith.constant 0 : index
    %227 = vector.load %arg10[%c1_106, %c0_107, %c0_108] : memref<2x32x64xf32, #tpu.memory_space<vmem>>, vector<1x32x64xf32>
    %228 = vector.shape_cast %227 : vector<1x32x64xf32> to vector<32x64xf32>
    %cst_109 = arith.constant dense<0.000000e+00> : vector<8x64xf32>
    %229 = tpu.matmul %226, %228, %cst_109 {dimension_numbers = #tpu.dot_dimension_numbers<[1], [0], [0], [1], [0, 0, 1, 1], [], []>} : vector<8x32xf32>, vector<32x64xf32>, vector<8x64xf32> -> vector<8x64xf32>
    %c1_110 = arith.constant 1 : index
    %c0_111 = arith.constant 0 : index
    %c0_112 = arith.constant 0 : index
    %230 = vector.load %arg11[%c1_110, %c0_111, %c0_112] : memref<2x1x64xf32, #tpu.memory_space<vmem>>, vector<1x1x64xf32>
    %231 = vector.shape_cast %230 : vector<1x1x64xf32> to vector<1x64xf32>
    %232 = vector.broadcast %231 : vector<1x64xf32> to vector<8x64xf32>
    %233 = arith.addf %229, %232 : vector<8x64xf32>
    %cst_113 = arith.constant 0.000000e+00 : f32
    %234 = vector.broadcast %cst_113 : f32 to vector<8x64xf32>
    %235 = arith.maximumf %233, %234 : vector<8x64xf32>
    %c1_114 = arith.constant 1 : index
    %c0_115 = arith.constant 0 : index
    %c0_116 = arith.constant 0 : index
    %236 = vector.load %arg12[%c1_114, %c0_115, %c0_116] : memref<2x64x32xf32, #tpu.memory_space<vmem>>, vector<1x64x32xf32>
    %237 = vector.shape_cast %236 : vector<1x64x32xf32> to vector<64x32xf32>
    %cst_117 = arith.constant dense<0.000000e+00> : vector<8x32xf32>
    %238 = tpu.matmul %235, %237, %cst_117 {dimension_numbers = #tpu.dot_dimension_numbers<[1], [0], [0], [1], [0, 0, 1, 1], [], []>} : vector<8x64xf32>, vector<64x32xf32>, vector<8x32xf32> -> vector<8x32xf32>
    %c1_118 = arith.constant 1 : index
    %c0_119 = arith.constant 0 : index
    %c0_120 = arith.constant 0 : index
    %239 = vector.load %arg13[%c1_118, %c0_119, %c0_120] : memref<2x1x32xf32, #tpu.memory_space<vmem>>, vector<1x1x32xf32>
    %240 = vector.shape_cast %239 : vector<1x1x32xf32> to vector<1x32xf32>
    %241 = vector.broadcast %240 : vector<1x32xf32> to vector<8x32xf32>
    %242 = arith.addf %238, %241 : vector<8x32xf32>
    %243 = arith.addf %226, %242 : vector<8x32xf32>
    %c1_121 = arith.constant 1 : index
    %c0_122 = arith.constant 0 : index
    %c0_123 = arith.constant 0 : index
    %244 = vector.load %arg16[%c1_121, %c0_122, %c0_123] : memref<2x8x32xf32, #tpu.memory_space<vmem>>, vector<1x8x32xf32>
    %245 = vector.shape_cast %244 : vector<1x8x32xf32> to vector<8x32xf32>
    %c1_124 = arith.constant 1 : index
    %c0_125 = arith.constant 0 : index
    %c0_126 = arith.constant 0 : index
    %246 = vector.load %arg17[%c1_124, %c0_125, %c0_126] : memref<2x8x32xf32, #tpu.memory_space<vmem>>, vector<1x8x32xf32>
    %247 = vector.shape_cast %246 : vector<1x8x32xf32> to vector<8x32xf32>
    %248 = vector.shape_cast %243 : vector<8x32xf32> to vector<1x8x32xf32>
    %cst_127 = arith.constant dense<0.000000e+00> : vector<1xf32>
    %249 = vector.multi_reduction <add>, %248, %cst_127 [1, 2] : vector<1x8x32xf32> to vector<1xf32>
    %250 = vector.shape_cast %249 : vector<1xf32> to vector<1x1x1xf32>
    %251 = vector.extract %250[0, 0, 0] : f32 from vector<1x1x1xf32>
    %252 = vector.broadcast %251 : f32 to vector<1x1xf32>
    %cst_128 = arith.constant 2.560000e+02 : f32
    %253 = vector.broadcast %cst_128 : f32 to vector<1x1xf32>
    %254 = arith.divf %252, %253 : vector<1x1xf32>
    %255 = vector.broadcast %254 : vector<1x1xf32> to vector<8x32xf32>
    %256 = arith.subf %243, %255 : vector<8x32xf32>
    %257 = arith.mulf %256, %256 : vector<8x32xf32>
    %258 = vector.shape_cast %257 : vector<8x32xf32> to vector<1x8x32xf32>
    %cst_129 = arith.constant dense<0.000000e+00> : vector<1xf32>
    %259 = vector.multi_reduction <add>, %258, %cst_129 [1, 2] : vector<1x8x32xf32> to vector<1xf32>
    %260 = vector.shape_cast %259 : vector<1xf32> to vector<1x1x1xf32>
    %261 = vector.extract %260[0, 0, 0] : f32 from vector<1x1x1xf32>
    %262 = vector.broadcast %261 : f32 to vector<1x1xf32>
    %cst_130 = arith.constant 2.560000e+02 : f32
    %263 = vector.broadcast %cst_130 : f32 to vector<1x1xf32>
    %264 = arith.divf %262, %263 : vector<1x1xf32>
    %265 = vector.broadcast %254 : vector<1x1xf32> to vector<8x32xf32>
    %266 = arith.subf %243, %265 : vector<8x32xf32>
    %cst_131 = arith.constant 9.99999974E-6 : f32
    %267 = vector.broadcast %cst_131 : f32 to vector<1x1xf32>
    %268 = arith.addf %264, %267 : vector<1x1xf32>
    %269 = math.rsqrt %268 : vector<1x1xf32>
    %270 = vector.broadcast %269 : vector<1x1xf32> to vector<8x32xf32>
    %271 = arith.mulf %266, %270 : vector<8x32xf32>
    %272 = arith.mulf %271, %245 : vector<8x32xf32>
    %273 = arith.addf %272, %247 : vector<8x32xf32>
    %274 = arith.index_cast %arg0 : i32 to index
    %c0_132 = arith.constant 0 : index
    %275 = memref.load %arg2[%274, %c0_132] : memref<2x8xi32, #tpu.memory_space<smem>>
    %276 = arith.index_cast %275 : i32 to index
    %c0_133 = arith.constant 0 : index
    %277 = vector.load %arg31[%276, %c0_133] : memref<2x32xf32, #tpu.memory_space<vmem>>, vector<1x32xf32>
    %278 = arith.index_cast %arg0 : i32 to index
    %c1_134 = arith.constant 1 : index
    %279 = memref.load %arg2[%278, %c1_134] : memref<2x8xi32, #tpu.memory_space<smem>>
    %280 = arith.index_cast %279 : i32 to index
    %c0_135 = arith.constant 0 : index
    %281 = vector.load %arg31[%280, %c0_135] : memref<2x32xf32, #tpu.memory_space<vmem>>, vector<1x32xf32>
    %282 = arith.index_cast %arg0 : i32 to index
    %c2_136 = arith.constant 2 : index
    %283 = memref.load %arg2[%282, %c2_136] : memref<2x8xi32, #tpu.memory_space<smem>>
    %284 = arith.index_cast %283 : i32 to index
    %c0_137 = arith.constant 0 : index
    %285 = vector.load %arg31[%284, %c0_137] : memref<2x32xf32, #tpu.memory_space<vmem>>, vector<1x32xf32>
    %286 = arith.index_cast %arg0 : i32 to index
    %c3 = arith.constant 3 : index
    %287 = memref.load %arg2[%286, %c3] : memref<2x8xi32, #tpu.memory_space<smem>>
    %288 = arith.index_cast %287 : i32 to index
    %c0_138 = arith.constant 0 : index
    %289 = vector.load %arg31[%288, %c0_138] : memref<2x32xf32, #tpu.memory_space<vmem>>, vector<1x32xf32>
    %290 = arith.index_cast %arg0 : i32 to index
    %c4 = arith.constant 4 : index
    %291 = memref.load %arg2[%290, %c4] : memref<2x8xi32, #tpu.memory_space<smem>>
    %292 = arith.index_cast %291 : i32 to index
    %c0_139 = arith.constant 0 : index
    %293 = vector.load %arg31[%292, %c0_139] : memref<2x32xf32, #tpu.memory_space<vmem>>, vector<1x32xf32>
    %294 = arith.index_cast %arg0 : i32 to index
    %c5 = arith.constant 5 : index
    %295 = memref.load %arg2[%294, %c5] : memref<2x8xi32, #tpu.memory_space<smem>>
    %296 = arith.index_cast %295 : i32 to index
    %c0_140 = arith.constant 0 : index
    %297 = vector.load %arg31[%296, %c0_140] : memref<2x32xf32, #tpu.memory_space<vmem>>, vector<1x32xf32>
    %298 = arith.index_cast %arg0 : i32 to index
    %c6 = arith.constant 6 : index
    %299 = memref.load %arg2[%298, %c6] : memref<2x8xi32, #tpu.memory_space<smem>>
    %300 = arith.index_cast %299 : i32 to index
    %c0_141 = arith.constant 0 : index
    %301 = vector.load %arg31[%300, %c0_141] : memref<2x32xf32, #tpu.memory_space<vmem>>, vector<1x32xf32>
    %302 = arith.index_cast %arg0 : i32 to index
    %c7 = arith.constant 7 : index
    %303 = memref.load %arg2[%302, %c7] : memref<2x8xi32, #tpu.memory_space<smem>>
    %304 = arith.index_cast %303 : i32 to index
    %c0_142 = arith.constant 0 : index
    %305 = vector.load %arg31[%304, %c0_142] : memref<2x32xf32, #tpu.memory_space<vmem>>, vector<1x32xf32>
    %306 = tpu.concatenate %277, %281, %285, %289, %293, %297, %301, %305 in 0 : vector<1x32xf32>, vector<1x32xf32>, vector<1x32xf32>, vector<1x32xf32>, vector<1x32xf32>, vector<1x32xf32>, vector<1x32xf32>, vector<1x32xf32> -> vector<8x32xf32>
    %c0_143 = arith.constant 0 : index
    %c0_144 = arith.constant 0 : index
    %c0_145 = arith.constant 0 : index
    %307 = vector.load %arg4[%c0_143, %c0_144, %c0_145] : memref<1x8x32xf32, #tpu.memory_space<vmem>>, vector<1x8x32xf32>
    %308 = vector.shape_cast %307 : vector<1x8x32xf32> to vector<8x32xf32>
    %c0_146 = arith.constant 0 : index
    %c0_147 = arith.constant 0 : index
    %309 = vector.load %arg20[%c0_146, %c0_147] : memref<8x32xf32, #tpu.memory_space<vmem>>, vector<8x32xf32>
    %310 = arith.addf %309, %306 : vector<8x32xf32>
    %c0_148 = arith.constant 0 : index
    %c0_149 = arith.constant 0 : index
    %311 = vector.load %arg18[%c0_148, %c0_149] : memref<32x32xf32, #tpu.memory_space<vmem>>, vector<32x32xf32>
    %cst_150 = arith.constant dense<0.000000e+00> : vector<8x32xf32>
    %312 = tpu.matmul %308, %311, %cst_150 {dimension_numbers = #tpu.dot_dimension_numbers<[1], [0], [0], [1], [0, 0, 1, 1], [], []>} : vector<8x32xf32>, vector<32x32xf32>, vector<8x32xf32> -> vector<8x32xf32>
    %c0_151 = arith.constant 0 : index
    %c0_152 = arith.constant 0 : index
    %313 = vector.load %arg19[%c0_151, %c0_152] : memref<1x32xf32, #tpu.memory_space<vmem>>, vector<1x32xf32>
    %314 = vector.broadcast %313 : vector<1x32xf32> to vector<8x32xf32>
    %315 = arith.addf %312, %314 : vector<8x32xf32>
    %cst_153 = arith.constant 0.000000e+00 : f32
    %316 = vector.broadcast %cst_153 : f32 to vector<8x32xf32>
    %317 = arith.maximumf %315, %316 : vector<8x32xf32>
    %cst_154 = arith.constant 5.65685415 : f32
    %318 = vector.broadcast %cst_154 : f32 to vector<8x32xf32>
    %319 = arith.mulf %317, %318 : vector<8x32xf32>
    %320 = arith.addf %319, %310 : vector<8x32xf32>
    %c0_155 = arith.constant 0 : index
    %c0_156 = arith.constant 0 : index
    %c0_157 = arith.constant 0 : index
    %c0_158 = arith.constant 0 : index
    %321 = vector.load %arg21[%c0_155, %c0_156, %c0_157, %c0_158] : memref<2x3x32x32xf32, #tpu.memory_space<vmem>>, vector<1x1x32x32xf32>
    %322 = vector.shape_cast %321 : vector<1x1x32x32xf32> to vector<32x32xf32>
    %cst_159 = arith.constant dense<0.000000e+00> : vector<8x32xf32>
    %323 = tpu.matmul %320, %322, %cst_159 {dimension_numbers = #tpu.dot_dimension_numbers<[1], [0], [0], [1], [0, 0, 1, 1], [], []>} : vector<8x32xf32>, vector<32x32xf32>, vector<8x32xf32> -> vector<8x32xf32>
    %c0_160 = arith.constant 0 : index
    %c1_161 = arith.constant 1 : index
    %c0_162 = arith.constant 0 : index
    %c0_163 = arith.constant 0 : index
    %324 = vector.load %arg21[%c0_160, %c1_161, %c0_162, %c0_163] : memref<2x3x32x32xf32, #tpu.memory_space<vmem>>, vector<1x1x32x32xf32>
    %325 = vector.shape_cast %324 : vector<1x1x32x32xf32> to vector<32x32xf32>
    %cst_164 = arith.constant dense<0.000000e+00> : vector<8x32xf32>
    %326 = tpu.matmul %320, %325, %cst_164 {dimension_numbers = #tpu.dot_dimension_numbers<[1], [0], [0], [1], [0, 0, 1, 1], [], []>} : vector<8x32xf32>, vector<32x32xf32>, vector<8x32xf32> -> vector<8x32xf32>
    %c0_165 = arith.constant 0 : index
    %c2_166 = arith.constant 2 : index
    %c0_167 = arith.constant 0 : index
    %c0_168 = arith.constant 0 : index
    %327 = vector.load %arg21[%c0_165, %c2_166, %c0_167, %c0_168] : memref<2x3x32x32xf32, #tpu.memory_space<vmem>>, vector<1x1x32x32xf32>
    %328 = vector.shape_cast %327 : vector<1x1x32x32xf32> to vector<32x32xf32>
    %cst_169 = arith.constant dense<0.000000e+00> : vector<8x32xf32>
    %329 = tpu.matmul %320, %328, %cst_169 {dimension_numbers = #tpu.dot_dimension_numbers<[1], [0], [0], [1], [0, 0, 1, 1], [], []>} : vector<8x32xf32>, vector<32x32xf32>, vector<8x32xf32> -> vector<8x32xf32>
    %330 = vector.extract_strided_slice %323 {offsets = [0, 0], sizes = [8, 16], strides = [1, 1]} : vector<8x32xf32> to vector<8x16xf32>
    %331 = vector.extract_strided_slice %323 {offsets = [0, 16], sizes = [8, 16], strides = [1, 1]} : vector<8x32xf32> to vector<8x16xf32>
    %332 = vector.shape_cast %330 : vector<8x16xf32> to vector<1x8x16xf32>
    %333 = vector.shape_cast %331 : vector<8x16xf32> to vector<1x8x16xf32>
    %334 = tpu.concatenate %332, %333 in 0 : vector<1x8x16xf32>, vector<1x8x16xf32> -> vector<2x8x16xf32>
    %335 = vector.extract_strided_slice %326 {offsets = [0, 0], sizes = [8, 16], strides = [1, 1]} : vector<8x32xf32> to vector<8x16xf32>
    %336 = vector.extract_strided_slice %326 {offsets = [0, 16], sizes = [8, 16], strides = [1, 1]} : vector<8x32xf32> to vector<8x16xf32>
    %337 = vector.shape_cast %335 : vector<8x16xf32> to vector<1x8x16xf32>
    %338 = vector.shape_cast %336 : vector<8x16xf32> to vector<1x8x16xf32>
    %339 = tpu.concatenate %337, %338 in 0 : vector<1x8x16xf32>, vector<1x8x16xf32> -> vector<2x8x16xf32>
    %340 = vector.extract_strided_slice %329 {offsets = [0, 0], sizes = [8, 16], strides = [1, 1]} : vector<8x32xf32> to vector<8x16xf32>
    %341 = vector.extract_strided_slice %329 {offsets = [0, 16], sizes = [8, 16], strides = [1, 1]} : vector<8x32xf32> to vector<8x16xf32>
    %342 = vector.shape_cast %340 : vector<8x16xf32> to vector<1x8x16xf32>
    %343 = vector.shape_cast %341 : vector<8x16xf32> to vector<1x8x16xf32>
    %344 = tpu.concatenate %342, %343 in 0 : vector<1x8x16xf32>, vector<1x8x16xf32> -> vector<2x8x16xf32>
    "tpu.trace_start"() <{level = 10 : i32, message = "hqd,hkd->hqk"}> : () -> ()
    %cst_170 = arith.constant dense<0.000000e+00> : vector<2x8x8xf32>
    %345 = tpu.matmul %334, %339, %cst_170 {dimension_numbers = #tpu.dot_dimension_numbers<[2], [2], [1], [1], [0, 0, 0, 1, 1, 1], [0], [0]>} : vector<2x8x16xf32>, vector<2x8x16xf32>, vector<2x8x8xf32> -> vector<2x8x8xf32>
    "tpu.trace_stop"() : () -> ()
    %cst_171 = arith.constant 2.500000e-01 : f32
    %346 = vector.broadcast %cst_171 : f32 to vector<2x8x8xf32>
    %347 = arith.mulf %345, %346 : vector<2x8x8xf32>
    %cst_172 = arith.constant dense<0xFF800000> : vector<2x8xf32>
    %348 = vector.multi_reduction <maximumf>, %347, %cst_172 [2] : vector<2x8x8xf32> to vector<2x8xf32>
    %349 = vector.shape_cast %348 : vector<2x8xf32> to vector<2x8x1xf32>
    %350 = vector.broadcast %349 : vector<2x8x1xf32> to vector<2x8x8xf32>
    %351 = arith.subf %347, %350 : vector<2x8x8xf32>
    %352 = math.exp %351 : vector<2x8x8xf32>
    %cst_173 = arith.constant dense<0.000000e+00> : vector<2x8xf32>
    %353 = vector.multi_reduction <add>, %352, %cst_173 [2] : vector<2x8x8xf32> to vector<2x8xf32>
    %354 = vector.shape_cast %353 : vector<2x8xf32> to vector<2x8x1xf32>
    %355 = tpu.reciprocal %354 {approx = true} : vector<2x8x1xf32> -> vector<2x8x1xf32>
    %356 = vector.broadcast %355 : vector<2x8x1xf32> to vector<2x8x8xf32>
    %357 = arith.mulf %352, %356 : vector<2x8x8xf32>
    "tpu.trace_start"() <{level = 10 : i32, message = "hqk,hkd->hqd"}> : () -> ()
    %cst_174 = arith.constant dense<0.000000e+00> : vector<2x8x16xf32>
    %358 = tpu.matmul %357, %344, %cst_174 {dimension_numbers = #tpu.dot_dimension_numbers<[2], [1], [1], [2], [0, 0, 0, 1, 1, 2], [0], [0]>} : vector<2x8x8xf32>, vector<2x8x16xf32>, vector<2x8x16xf32> -> vector<2x8x16xf32>
    "tpu.trace_stop"() : () -> ()
    %359 = vector.extract_strided_slice %358 {offsets = [0, 0, 0], sizes = [1, 8, 16], strides = [1, 1, 1]} : vector<2x8x16xf32> to vector<1x8x16xf32>
    %360 = vector.shape_cast %359 : vector<1x8x16xf32> to vector<8x16xf32>
    %361 = vector.extract_strided_slice %358 {offsets = [1, 0, 0], sizes = [1, 8, 16], strides = [1, 1, 1]} : vector<2x8x16xf32> to vector<1x8x16xf32>
    %362 = vector.shape_cast %361 : vector<1x8x16xf32> to vector<8x16xf32>
    %363 = tpu.concatenate %360, %362 in 1 : vector<8x16xf32>, vector<8x16xf32> -> vector<8x32xf32>
    %c0_175 = arith.constant 0 : index
    %c0_176 = arith.constant 0 : index
    %c0_177 = arith.constant 0 : index
    %364 = vector.load %arg22[%c0_175, %c0_176, %c0_177] : memref<2x32x32xf32, #tpu.memory_space<vmem>>, vector<1x32x32xf32>
    %365 = vector.shape_cast %364 : vector<1x32x32xf32> to vector<32x32xf32>
    %cst_178 = arith.constant dense<0.000000e+00> : vector<8x32xf32>
    %366 = tpu.matmul %363, %365, %cst_178 {dimension_numbers = #tpu.dot_dimension_numbers<[1], [0], [0], [1], [0, 0, 1, 1], [], []>} : vector<8x32xf32>, vector<32x32xf32>, vector<8x32xf32> -> vector<8x32xf32>
    %367 = arith.addf %320, %366 : vector<8x32xf32>
    %c0_179 = arith.constant 0 : index
    %c0_180 = arith.constant 0 : index
    %c0_181 = arith.constant 0 : index
    %368 = vector.load %arg27[%c0_179, %c0_180, %c0_181] : memref<2x8x32xf32, #tpu.memory_space<vmem>>, vector<1x8x32xf32>
    %369 = vector.shape_cast %368 : vector<1x8x32xf32> to vector<8x32xf32>
    %c0_182 = arith.constant 0 : index
    %c0_183 = arith.constant 0 : index
    %c0_184 = arith.constant 0 : index
    %370 = vector.load %arg28[%c0_182, %c0_183, %c0_184] : memref<2x8x32xf32, #tpu.memory_space<vmem>>, vector<1x8x32xf32>
    %371 = vector.shape_cast %370 : vector<1x8x32xf32> to vector<8x32xf32>
    %372 = vector.shape_cast %367 : vector<8x32xf32> to vector<1x8x32xf32>
    %cst_185 = arith.constant dense<0.000000e+00> : vector<1xf32>
    %373 = vector.multi_reduction <add>, %372, %cst_185 [1, 2] : vector<1x8x32xf32> to vector<1xf32>
    %374 = vector.shape_cast %373 : vector<1xf32> to vector<1x1x1xf32>
    %375 = vector.extract %374[0, 0, 0] : f32 from vector<1x1x1xf32>
    %376 = vector.broadcast %375 : f32 to vector<1x1xf32>
    %cst_186 = arith.constant 2.560000e+02 : f32
    %377 = vector.broadcast %cst_186 : f32 to vector<1x1xf32>
    %378 = arith.divf %376, %377 : vector<1x1xf32>
    %379 = vector.broadcast %378 : vector<1x1xf32> to vector<8x32xf32>
    %380 = arith.subf %367, %379 : vector<8x32xf32>
    %381 = arith.mulf %380, %380 : vector<8x32xf32>
    %382 = vector.shape_cast %381 : vector<8x32xf32> to vector<1x8x32xf32>
    %cst_187 = arith.constant dense<0.000000e+00> : vector<1xf32>
    %383 = vector.multi_reduction <add>, %382, %cst_187 [1, 2] : vector<1x8x32xf32> to vector<1xf32>
    %384 = vector.shape_cast %383 : vector<1xf32> to vector<1x1x1xf32>
    %385 = vector.extract %384[0, 0, 0] : f32 from vector<1x1x1xf32>
    %386 = vector.broadcast %385 : f32 to vector<1x1xf32>
    %cst_188 = arith.constant 2.560000e+02 : f32
    %387 = vector.broadcast %cst_188 : f32 to vector<1x1xf32>
    %388 = arith.divf %386, %387 : vector<1x1xf32>
    %389 = vector.broadcast %378 : vector<1x1xf32> to vector<8x32xf32>
    %390 = arith.subf %367, %389 : vector<8x32xf32>
    %cst_189 = arith.constant 9.99999974E-6 : f32
    %391 = vector.broadcast %cst_189 : f32 to vector<1x1xf32>
    %392 = arith.addf %388, %391 : vector<1x1xf32>
    %393 = math.rsqrt %392 : vector<1x1xf32>
    %394 = vector.broadcast %393 : vector<1x1xf32> to vector<8x32xf32>
    %395 = arith.mulf %390, %394 : vector<8x32xf32>
    %396 = arith.mulf %395, %369 : vector<8x32xf32>
    %397 = arith.addf %396, %371 : vector<8x32xf32>
    %c0_190 = arith.constant 0 : index
    %c0_191 = arith.constant 0 : index
    %c0_192 = arith.constant 0 : index
    %398 = vector.load %arg23[%c0_190, %c0_191, %c0_192] : memref<2x32x64xf32, #tpu.memory_space<vmem>>, vector<1x32x64xf32>
    %399 = vector.shape_cast %398 : vector<1x32x64xf32> to vector<32x64xf32>
    %cst_193 = arith.constant dense<0.000000e+00> : vector<8x64xf32>
    %400 = tpu.matmul %397, %399, %cst_193 {dimension_numbers = #tpu.dot_dimension_numbers<[1], [0], [0], [1], [0, 0, 1, 1], [], []>} : vector<8x32xf32>, vector<32x64xf32>, vector<8x64xf32> -> vector<8x64xf32>
    %c0_194 = arith.constant 0 : index
    %c0_195 = arith.constant 0 : index
    %c0_196 = arith.constant 0 : index
    %401 = vector.load %arg24[%c0_194, %c0_195, %c0_196] : memref<2x1x64xf32, #tpu.memory_space<vmem>>, vector<1x1x64xf32>
    %402 = vector.shape_cast %401 : vector<1x1x64xf32> to vector<1x64xf32>
    %403 = vector.broadcast %402 : vector<1x64xf32> to vector<8x64xf32>
    %404 = arith.addf %400, %403 : vector<8x64xf32>
    %cst_197 = arith.constant 0.000000e+00 : f32
    %405 = vector.broadcast %cst_197 : f32 to vector<8x64xf32>
    %406 = arith.maximumf %404, %405 : vector<8x64xf32>
    %c0_198 = arith.constant 0 : index
    %c0_199 = arith.constant 0 : index
    %c0_200 = arith.constant 0 : index
    %407 = vector.load %arg25[%c0_198, %c0_199, %c0_200] : memref<2x64x32xf32, #tpu.memory_space<vmem>>, vector<1x64x32xf32>
    %408 = vector.shape_cast %407 : vector<1x64x32xf32> to vector<64x32xf32>
    %cst_201 = arith.constant dense<0.000000e+00> : vector<8x32xf32>
    %409 = tpu.matmul %406, %408, %cst_201 {dimension_numbers = #tpu.dot_dimension_numbers<[1], [0], [0], [1], [0, 0, 1, 1], [], []>} : vector<8x64xf32>, vector<64x32xf32>, vector<8x32xf32> -> vector<8x32xf32>
    %c0_202 = arith.constant 0 : index
    %c0_203 = arith.constant 0 : index
    %c0_204 = arith.constant 0 : index
    %410 = vector.load %arg26[%c0_202, %c0_203, %c0_204] : memref<2x1x32xf32, #tpu.memory_space<vmem>>, vector<1x1x32xf32>
    %411 = vector.shape_cast %410 : vector<1x1x32xf32> to vector<1x32xf32>
    %412 = vector.broadcast %411 : vector<1x32xf32> to vector<8x32xf32>
    %413 = arith.addf %409, %412 : vector<8x32xf32>
    %414 = arith.addf %397, %413 : vector<8x32xf32>
    %c0_205 = arith.constant 0 : index
    %c0_206 = arith.constant 0 : index
    %c0_207 = arith.constant 0 : index
    %415 = vector.load %arg29[%c0_205, %c0_206, %c0_207] : memref<2x8x32xf32, #tpu.memory_space<vmem>>, vector<1x8x32xf32>
    %416 = vector.shape_cast %415 : vector<1x8x32xf32> to vector<8x32xf32>
    %c0_208 = arith.constant 0 : index
    %c0_209 = arith.constant 0 : index
    %c0_210 = arith.constant 0 : index
    %417 = vector.load %arg30[%c0_208, %c0_209, %c0_210] : memref<2x8x32xf32, #tpu.memory_space<vmem>>, vector<1x8x32xf32>
    %418 = vector.shape_cast %417 : vector<1x8x32xf32> to vector<8x32xf32>
    %419 = vector.shape_cast %414 : vector<8x32xf32> to vector<1x8x32xf32>
    %cst_211 = arith.constant dense<0.000000e+00> : vector<1xf32>
    %420 = vector.multi_reduction <add>, %419, %cst_211 [1, 2] : vector<1x8x32xf32> to vector<1xf32>
    %421 = vector.shape_cast %420 : vector<1xf32> to vector<1x1x1xf32>
    %422 = vector.extract %421[0, 0, 0] : f32 from vector<1x1x1xf32>
    %423 = vector.broadcast %422 : f32 to vector<1x1xf32>
    %cst_212 = arith.constant 2.560000e+02 : f32
    %424 = vector.broadcast %cst_212 : f32 to vector<1x1xf32>
    %425 = arith.divf %423, %424 : vector<1x1xf32>
    %426 = vector.broadcast %425 : vector<1x1xf32> to vector<8x32xf32>
    %427 = arith.subf %414, %426 : vector<8x32xf32>
    %428 = arith.mulf %427, %427 : vector<8x32xf32>
    %429 = vector.shape_cast %428 : vector<8x32xf32> to vector<1x8x32xf32>
    %cst_213 = arith.constant dense<0.000000e+00> : vector<1xf32>
    %430 = vector.multi_reduction <add>, %429, %cst_213 [1, 2] : vector<1x8x32xf32> to vector<1xf32>
    %431 = vector.shape_cast %430 : vector<1xf32> to vector<1x1x1xf32>
    %432 = vector.extract %431[0, 0, 0] : f32 from vector<1x1x1xf32>
    %433 = vector.broadcast %432 : f32 to vector<1x1xf32>
    %cst_214 = arith.constant 2.560000e+02 : f32
    %434 = vector.broadcast %cst_214 : f32 to vector<1x1xf32>
    %435 = arith.divf %433, %434 : vector<1x1xf32>
    %436 = vector.broadcast %425 : vector<1x1xf32> to vector<8x32xf32>
    %437 = arith.subf %414, %436 : vector<8x32xf32>
    %cst_215 = arith.constant 9.99999974E-6 : f32
    %438 = vector.broadcast %cst_215 : f32 to vector<1x1xf32>
    %439 = arith.addf %435, %438 : vector<1x1xf32>
    %440 = math.rsqrt %439 : vector<1x1xf32>
    %441 = vector.broadcast %440 : vector<1x1xf32> to vector<8x32xf32>
    %442 = arith.mulf %437, %441 : vector<8x32xf32>
    %443 = arith.mulf %442, %416 : vector<8x32xf32>
    %444 = arith.addf %443, %418 : vector<8x32xf32>
    %c1_216 = arith.constant 1 : index
    %c0_217 = arith.constant 0 : index
    %c0_218 = arith.constant 0 : index
    %c0_219 = arith.constant 0 : index
    %445 = vector.load %arg21[%c1_216, %c0_217, %c0_218, %c0_219] : memref<2x3x32x32xf32, #tpu.memory_space<vmem>>, vector<1x1x32x32xf32>
    %446 = vector.shape_cast %445 : vector<1x1x32x32xf32> to vector<32x32xf32>
    %cst_220 = arith.constant dense<0.000000e+00> : vector<8x32xf32>
    %447 = tpu.matmul %444, %446, %cst_220 {dimension_numbers = #tpu.dot_dimension_numbers<[1], [0], [0], [1], [0, 0, 1, 1], [], []>} : vector<8x32xf32>, vector<32x32xf32>, vector<8x32xf32> -> vector<8x32xf32>
    %c1_221 = arith.constant 1 : index
    %c1_222 = arith.constant 1 : index
    %c0_223 = arith.constant 0 : index
    %c0_224 = arith.constant 0 : index
    %448 = vector.load %arg21[%c1_221, %c1_222, %c0_223, %c0_224] : memref<2x3x32x32xf32, #tpu.memory_space<vmem>>, vector<1x1x32x32xf32>
    %449 = vector.shape_cast %448 : vector<1x1x32x32xf32> to vector<32x32xf32>
    %cst_225 = arith.constant dense<0.000000e+00> : vector<8x32xf32>
    %450 = tpu.matmul %444, %449, %cst_225 {dimension_numbers = #tpu.dot_dimension_numbers<[1], [0], [0], [1], [0, 0, 1, 1], [], []>} : vector<8x32xf32>, vector<32x32xf32>, vector<8x32xf32> -> vector<8x32xf32>
    %c1_226 = arith.constant 1 : index
    %c2_227 = arith.constant 2 : index
    %c0_228 = arith.constant 0 : index
    %c0_229 = arith.constant 0 : index
    %451 = vector.load %arg21[%c1_226, %c2_227, %c0_228, %c0_229] : memref<2x3x32x32xf32, #tpu.memory_space<vmem>>, vector<1x1x32x32xf32>
    %452 = vector.shape_cast %451 : vector<1x1x32x32xf32> to vector<32x32xf32>
    %cst_230 = arith.constant dense<0.000000e+00> : vector<8x32xf32>
    %453 = tpu.matmul %444, %452, %cst_230 {dimension_numbers = #tpu.dot_dimension_numbers<[1], [0], [0], [1], [0, 0, 1, 1], [], []>} : vector<8x32xf32>, vector<32x32xf32>, vector<8x32xf32> -> vector<8x32xf32>
    %454 = vector.extract_strided_slice %447 {offsets = [0, 0], sizes = [8, 16], strides = [1, 1]} : vector<8x32xf32> to vector<8x16xf32>
    %455 = vector.extract_strided_slice %447 {offsets = [0, 16], sizes = [8, 16], strides = [1, 1]} : vector<8x32xf32> to vector<8x16xf32>
    %456 = vector.shape_cast %454 : vector<8x16xf32> to vector<1x8x16xf32>
    %457 = vector.shape_cast %455 : vector<8x16xf32> to vector<1x8x16xf32>
    %458 = tpu.concatenate %456, %457 in 0 : vector<1x8x16xf32>, vector<1x8x16xf32> -> vector<2x8x16xf32>
    %459 = vector.extract_strided_slice %450 {offsets = [0, 0], sizes = [8, 16], strides = [1, 1]} : vector<8x32xf32> to vector<8x16xf32>
    %460 = vector.extract_strided_slice %450 {offsets = [0, 16], sizes = [8, 16], strides = [1, 1]} : vector<8x32xf32> to vector<8x16xf32>
    %461 = vector.shape_cast %459 : vector<8x16xf32> to vector<1x8x16xf32>
    %462 = vector.shape_cast %460 : vector<8x16xf32> to vector<1x8x16xf32>
    %463 = tpu.concatenate %461, %462 in 0 : vector<1x8x16xf32>, vector<1x8x16xf32> -> vector<2x8x16xf32>
    %464 = vector.extract_strided_slice %453 {offsets = [0, 0], sizes = [8, 16], strides = [1, 1]} : vector<8x32xf32> to vector<8x16xf32>
    %465 = vector.extract_strided_slice %453 {offsets = [0, 16], sizes = [8, 16], strides = [1, 1]} : vector<8x32xf32> to vector<8x16xf32>
    %466 = vector.shape_cast %464 : vector<8x16xf32> to vector<1x8x16xf32>
    %467 = vector.shape_cast %465 : vector<8x16xf32> to vector<1x8x16xf32>
    %468 = tpu.concatenate %466, %467 in 0 : vector<1x8x16xf32>, vector<1x8x16xf32> -> vector<2x8x16xf32>
    "tpu.trace_start"() <{level = 10 : i32, message = "hqd,hkd->hqk"}> : () -> ()
    %cst_231 = arith.constant dense<0.000000e+00> : vector<2x8x8xf32>
    %469 = tpu.matmul %458, %463, %cst_231 {dimension_numbers = #tpu.dot_dimension_numbers<[2], [2], [1], [1], [0, 0, 0, 1, 1, 1], [0], [0]>} : vector<2x8x16xf32>, vector<2x8x16xf32>, vector<2x8x8xf32> -> vector<2x8x8xf32>
    "tpu.trace_stop"() : () -> ()
    %cst_232 = arith.constant 2.500000e-01 : f32
    %470 = vector.broadcast %cst_232 : f32 to vector<2x8x8xf32>
    %471 = arith.mulf %469, %470 : vector<2x8x8xf32>
    %cst_233 = arith.constant dense<0xFF800000> : vector<2x8xf32>
    %472 = vector.multi_reduction <maximumf>, %471, %cst_233 [2] : vector<2x8x8xf32> to vector<2x8xf32>
    %473 = vector.shape_cast %472 : vector<2x8xf32> to vector<2x8x1xf32>
    %474 = vector.broadcast %473 : vector<2x8x1xf32> to vector<2x8x8xf32>
    %475 = arith.subf %471, %474 : vector<2x8x8xf32>
    %476 = math.exp %475 : vector<2x8x8xf32>
    %cst_234 = arith.constant dense<0.000000e+00> : vector<2x8xf32>
    %477 = vector.multi_reduction <add>, %476, %cst_234 [2] : vector<2x8x8xf32> to vector<2x8xf32>
    %478 = vector.shape_cast %477 : vector<2x8xf32> to vector<2x8x1xf32>
    %479 = tpu.reciprocal %478 {approx = true} : vector<2x8x1xf32> -> vector<2x8x1xf32>
    %480 = vector.broadcast %479 : vector<2x8x1xf32> to vector<2x8x8xf32>
    %481 = arith.mulf %476, %480 : vector<2x8x8xf32>
    "tpu.trace_start"() <{level = 10 : i32, message = "hqk,hkd->hqd"}> : () -> ()
    %cst_235 = arith.constant dense<0.000000e+00> : vector<2x8x16xf32>
    %482 = tpu.matmul %481, %468, %cst_235 {dimension_numbers = #tpu.dot_dimension_numbers<[2], [1], [1], [2], [0, 0, 0, 1, 1, 2], [0], [0]>} : vector<2x8x8xf32>, vector<2x8x16xf32>, vector<2x8x16xf32> -> vector<2x8x16xf32>
    "tpu.trace_stop"() : () -> ()
    %483 = vector.extract_strided_slice %482 {offsets = [0, 0, 0], sizes = [1, 8, 16], strides = [1, 1, 1]} : vector<2x8x16xf32> to vector<1x8x16xf32>
    %484 = vector.shape_cast %483 : vector<1x8x16xf32> to vector<8x16xf32>
    %485 = vector.extract_strided_slice %482 {offsets = [1, 0, 0], sizes = [1, 8, 16], strides = [1, 1, 1]} : vector<2x8x16xf32> to vector<1x8x16xf32>
    %486 = vector.shape_cast %485 : vector<1x8x16xf32> to vector<8x16xf32>
    %487 = tpu.concatenate %484, %486 in 1 : vector<8x16xf32>, vector<8x16xf32> -> vector<8x32xf32>
    %c1_236 = arith.constant 1 : index
    %c0_237 = arith.constant 0 : index
    %c0_238 = arith.constant 0 : index
    %488 = vector.load %arg22[%c1_236, %c0_237, %c0_238] : memref<2x32x32xf32, #tpu.memory_space<vmem>>, vector<1x32x32xf32>
    %489 = vector.shape_cast %488 : vector<1x32x32xf32> to vector<32x32xf32>
    %cst_239 = arith.constant dense<0.000000e+00> : vector<8x32xf32>
    %490 = tpu.matmul %487, %489, %cst_239 {dimension_numbers = #tpu.dot_dimension_numbers<[1], [0], [0], [1], [0, 0, 1, 1], [], []>} : vector<8x32xf32>, vector<32x32xf32>, vector<8x32xf32> -> vector<8x32xf32>
    %491 = arith.addf %444, %490 : vector<8x32xf32>
    %c1_240 = arith.constant 1 : index
    %c0_241 = arith.constant 0 : index
    %c0_242 = arith.constant 0 : index
    %492 = vector.load %arg27[%c1_240, %c0_241, %c0_242] : memref<2x8x32xf32, #tpu.memory_space<vmem>>, vector<1x8x32xf32>
    %493 = vector.shape_cast %492 : vector<1x8x32xf32> to vector<8x32xf32>
    %c1_243 = arith.constant 1 : index
    %c0_244 = arith.constant 0 : index
    %c0_245 = arith.constant 0 : index
    %494 = vector.load %arg28[%c1_243, %c0_244, %c0_245] : memref<2x8x32xf32, #tpu.memory_space<vmem>>, vector<1x8x32xf32>
    %495 = vector.shape_cast %494 : vector<1x8x32xf32> to vector<8x32xf32>
    %496 = vector.shape_cast %491 : vector<8x32xf32> to vector<1x8x32xf32>
    %cst_246 = arith.constant dense<0.000000e+00> : vector<1xf32>
    %497 = vector.multi_reduction <add>, %496, %cst_246 [1, 2] : vector<1x8x32xf32> to vector<1xf32>
    %498 = vector.shape_cast %497 : vector<1xf32> to vector<1x1x1xf32>
    %499 = vector.extract %498[0, 0, 0] : f32 from vector<1x1x1xf32>
    %500 = vector.broadcast %499 : f32 to vector<1x1xf32>
    %cst_247 = arith.constant 2.560000e+02 : f32
    %501 = vector.broadcast %cst_247 : f32 to vector<1x1xf32>
    %502 = arith.divf %500, %501 : vector<1x1xf32>
    %503 = vector.broadcast %502 : vector<1x1xf32> to vector<8x32xf32>
    %504 = arith.subf %491, %503 : vector<8x32xf32>
    %505 = arith.mulf %504, %504 : vector<8x32xf32>
    %506 = vector.shape_cast %505 : vector<8x32xf32> to vector<1x8x32xf32>
    %cst_248 = arith.constant dense<0.000000e+00> : vector<1xf32>
    %507 = vector.multi_reduction <add>, %506, %cst_248 [1, 2] : vector<1x8x32xf32> to vector<1xf32>
    %508 = vector.shape_cast %507 : vector<1xf32> to vector<1x1x1xf32>
    %509 = vector.extract %508[0, 0, 0] : f32 from vector<1x1x1xf32>
    %510 = vector.broadcast %509 : f32 to vector<1x1xf32>
    %cst_249 = arith.constant 2.560000e+02 : f32
    %511 = vector.broadcast %cst_249 : f32 to vector<1x1xf32>
    %512 = arith.divf %510, %511 : vector<1x1xf32>
    %513 = vector.broadcast %502 : vector<1x1xf32> to vector<8x32xf32>
    %514 = arith.subf %491, %513 : vector<8x32xf32>
    %cst_250 = arith.constant 9.99999974E-6 : f32
    %515 = vector.broadcast %cst_250 : f32 to vector<1x1xf32>
    %516 = arith.addf %512, %515 : vector<1x1xf32>
    %517 = math.rsqrt %516 : vector<1x1xf32>
    %518 = vector.broadcast %517 : vector<1x1xf32> to vector<8x32xf32>
    %519 = arith.mulf %514, %518 : vector<8x32xf32>
    %520 = arith.mulf %519, %493 : vector<8x32xf32>
    %521 = arith.addf %520, %495 : vector<8x32xf32>
    %c1_251 = arith.constant 1 : index
    %c0_252 = arith.constant 0 : index
    %c0_253 = arith.constant 0 : index
    %522 = vector.load %arg23[%c1_251, %c0_252, %c0_253] : memref<2x32x64xf32, #tpu.memory_space<vmem>>, vector<1x32x64xf32>
    %523 = vector.shape_cast %522 : vector<1x32x64xf32> to vector<32x64xf32>
    %cst_254 = arith.constant dense<0.000000e+00> : vector<8x64xf32>
    %524 = tpu.matmul %521, %523, %cst_254 {dimension_numbers = #tpu.dot_dimension_numbers<[1], [0], [0], [1], [0, 0, 1, 1], [], []>} : vector<8x32xf32>, vector<32x64xf32>, vector<8x64xf32> -> vector<8x64xf32>
    %c1_255 = arith.constant 1 : index
    %c0_256 = arith.constant 0 : index
    %c0_257 = arith.constant 0 : index
    %525 = vector.load %arg24[%c1_255, %c0_256, %c0_257] : memref<2x1x64xf32, #tpu.memory_space<vmem>>, vector<1x1x64xf32>
    %526 = vector.shape_cast %525 : vector<1x1x64xf32> to vector<1x64xf32>
    %527 = vector.broadcast %526 : vector<1x64xf32> to vector<8x64xf32>
    %528 = arith.addf %524, %527 : vector<8x64xf32>
    %cst_258 = arith.constant 0.000000e+00 : f32
    %529 = vector.broadcast %cst_258 : f32 to vector<8x64xf32>
    %530 = arith.maximumf %528, %529 : vector<8x64xf32>
    %c1_259 = arith.constant 1 : index
    %c0_260 = arith.constant 0 : index
    %c0_261 = arith.constant 0 : index
    %531 = vector.load %arg25[%c1_259, %c0_260, %c0_261] : memref<2x64x32xf32, #tpu.memory_space<vmem>>, vector<1x64x32xf32>
    %532 = vector.shape_cast %531 : vector<1x64x32xf32> to vector<64x32xf32>
    %cst_262 = arith.constant dense<0.000000e+00> : vector<8x32xf32>
    %533 = tpu.matmul %530, %532, %cst_262 {dimension_numbers = #tpu.dot_dimension_numbers<[1], [0], [0], [1], [0, 0, 1, 1], [], []>} : vector<8x64xf32>, vector<64x32xf32>, vector<8x32xf32> -> vector<8x32xf32>
    %c1_263 = arith.constant 1 : index
    %c0_264 = arith.constant 0 : index
    %c0_265 = arith.constant 0 : index
    %534 = vector.load %arg26[%c1_263, %c0_264, %c0_265] : memref<2x1x32xf32, #tpu.memory_space<vmem>>, vector<1x1x32xf32>
    %535 = vector.shape_cast %534 : vector<1x1x32xf32> to vector<1x32xf32>
    %536 = vector.broadcast %535 : vector<1x32xf32> to vector<8x32xf32>
    %537 = arith.addf %533, %536 : vector<8x32xf32>
    %538 = arith.addf %521, %537 : vector<8x32xf32>
    %c1_266 = arith.constant 1 : index
    %c0_267 = arith.constant 0 : index
    %c0_268 = arith.constant 0 : index
    %539 = vector.load %arg29[%c1_266, %c0_267, %c0_268] : memref<2x8x32xf32, #tpu.memory_space<vmem>>, vector<1x8x32xf32>
    %540 = vector.shape_cast %539 : vector<1x8x32xf32> to vector<8x32xf32>
    %c1_269 = arith.constant 1 : index
    %c0_270 = arith.constant 0 : index
    %c0_271 = arith.constant 0 : index
    %541 = vector.load %arg30[%c1_269, %c0_270, %c0_271] : memref<2x8x32xf32, #tpu.memory_space<vmem>>, vector<1x8x32xf32>
    %542 = vector.shape_cast %541 : vector<1x8x32xf32> to vector<8x32xf32>
    %543 = vector.shape_cast %538 : vector<8x32xf32> to vector<1x8x32xf32>
    %cst_272 = arith.constant dense<0.000000e+00> : vector<1xf32>
    %544 = vector.multi_reduction <add>, %543, %cst_272 [1, 2] : vector<1x8x32xf32> to vector<1xf32>
    %545 = vector.shape_cast %544 : vector<1xf32> to vector<1x1x1xf32>
    %546 = vector.extract %545[0, 0, 0] : f32 from vector<1x1x1xf32>
    %547 = vector.broadcast %546 : f32 to vector<1x1xf32>
    %cst_273 = arith.constant 2.560000e+02 : f32
    %548 = vector.broadcast %cst_273 : f32 to vector<1x1xf32>
    %549 = arith.divf %547, %548 : vector<1x1xf32>
    %550 = vector.broadcast %549 : vector<1x1xf32> to vector<8x32xf32>
    %551 = arith.subf %538, %550 : vector<8x32xf32>
    %552 = arith.mulf %551, %551 : vector<8x32xf32>
    %553 = vector.shape_cast %552 : vector<8x32xf32> to vector<1x8x32xf32>
    %cst_274 = arith.constant dense<0.000000e+00> : vector<1xf32>
    %554 = vector.multi_reduction <add>, %553, %cst_274 [1, 2] : vector<1x8x32xf32> to vector<1xf32>
    %555 = vector.shape_cast %554 : vector<1xf32> to vector<1x1x1xf32>
    %556 = vector.extract %555[0, 0, 0] : f32 from vector<1x1x1xf32>
    %557 = vector.broadcast %556 : f32 to vector<1x1xf32>
    %cst_275 = arith.constant 2.560000e+02 : f32
    %558 = vector.broadcast %cst_275 : f32 to vector<1x1xf32>
    %559 = arith.divf %557, %558 : vector<1x1xf32>
    %560 = vector.broadcast %549 : vector<1x1xf32> to vector<8x32xf32>
    %561 = arith.subf %538, %560 : vector<8x32xf32>
    %cst_276 = arith.constant 9.99999974E-6 : f32
    %562 = vector.broadcast %cst_276 : f32 to vector<1x1xf32>
    %563 = arith.addf %559, %562 : vector<1x1xf32>
    %564 = math.rsqrt %563 : vector<1x1xf32>
    %565 = vector.broadcast %564 : vector<1x1xf32> to vector<8x32xf32>
    %566 = arith.mulf %561, %565 : vector<8x32xf32>
    %567 = arith.mulf %566, %540 : vector<8x32xf32>
    %568 = arith.addf %567, %542 : vector<8x32xf32>
    %c0_277 = arith.constant 0 : index
    %c0_278 = arith.constant 0 : index
    %569 = vector.load %arg32[%c0_277, %c0_278] : memref<32x32xf32, #tpu.memory_space<vmem>>, vector<32x32xf32>
    %cst_279 = arith.constant dense<0.000000e+00> : vector<8x32xf32>
    %570 = tpu.matmul %273, %569, %cst_279 {dimension_numbers = #tpu.dot_dimension_numbers<[1], [0], [0], [1], [0, 0, 1, 1], [], []>} : vector<8x32xf32>, vector<32x32xf32>, vector<8x32xf32> -> vector<8x32xf32>
    %c0_280 = arith.constant 0 : index
    %c0_281 = arith.constant 0 : index
    %571 = vector.load %arg33[%c0_280, %c0_281] : memref<1x32xf32, #tpu.memory_space<vmem>>, vector<1x32xf32>
    %572 = vector.broadcast %571 : vector<1x32xf32> to vector<8x32xf32>
    %573 = arith.addf %570, %572 : vector<8x32xf32>
    %c0_282 = arith.constant 0 : index
    %c0_283 = arith.constant 0 : index
    %574 = vector.load %arg34[%c0_282, %c0_283] : memref<32x32xf32, #tpu.memory_space<vmem>>, vector<32x32xf32>
    %cst_284 = arith.constant dense<0.000000e+00> : vector<8x32xf32>
    %575 = tpu.matmul %568, %574, %cst_284 {dimension_numbers = #tpu.dot_dimension_numbers<[1], [0], [0], [1], [0, 0, 1, 1], [], []>} : vector<8x32xf32>, vector<32x32xf32>, vector<8x32xf32> -> vector<8x32xf32>
    %c0_285 = arith.constant 0 : index
    %c0_286 = arith.constant 0 : index
    %576 = vector.load %arg35[%c0_285, %c0_286] : memref<1x32xf32, #tpu.memory_space<vmem>>, vector<1x32xf32>
    %577 = vector.broadcast %576 : vector<1x32xf32> to vector<8x32xf32>
    %578 = arith.addf %575, %577 : vector<8x32xf32>
    %c0_287 = arith.constant 0 : index
    %c0_288 = arith.constant 0 : index
    %579 = vector.load %arg36[%c0_287, %c0_288] : memref<32x32xf32, #tpu.memory_space<vmem>>, vector<32x32xf32>
    %cst_289 = arith.constant dense<0.000000e+00> : vector<8x32xf32>
    %580 = tpu.matmul %568, %579, %cst_289 {dimension_numbers = #tpu.dot_dimension_numbers<[1], [0], [0], [1], [0, 0, 1, 1], [], []>} : vector<8x32xf32>, vector<32x32xf32>, vector<8x32xf32> -> vector<8x32xf32>
    %c0_290 = arith.constant 0 : index
    %c0_291 = arith.constant 0 : index
    %581 = vector.load %arg37[%c0_290, %c0_291] : memref<1x32xf32, #tpu.memory_space<vmem>>, vector<1x32xf32>
    %582 = vector.broadcast %581 : vector<1x32xf32> to vector<8x32xf32>
    %583 = arith.addf %580, %582 : vector<8x32xf32>
    %584 = vector.extract_strided_slice %573 {offsets = [0, 0], sizes = [8, 16], strides = [1, 1]} : vector<8x32xf32> to vector<8x16xf32>
    %585 = vector.extract_strided_slice %573 {offsets = [0, 16], sizes = [8, 16], strides = [1, 1]} : vector<8x32xf32> to vector<8x16xf32>
    %586 = vector.shape_cast %584 : vector<8x16xf32> to vector<1x8x16xf32>
    %587 = vector.shape_cast %585 : vector<8x16xf32> to vector<1x8x16xf32>
    %588 = tpu.concatenate %586, %587 in 0 : vector<1x8x16xf32>, vector<1x8x16xf32> -> vector<2x8x16xf32>
    %589 = vector.extract_strided_slice %578 {offsets = [0, 0], sizes = [8, 16], strides = [1, 1]} : vector<8x32xf32> to vector<8x16xf32>
    %590 = vector.extract_strided_slice %578 {offsets = [0, 16], sizes = [8, 16], strides = [1, 1]} : vector<8x32xf32> to vector<8x16xf32>
    %591 = vector.shape_cast %589 : vector<8x16xf32> to vector<1x8x16xf32>
    %592 = vector.shape_cast %590 : vector<8x16xf32> to vector<1x8x16xf32>
    %593 = tpu.concatenate %591, %592 in 0 : vector<1x8x16xf32>, vector<1x8x16xf32> -> vector<2x8x16xf32>
    %594 = vector.extract_strided_slice %583 {offsets = [0, 0], sizes = [8, 16], strides = [1, 1]} : vector<8x32xf32> to vector<8x16xf32>
    %595 = vector.extract_strided_slice %583 {offsets = [0, 16], sizes = [8, 16], strides = [1, 1]} : vector<8x32xf32> to vector<8x16xf32>
    %596 = vector.shape_cast %594 : vector<8x16xf32> to vector<1x8x16xf32>
    %597 = vector.shape_cast %595 : vector<8x16xf32> to vector<1x8x16xf32>
    %598 = tpu.concatenate %596, %597 in 0 : vector<1x8x16xf32>, vector<1x8x16xf32> -> vector<2x8x16xf32>
    "tpu.trace_start"() <{level = 10 : i32, message = "hqd,hkd->hqk"}> : () -> ()
    %cst_292 = arith.constant dense<0.000000e+00> : vector<2x8x8xf32>
    %599 = tpu.matmul %588, %593, %cst_292 {dimension_numbers = #tpu.dot_dimension_numbers<[2], [2], [1], [1], [0, 0, 0, 1, 1, 1], [0], [0]>} : vector<2x8x16xf32>, vector<2x8x16xf32>, vector<2x8x8xf32> -> vector<2x8x8xf32>
    "tpu.trace_stop"() : () -> ()
    %cst_293 = arith.constant 5.65685415 : f32
    %600 = vector.broadcast %cst_293 : f32 to vector<2x8x8xf32>
    %601 = arith.mulf %599, %600 : vector<2x8x8xf32>
    %cst_294 = arith.constant dense<0xFF800000> : vector<2x8xf32>
    %602 = vector.multi_reduction <maximumf>, %601, %cst_294 [2] : vector<2x8x8xf32> to vector<2x8xf32>
    %603 = vector.shape_cast %602 : vector<2x8xf32> to vector<2x8x1xf32>
    %604 = vector.broadcast %603 : vector<2x8x1xf32> to vector<2x8x8xf32>
    %605 = arith.subf %601, %604 : vector<2x8x8xf32>
    %606 = math.exp %605 : vector<2x8x8xf32>
    %cst_295 = arith.constant dense<0.000000e+00> : vector<2x8xf32>
    %607 = vector.multi_reduction <add>, %606, %cst_295 [2] : vector<2x8x8xf32> to vector<2x8xf32>
    %608 = vector.shape_cast %607 : vector<2x8xf32> to vector<2x8x1xf32>
    %609 = tpu.reciprocal %608 {approx = true} : vector<2x8x1xf32> -> vector<2x8x1xf32>
    %610 = vector.broadcast %609 : vector<2x8x1xf32> to vector<2x8x8xf32>
    %611 = arith.mulf %606, %610 : vector<2x8x8xf32>
    "tpu.trace_start"() <{level = 10 : i32, message = "hqk,hkd->hqd"}> : () -> ()
    %cst_296 = arith.constant dense<0.000000e+00> : vector<2x8x16xf32>
    %612 = tpu.matmul %611, %598, %cst_296 {dimension_numbers = #tpu.dot_dimension_numbers<[2], [1], [1], [2], [0, 0, 0, 1, 1, 2], [0], [0]>} : vector<2x8x8xf32>, vector<2x8x16xf32>, vector<2x8x16xf32> -> vector<2x8x16xf32>
    "tpu.trace_stop"() : () -> ()
    %613 = vector.extract_strided_slice %612 {offsets = [0, 0, 0], sizes = [1, 8, 16], strides = [1, 1, 1]} : vector<2x8x16xf32> to vector<1x8x16xf32>
    %614 = vector.shape_cast %613 : vector<1x8x16xf32> to vector<8x16xf32>
    %615 = vector.extract_strided_slice %612 {offsets = [1, 0, 0], sizes = [1, 8, 16], strides = [1, 1, 1]} : vector<2x8x16xf32> to vector<1x8x16xf32>
    %616 = vector.shape_cast %615 : vector<1x8x16xf32> to vector<8x16xf32>
    %617 = tpu.concatenate %614, %616 in 1 : vector<8x16xf32>, vector<8x16xf32> -> vector<8x32xf32>
    %618 = arith.addf %573, %617 : vector<8x32xf32>
    %c0_297 = arith.constant 0 : index
    %c0_298 = arith.constant 0 : index
    %619 = vector.load %arg42[%c0_297, %c0_298] : memref<8x32xf32, #tpu.memory_space<vmem>>, vector<8x32xf32>
    %c0_299 = arith.constant 0 : index
    %c0_300 = arith.constant 0 : index
    %620 = vector.load %arg43[%c0_299, %c0_300] : memref<8x32xf32, #tpu.memory_space<vmem>>, vector<8x32xf32>
    %621 = vector.shape_cast %618 : vector<8x32xf32> to vector<1x8x32xf32>
    %cst_301 = arith.constant dense<0.000000e+00> : vector<1xf32>
    %622 = vector.multi_reduction <add>, %621, %cst_301 [1, 2] : vector<1x8x32xf32> to vector<1xf32>
    %623 = vector.shape_cast %622 : vector<1xf32> to vector<1x1x1xf32>
    %624 = vector.extract %623[0, 0, 0] : f32 from vector<1x1x1xf32>
    %625 = vector.broadcast %624 : f32 to vector<1x1xf32>
    %cst_302 = arith.constant 2.560000e+02 : f32
    %626 = vector.broadcast %cst_302 : f32 to vector<1x1xf32>
    %627 = arith.divf %625, %626 : vector<1x1xf32>
    %628 = vector.broadcast %627 : vector<1x1xf32> to vector<8x32xf32>
    %629 = arith.subf %618, %628 : vector<8x32xf32>
    %630 = arith.mulf %629, %629 : vector<8x32xf32>
    %631 = vector.shape_cast %630 : vector<8x32xf32> to vector<1x8x32xf32>
    %cst_303 = arith.constant dense<0.000000e+00> : vector<1xf32>
    %632 = vector.multi_reduction <add>, %631, %cst_303 [1, 2] : vector<1x8x32xf32> to vector<1xf32>
    %633 = vector.shape_cast %632 : vector<1xf32> to vector<1x1x1xf32>
    %634 = vector.extract %633[0, 0, 0] : f32 from vector<1x1x1xf32>
    %635 = vector.broadcast %634 : f32 to vector<1x1xf32>
    %cst_304 = arith.constant 2.560000e+02 : f32
    %636 = vector.broadcast %cst_304 : f32 to vector<1x1xf32>
    %637 = arith.divf %635, %636 : vector<1x1xf32>
    %638 = vector.broadcast %627 : vector<1x1xf32> to vector<8x32xf32>
    %639 = arith.subf %618, %638 : vector<8x32xf32>
    %cst_305 = arith.constant 9.99999974E-6 : f32
    %640 = vector.broadcast %cst_305 : f32 to vector<1x1xf32>
    %641 = arith.addf %637, %640 : vector<1x1xf32>
    %642 = math.rsqrt %641 : vector<1x1xf32>
    %643 = vector.broadcast %642 : vector<1x1xf32> to vector<8x32xf32>
    %644 = arith.mulf %639, %643 : vector<8x32xf32>
    %645 = arith.mulf %644, %619 : vector<8x32xf32>
    %646 = arith.addf %645, %620 : vector<8x32xf32>
    %c0_306 = arith.constant 0 : index
    %c0_307 = arith.constant 0 : index
    %647 = vector.load %arg38[%c0_306, %c0_307] : memref<32x64xf32, #tpu.memory_space<vmem>>, vector<32x64xf32>
    %cst_308 = arith.constant dense<0.000000e+00> : vector<8x64xf32>
    %648 = tpu.matmul %646, %647, %cst_308 {dimension_numbers = #tpu.dot_dimension_numbers<[1], [0], [0], [1], [0, 0, 1, 1], [], []>} : vector<8x32xf32>, vector<32x64xf32>, vector<8x64xf32> -> vector<8x64xf32>
    %c0_309 = arith.constant 0 : index
    %c0_310 = arith.constant 0 : index
    %649 = vector.load %arg39[%c0_309, %c0_310] : memref<1x64xf32, #tpu.memory_space<vmem>>, vector<1x64xf32>
    %650 = vector.broadcast %649 : vector<1x64xf32> to vector<8x64xf32>
    %651 = arith.addf %648, %650 : vector<8x64xf32>
    %cst_311 = arith.constant 0.000000e+00 : f32
    %652 = vector.broadcast %cst_311 : f32 to vector<8x64xf32>
    %653 = arith.maximumf %651, %652 : vector<8x64xf32>
    %c0_312 = arith.constant 0 : index
    %c0_313 = arith.constant 0 : index
    %654 = vector.load %arg40[%c0_312, %c0_313] : memref<64x32xf32, #tpu.memory_space<vmem>>, vector<64x32xf32>
    %cst_314 = arith.constant dense<0.000000e+00> : vector<8x32xf32>
    %655 = tpu.matmul %653, %654, %cst_314 {dimension_numbers = #tpu.dot_dimension_numbers<[1], [0], [0], [1], [0, 0, 1, 1], [], []>} : vector<8x64xf32>, vector<64x32xf32>, vector<8x32xf32> -> vector<8x32xf32>
    %c0_315 = arith.constant 0 : index
    %c0_316 = arith.constant 0 : index
    %656 = vector.load %arg41[%c0_315, %c0_316] : memref<1x32xf32, #tpu.memory_space<vmem>>, vector<1x32xf32>
    %657 = vector.broadcast %656 : vector<1x32xf32> to vector<8x32xf32>
    %658 = arith.addf %655, %657 : vector<8x32xf32>
    %659 = arith.addf %646, %658 : vector<8x32xf32>
    %c0_317 = arith.constant 0 : index
    %c0_318 = arith.constant 0 : index
    %660 = vector.load %arg44[%c0_317, %c0_318] : memref<8x32xf32, #tpu.memory_space<vmem>>, vector<8x32xf32>
    %c0_319 = arith.constant 0 : index
    %c0_320 = arith.constant 0 : index
    %661 = vector.load %arg45[%c0_319, %c0_320] : memref<8x32xf32, #tpu.memory_space<vmem>>, vector<8x32xf32>
    %662 = vector.shape_cast %659 : vector<8x32xf32> to vector<1x8x32xf32>
    %cst_321 = arith.constant dense<0.000000e+00> : vector<1xf32>
    %663 = vector.multi_reduction <add>, %662, %cst_321 [1, 2] : vector<1x8x32xf32> to vector<1xf32>
    %664 = vector.shape_cast %663 : vector<1xf32> to vector<1x1x1xf32>
    %665 = vector.extract %664[0, 0, 0] : f32 from vector<1x1x1xf32>
    %666 = vector.broadcast %665 : f32 to vector<1x1xf32>
    %cst_322 = arith.constant 2.560000e+02 : f32
    %667 = vector.broadcast %cst_322 : f32 to vector<1x1xf32>
    %668 = arith.divf %666, %667 : vector<1x1xf32>
    %669 = vector.broadcast %668 : vector<1x1xf32> to vector<8x32xf32>
    %670 = arith.subf %659, %669 : vector<8x32xf32>
    %671 = arith.mulf %670, %670 : vector<8x32xf32>
    %672 = vector.shape_cast %671 : vector<8x32xf32> to vector<1x8x32xf32>
    %cst_323 = arith.constant dense<0.000000e+00> : vector<1xf32>
    %673 = vector.multi_reduction <add>, %672, %cst_323 [1, 2] : vector<1x8x32xf32> to vector<1xf32>
    %674 = vector.shape_cast %673 : vector<1xf32> to vector<1x1x1xf32>
    %675 = vector.extract %674[0, 0, 0] : f32 from vector<1x1x1xf32>
    %676 = vector.broadcast %675 : f32 to vector<1x1xf32>
    %cst_324 = arith.constant 2.560000e+02 : f32
    %677 = vector.broadcast %cst_324 : f32 to vector<1x1xf32>
    %678 = arith.divf %676, %677 : vector<1x1xf32>
    %679 = vector.broadcast %668 : vector<1x1xf32> to vector<8x32xf32>
    %680 = arith.subf %659, %679 : vector<8x32xf32>
    %cst_325 = arith.constant 9.99999974E-6 : f32
    %681 = vector.broadcast %cst_325 : f32 to vector<1x1xf32>
    %682 = arith.addf %678, %681 : vector<1x1xf32>
    %683 = math.rsqrt %682 : vector<1x1xf32>
    %684 = vector.broadcast %683 : vector<1x1xf32> to vector<8x32xf32>
    %685 = arith.mulf %680, %684 : vector<8x32xf32>
    %686 = arith.mulf %685, %660 : vector<8x32xf32>
    %687 = arith.addf %686, %661 : vector<8x32xf32>
    %688 = vector.shape_cast %687 : vector<8x32xf32> to vector<8x32x1xf32>
    %c0_326 = arith.constant 0 : index
    %c0_327 = arith.constant 0 : index
    %c0_328 = arith.constant 0 : index
    %689 = vector.load %arg46[%c0_326, %c0_327, %c0_328] : memref<8x32x5xf32, #tpu.memory_space<vmem>>, vector<8x32x5xf32>
    %690 = vector.broadcast %688 : vector<8x32x1xf32> to vector<8x32x5xf32>
    %691 = arith.mulf %690, %689 : vector<8x32x5xf32>
    %cst_329 = arith.constant dense<0.000000e+00> : vector<32x5xf32>
    %692 = vector.multi_reduction <add>, %691, %cst_329 [0] : vector<8x32x5xf32> to vector<32x5xf32>
    %cst_330 = arith.constant dense<0.000000e+00> : vector<5xf32>
    %693 = vector.multi_reduction <add>, %692, %cst_330 [0] : vector<32x5xf32> to vector<5xf32>
    %694 = vector.shape_cast %693 : vector<5xf32> to vector<1x5xf32>
    %c0_331 = arith.constant 0 : index
    %c0_332 = arith.constant 0 : index
    %695 = vector.load %arg47[%c0_331, %c0_332] : memref<1x5xf32, #tpu.memory_space<vmem>>, vector<1x5xf32>
    %696 = arith.addf %694, %695 : vector<1x5xf32>
    %cst_333 = arith.constant dense<0xFF800000> : vector<1xf32>
    %697 = vector.multi_reduction <maximumf>, %696, %cst_333 [1] : vector<1x5xf32> to vector<1xf32>
    %698 = vector.shape_cast %697 : vector<1xf32> to vector<1x1xf32>
    %699 = vector.broadcast %698 : vector<1x1xf32> to vector<1x5xf32>
    %700 = arith.subf %696, %699 : vector<1x5xf32>
    %701 = math.exp %700 : vector<1x5xf32>
    %cst_334 = arith.constant dense<0.000000e+00> : vector<1xf32>
    %702 = vector.multi_reduction <add>, %701, %cst_334 [1] : vector<1x5xf32> to vector<1xf32>
    %703 = vector.shape_cast %702 : vector<1xf32> to vector<1x1xf32>
    %704 = vector.broadcast %703 : vector<1x1xf32> to vector<1x5xf32>
    %705 = arith.divf %701, %704 : vector<1x5xf32>
    %706 = vector.shape_cast %705 : vector<1x5xf32> to vector<1x1x5xf32>
    %c0_335 = arith.constant 0 : index
    %c0_336 = arith.constant 0 : index
    %c0_337 = arith.constant 0 : index
    %707 = vector.load %arg48[%c0_335, %c0_336, %c0_337] : memref<1x1x5xf32, #tpu.memory_space<vmem>>, vector<1x1x5xf32>
    tpu.vector_store %arg48[%c0_335, %c0_336, %c0_337], %706 {strides = array<i32>} : memref<1x1x5xf32, #tpu.memory_space<vmem>>, vector<1x1x5xf32>,
    return
  }
  func.func @transform_0(%arg0: i32, %arg1: memref<2xi32, #tpu.memory_space<smem>>, %arg2: memref<2x8xi32, #tpu.memory_space<smem>>) -> (i32, i32, i32) {
    %c0_i32 = arith.constant 0 : i32
    %c0_i32_0 = arith.constant 0 : i32
    %c0_i32_1 = arith.constant 0 : i32
    return %arg0, %c0_i32, %c0_i32_0 : i32, i32, i32
  }
  func.func @transform_1(%arg0: i32, %arg1: memref<2xi32, #tpu.memory_space<smem>>, %arg2: memref<2x8xi32, #tpu.memory_space<smem>>) -> (i32, i32, i32) {
    %c0_i32 = arith.constant 0 : i32
    %c0_i32_0 = arith.constant 0 : i32
    %c0_i32_1 = arith.constant 0 : i32
    return %arg0, %c0_i32, %c0_i32_0 : i32, i32, i32
  }
  func.func @transform_2(%arg0: i32, %arg1: memref<2xi32, #tpu.memory_space<smem>>, %arg2: memref<2x8xi32, #tpu.memory_space<smem>>) -> (i32, i32) {
    %c0_i32 = arith.constant 0 : i32
    %c0_i32_0 = arith.constant 0 : i32
    %c0_i32_1 = arith.constant 0 : i32
    return %c0_i32, %c0_i32_0 : i32, i32
  }
  func.func @transform_3(%arg0: i32, %arg1: memref<2xi32, #tpu.memory_space<smem>>, %arg2: memref<2x8xi32, #tpu.memory_space<smem>>) -> (i32, i32) {
    %c0_i32 = arith.constant 0 : i32
    %c0_i32_0 = arith.constant 0 : i32
    %c0_i32_1 = arith.constant 0 : i32
    return %c0_i32, %c0_i32_0 : i32, i32
  }
  func.func @transform_4(%arg0: i32, %arg1: memref<2xi32, #tpu.memory_space<smem>>, %arg2: memref<2x8xi32, #tpu.memory_space<smem>>) -> (i32, i32) {
    %c0_i32 = arith.constant 0 : i32
    %c0_i32_0 = arith.constant 0 : i32
    %c0_i32_1 = arith.constant 0 : i32
    return %c0_i32, %c0_i32_0 : i32, i32
  }
  func.func @transform_5(%arg0: i32, %arg1: memref<2xi32, #tpu.memory_space<smem>>, %arg2: memref<2x8xi32, #tpu.memory_space<smem>>) -> (i32, i32, i32, i32) {
    %c0_i32 = arith.constant 0 : i32
    %c0_i32_0 = arith.constant 0 : i32
    %c0_i32_1 = arith.constant 0 : i32
    %c0_i32_2 = arith.constant 0 : i32
    %c0_i32_3 = arith.constant 0 : i32
    return %c0_i32, %c0_i32_0, %c0_i32_1, %c0_i32_2 : i32, i32, i32, i32
  }
  func.func @transform_6(%arg0: i32, %arg1: memref<2xi32, #tpu.memory_space<smem>>, %arg2: memref<2x8xi32, #tpu.memory_space<smem>>) -> (i32, i32, i32) {
    %c0_i32 = arith.constant 0 : i32
    %c0_i32_0 = arith.constant 0 : i32
    %c0_i32_1 = arith.constant 0 : i32
    %c0_i32_2 = arith.constant 0 : i32
    return %c0_i32, %c0_i32_0, %c0_i32_1 : i32, i32, i32
  }
  func.func @transform_7(%arg0: i32, %arg1: memref<2xi32, #tpu.memory_space<smem>>, %arg2: memref<2x8xi32, #tpu.memory_space<smem>>) -> (i32, i32, i32) {
    %c0_i32 = arith.constant 0 : i32
    %c0_i32_0 = arith.constant 0 : i32
    %c0_i32_1 = arith.constant 0 : i32
    %c0_i32_2 = arith.constant 0 : i32
    return %c0_i32, %c0_i32_0, %c0_i32_1 : i32, i32, i32
  }
  func.func @transform_8(%arg0: i32, %arg1: memref<2xi32, #tpu.memory_space<smem>>, %arg2: memref<2x8xi32, #tpu.memory_space<smem>>) -> (i32, i32, i32) {
    %c0_i32 = arith.constant 0 : i32
    %c0_i32_0 = arith.constant 0 : i32
    %c0_i32_1 = arith.constant 0 : i32
    %c0_i32_2 = arith.constant 0 : i32
    return %c0_i32, %c0_i32_0, %c0_i32_1 : i32, i32, i32
  }
  func.func @transform_9(%arg0: i32, %arg1: memref<2xi32, #tpu.memory_space<smem>>, %arg2: memref<2x8xi32, #tpu.memory_space<smem>>) -> (i32, i32, i32) {
    %c0_i32 = arith.constant 0 : i32
    %c0_i32_0 = arith.constant 0 : i32
    %c0_i32_1 = arith.constant 0 : i32
    %c0_i32_2 = arith.constant 0 : i32
    return %c0_i32, %c0_i32_0, %c0_i32_1 : i32, i32, i32
  }
  func.func @transform_10(%arg0: i32, %arg1: memref<2xi32, #tpu.memory_space<smem>>, %arg2: memref<2x8xi32, #tpu.memory_space<smem>>) -> (i32, i32, i32) {
    %c0_i32 = arith.constant 0 : i32
    %c0_i32_0 = arith.constant 0 : i32
    %c0_i32_1 = arith.constant 0 : i32
    %c0_i32_2 = arith.constant 0 : i32
    return %c0_i32, %c0_i32_0, %c0_i32_1 : i32, i32, i32
  }
  func.func @transform_11(%arg0: i32, %arg1: memref<2xi32, #tpu.memory_space<smem>>, %arg2: memref<2x8xi32, #tpu.memory_space<smem>>) -> (i32, i32, i32) {
    %c0_i32 = arith.constant 0 : i32
    %c0_i32_0 = arith.constant 0 : i32
    %c0_i32_1 = arith.constant 0 : i32
    %c0_i32_2 = arith.constant 0 : i32
    return %c0_i32, %c0_i32_0, %c0_i32_1 : i32, i32, i32
  }
  func.func @transform_12(%arg0: i32, %arg1: memref<2xi32, #tpu.memory_space<smem>>, %arg2: memref<2x8xi32, #tpu.memory_space<smem>>) -> (i32, i32, i32) {
    %c0_i32 = arith.constant 0 : i32
    %c0_i32_0 = arith.constant 0 : i32
    %c0_i32_1 = arith.constant 0 : i32
    %c0_i32_2 = arith.constant 0 : i32
    return %c0_i32, %c0_i32_0, %c0_i32_1 : i32, i32, i32
  }
  func.func @transform_13(%arg0: i32, %arg1: memref<2xi32, #tpu.memory_space<smem>>, %arg2: memref<2x8xi32, #tpu.memory_space<smem>>) -> (i32, i32, i32) {
    %c0_i32 = arith.constant 0 : i32
    %c0_i32_0 = arith.constant 0 : i32
    %c0_i32_1 = arith.constant 0 : i32
    %c0_i32_2 = arith.constant 0 : i32
    return %c0_i32, %c0_i32_0, %c0_i32_1 : i32, i32, i32
  }
  func.func @transform_14(%arg0: i32, %arg1: memref<2xi32, #tpu.memory_space<smem>>, %arg2: memref<2x8xi32, #tpu.memory_space<smem>>) -> (i32, i32, i32) {
    %c0_i32 = arith.constant 0 : i32
    %c0_i32_0 = arith.constant 0 : i32
    %c0_i32_1 = arith.constant 0 : i32
    %c0_i32_2 = arith.constant 0 : i32
    return %c0_i32, %c0_i32_0, %c0_i32_1 : i32, i32, i32
  }
  func.func @transform_15(%arg0: i32, %arg1: memref<2xi32, #tpu.memory_space<smem>>, %arg2: memref<2x8xi32, #tpu.memory_space<smem>>) -> (i32, i32) {
    %c0_i32 = arith.constant 0 : i32
    %c0_i32_0 = arith.constant 0 : i32
    %c0_i32_1 = arith.constant 0 : i32
    return %c0_i32, %c0_i32_0 : i32, i32
  }
  func.func @transform_16(%arg0: i32, %arg1: memref<2xi32, #tpu.memory_space<smem>>, %arg2: memref<2x8xi32, #tpu.memory_space<smem>>) -> (i32, i32) {
    %c0_i32 = arith.constant 0 : i32
    %c0_i32_0 = arith.constant 0 : i32
    %c0_i32_1 = arith.constant 0 : i32
    return %c0_i32, %c0_i32_0 : i32, i32
  }
  func.func @transform_17(%arg0: i32, %arg1: memref<2xi32, #tpu.memory_space<smem>>, %arg2: memref<2x8xi32, #tpu.memory_space<smem>>) -> (i32, i32) {
    %c0_i32 = arith.constant 0 : i32
    %c0_i32_0 = arith.constant 0 : i32
    %c0_i32_1 = arith.constant 0 : i32
    return %c0_i32, %c0_i32_0 : i32, i32
  }
  func.func @transform_18(%arg0: i32, %arg1: memref<2xi32, #tpu.memory_space<smem>>, %arg2: memref<2x8xi32, #tpu.memory_space<smem>>) -> (i32, i32, i32, i32) {
    %c0_i32 = arith.constant 0 : i32
    %c0_i32_0 = arith.constant 0 : i32
    %c0_i32_1 = arith.constant 0 : i32
    %c0_i32_2 = arith.constant 0 : i32
    %c0_i32_3 = arith.constant 0 : i32
    return %c0_i32, %c0_i32_0, %c0_i32_1, %c0_i32_2 : i32, i32, i32, i32
  }
  func.func @transform_19(%arg0: i32, %arg1: memref<2xi32, #tpu.memory_space<smem>>, %arg2: memref<2x8xi32, #tpu.memory_space<smem>>) -> (i32, i32, i32) {
    %c0_i32 = arith.constant 0 : i32
    %c0_i32_0 = arith.constant 0 : i32
    %c0_i32_1 = arith.constant 0 : i32
    %c0_i32_2 = arith.constant 0 : i32
    return %c0_i32, %c0_i32_0, %c0_i32_1 : i32, i32, i32
  }
  func.func @transform_20(%arg0: i32, %arg1: memref<2xi32, #tpu.memory_space<smem>>, %arg2: memref<2x8xi32, #tpu.memory_space<smem>>) -> (i32, i32, i32) {
    %c0_i32 = arith.constant 0 : i32
    %c0_i32_0 = arith.constant 0 : i32
    %c0_i32_1 = arith.constant 0 : i32
    %c0_i32_2 = arith.constant 0 : i32
    return %c0_i32, %c0_i32_0, %c0_i32_1 : i32, i32, i32
  }
  func.func @transform_21(%arg0: i32, %arg1: memref<2xi32, #tpu.memory_space<smem>>, %arg2: memref<2x8xi32, #tpu.memory_space<smem>>) -> (i32, i32, i32) {
    %c0_i32 = arith.constant 0 : i32
    %c0_i32_0 = arith.constant 0 : i32
    %c0_i32_1 = arith.constant 0 : i32
    %c0_i32_2 = arith.constant 0 : i32
    return %c0_i32, %c0_i32_0, %c0_i32_1 : i32, i32, i32
  }
  func.func @transform_22(%arg0: i32, %arg1: memref<2xi32, #tpu.memory_space<smem>>, %arg2: memref<2x8xi32, #tpu.memory_space<smem>>) -> (i32, i32, i32) {
    %c0_i32 = arith.constant 0 : i32
    %c0_i32_0 = arith.constant 0 : i32
    %c0_i32_1 = arith.constant 0 : i32
    %c0_i32_2 = arith.constant 0 : i32
    return %c0_i32, %c0_i32_0, %c0_i32_1 : i32, i32, i32
  }
  func.func @transform_23(%arg0: i32, %arg1: memref<2xi32, #tpu.memory_space<smem>>, %arg2: memref<2x8xi32, #tpu.memory_space<smem>>) -> (i32, i32, i32) {
    %c0_i32 = arith.constant 0 : i32
    %c0_i32_0 = arith.constant 0 : i32
    %c0_i32_1 = arith.constant 0 : i32
    %c0_i32_2 = arith.constant 0 : i32
    return %c0_i32, %c0_i32_0, %c0_i32_1 : i32, i32, i32
  }
  func.func @transform_24(%arg0: i32, %arg1: memref<2xi32, #tpu.memory_space<smem>>, %arg2: memref<2x8xi32, #tpu.memory_space<smem>>) -> (i32, i32, i32) {
    %c0_i32 = arith.constant 0 : i32
    %c0_i32_0 = arith.constant 0 : i32
    %c0_i32_1 = arith.constant 0 : i32
    %c0_i32_2 = arith.constant 0 : i32
    return %c0_i32, %c0_i32_0, %c0_i32_1 : i32, i32, i32
  }
  func.func @transform_25(%arg0: i32, %arg1: memref<2xi32, #tpu.memory_space<smem>>, %arg2: memref<2x8xi32, #tpu.memory_space<smem>>) -> (i32, i32, i32) {
    %c0_i32 = arith.constant 0 : i32
    %c0_i32_0 = arith.constant 0 : i32
    %c0_i32_1 = arith.constant 0 : i32
    %c0_i32_2 = arith.constant 0 : i32
    return %c0_i32, %c0_i32_0, %c0_i32_1 : i32, i32, i32
  }
  func.func @transform_26(%arg0: i32, %arg1: memref<2xi32, #tpu.memory_space<smem>>, %arg2: memref<2x8xi32, #tpu.memory_space<smem>>) -> (i32, i32, i32) {
    %c0_i32 = arith.constant 0 : i32
    %c0_i32_0 = arith.constant 0 : i32
    %c0_i32_1 = arith.constant 0 : i32
    %c0_i32_2 = arith.constant 0 : i32
    return %c0_i32, %c0_i32_0, %c0_i32_1 : i32, i32, i32
  }
  func.func @transform_27(%arg0: i32, %arg1: memref<2xi32, #tpu.memory_space<smem>>, %arg2: memref<2x8xi32, #tpu.memory_space<smem>>) -> (i32, i32, i32) {
    %c0_i32 = arith.constant 0 : i32
    %c0_i32_0 = arith.constant 0 : i32
    %c0_i32_1 = arith.constant 0 : i32
    %c0_i32_2 = arith.constant 0 : i32
    return %c0_i32, %c0_i32_0, %c0_i32_1 : i32, i32, i32
  }
  func.func @transform_28(%arg0: i32, %arg1: memref<2xi32, #tpu.memory_space<smem>>, %arg2: memref<2x8xi32, #tpu.memory_space<smem>>) -> (i32, i32) {
    %c0_i32 = arith.constant 0 : i32
    %c0_i32_0 = arith.constant 0 : i32
    %c0_i32_1 = arith.constant 0 : i32
    return %c0_i32, %c0_i32_0 : i32, i32
  }
  func.func @transform_29(%arg0: i32, %arg1: memref<2xi32, #tpu.memory_space<smem>>, %arg2: memref<2x8xi32, #tpu.memory_space<smem>>) -> (i32, i32) {
    %c0_i32 = arith.constant 0 : i32
    %c0_i32_0 = arith.constant 0 : i32
    %c0_i32_1 = arith.constant 0 : i32
    return %c0_i32, %c0_i32_0 : i32, i32
  }
  func.func @transform_30(%arg0: i32, %arg1: memref<2xi32, #tpu.memory_space<smem>>, %arg2: memref<2x8xi32, #tpu.memory_space<smem>>) -> (i32, i32) {
    %c0_i32 = arith.constant 0 : i32
    %c0_i32_0 = arith.constant 0 : i32
    %c0_i32_1 = arith.constant 0 : i32
    return %c0_i32, %c0_i32_0 : i32, i32
  }
  func.func @transform_31(%arg0: i32, %arg1: memref<2xi32, #tpu.memory_space<smem>>, %arg2: memref<2x8xi32, #tpu.memory_space<smem>>) -> (i32, i32) {
    %c0_i32 = arith.constant 0 : i32
    %c0_i32_0 = arith.constant 0 : i32
    %c0_i32_1 = arith.constant 0 : i32
    return %c0_i32, %c0_i32_0 : i32, i32
  }
  func.func @transform_32(%arg0: i32, %arg1: memref<2xi32, #tpu.memory_space<smem>>, %arg2: memref<2x8xi32, #tpu.memory_space<smem>>) -> (i32, i32) {
    %c0_i32 = arith.constant 0 : i32
    %c0_i32_0 = arith.constant 0 : i32
    %c0_i32_1 = arith.constant 0 : i32
    return %c0_i32, %c0_i32_0 : i32, i32
  }
  func.func @transform_33(%arg0: i32, %arg1: memref<2xi32, #tpu.memory_space<smem>>, %arg2: memref<2x8xi32, #tpu.memory_space<smem>>) -> (i32, i32) {
    %c0_i32 = arith.constant 0 : i32
    %c0_i32_0 = arith.constant 0 : i32
    %c0_i32_1 = arith.constant 0 : i32
    return %c0_i32, %c0_i32_0 : i32, i32
  }
  func.func @transform_34(%arg0: i32, %arg1: memref<2xi32, #tpu.memory_space<smem>>, %arg2: memref<2x8xi32, #tpu.memory_space<smem>>) -> (i32, i32) {
    %c0_i32 = arith.constant 0 : i32
    %c0_i32_0 = arith.constant 0 : i32
    %c0_i32_1 = arith.constant 0 : i32
    return %c0_i32, %c0_i32_0 : i32, i32
  }
  func.func @transform_35(%arg0: i32, %arg1: memref<2xi32, #tpu.memory_space<smem>>, %arg2: memref<2x8xi32, #tpu.memory_space<smem>>) -> (i32, i32) {
    %c0_i32 = arith.constant 0 : i32
    %c0_i32_0 = arith.constant 0 : i32
    %c0_i32_1 = arith.constant 0 : i32
    return %c0_i32, %c0_i32_0 : i32, i32
  }
  func.func @transform_36(%arg0: i32, %arg1: memref<2xi32, #tpu.memory_space<smem>>, %arg2: memref<2x8xi32, #tpu.memory_space<smem>>) -> (i32, i32) {
    %c0_i32 = arith.constant 0 : i32
    %c0_i32_0 = arith.constant 0 : i32
    %c0_i32_1 = arith.constant 0 : i32
    return %c0_i32, %c0_i32_0 : i32, i32
  }
  func.func @transform_37(%arg0: i32, %arg1: memref<2xi32, #tpu.memory_space<smem>>, %arg2: memref<2x8xi32, #tpu.memory_space<smem>>) -> (i32, i32) {
    %c0_i32 = arith.constant 0 : i32
    %c0_i32_0 = arith.constant 0 : i32
    %c0_i32_1 = arith.constant 0 : i32
    return %c0_i32, %c0_i32_0 : i32, i32
  }
  func.func @transform_38(%arg0: i32, %arg1: memref<2xi32, #tpu.memory_space<smem>>, %arg2: memref<2x8xi32, #tpu.memory_space<smem>>) -> (i32, i32) {
    %c0_i32 = arith.constant 0 : i32
    %c0_i32_0 = arith.constant 0 : i32
    %c0_i32_1 = arith.constant 0 : i32
    return %c0_i32, %c0_i32_0 : i32, i32
  }
  func.func @transform_39(%arg0: i32, %arg1: memref<2xi32, #tpu.memory_space<smem>>, %arg2: memref<2x8xi32, #tpu.memory_space<smem>>) -> (i32, i32) {
    %c0_i32 = arith.constant 0 : i32
    %c0_i32_0 = arith.constant 0 : i32
    %c0_i32_1 = arith.constant 0 : i32
    return %c0_i32, %c0_i32_0 : i32, i32
  }
  func.func @transform_40(%arg0: i32, %arg1: memref<2xi32, #tpu.memory_space<smem>>, %arg2: memref<2x8xi32, #tpu.memory_space<smem>>) -> (i32, i32) {
    %c0_i32 = arith.constant 0 : i32
    %c0_i32_0 = arith.constant 0 : i32
    %c0_i32_1 = arith.constant 0 : i32
    return %c0_i32, %c0_i32_0 : i32, i32
  }
  func.func @transform_41(%arg0: i32, %arg1: memref<2xi32, #tpu.memory_space<smem>>, %arg2: memref<2x8xi32, #tpu.memory_space<smem>>) -> (i32, i32) {
    %c0_i32 = arith.constant 0 : i32
    %c0_i32_0 = arith.constant 0 : i32
    %c0_i32_1 = arith.constant 0 : i32
    return %c0_i32, %c0_i32_0 : i32, i32
  }
  func.func @transform_42(%arg0: i32, %arg1: memref<2xi32, #tpu.memory_space<smem>>, %arg2: memref<2x8xi32, #tpu.memory_space<smem>>) -> (i32, i32) {
    %c0_i32 = arith.constant 0 : i32
    %c0_i32_0 = arith.constant 0 : i32
    %c0_i32_1 = arith.constant 0 : i32
    return %c0_i32, %c0_i32_0 : i32, i32
  }
  func.func @transform_43(%arg0: i32, %arg1: memref<2xi32, #tpu.memory_space<smem>>, %arg2: memref<2x8xi32, #tpu.memory_space<smem>>) -> (i32, i32, i32) {
    %c0_i32 = arith.constant 0 : i32
    %c0_i32_0 = arith.constant 0 : i32
    %c0_i32_1 = arith.constant 0 : i32
    %c0_i32_2 = arith.constant 0 : i32
    return %c0_i32, %c0_i32_0, %c0_i32_1 : i32, i32, i32
  }
  func.func @transform_44(%arg0: i32, %arg1: memref<2xi32, #tpu.memory_space<smem>>, %arg2: memref<2x8xi32, #tpu.memory_space<smem>>) -> (i32, i32) {
    %c0_i32 = arith.constant 0 : i32
    %c0_i32_0 = arith.constant 0 : i32
    %c0_i32_1 = arith.constant 0 : i32
    return %c0_i32, %c0_i32_0 : i32, i32
  }
  func.func @transform_45(%arg0: i32, %arg1: memref<2xi32, #tpu.memory_space<smem>>, %arg2: memref<2x8xi32, #tpu.memory_space<smem>>) -> (i32, i32, i32) {
    %c0_i32 = arith.constant 0 : i32
    %c0_i32_0 = arith.constant 0 : i32
    %c0_i32_1 = arith.constant 0 : i32
    return %arg0, %c0_i32, %c0_i32_0 : i32, i32, i32
  }
}

</mosaic_0001>

<bundles_post_ra>
// kernel: traffic_scope_fwd.1
= control target key start
LH: loop header
LB: loop body
LE: loop exit
PB: predicated region body
PF: predicated region fallthrough
CT: control target
= control target key end

     0   :  { %s9443_s6 = smov 2   ;;  %s9444_s10 = smov 3   ;;  %s10809_s0 = inlined_call_operand.smem [shape: u32[48], index: -1, kind: input, shape index: {}] }
   0x1   :  { %s9541_s5 = sld [smem:[%s10809_s0]]   ;;  %s9445_s14 = smov 4  }
   0x2   :  { %s9546_s9 = sld [smem:[%s10809_s0 + %s9443_s6]]   ;;  %s9446_s18 = smov 5  }
   0x3   :  { %s9551_s13 = sld [smem:[%s10809_s0 + %s9444_s10]]   ;;  %s9447_s22 = smov 6  }
   0x4   :  { %s9556_s17 = sld [smem:[%s10809_s0 + %s9445_s14]]   ;;  %s9448_s26 = smov 7  }
   0x5   :  { %s9561_s21 = sld [smem:[%s10809_s0 + %s9446_s18]]   ;;  %s9449_s30 = smov 8  }
   0x6   :  { %s9566_s25 = sld [smem:[%s10809_s0 + %s9447_s22]]   ;;  %s9450_s4 = smov 9  }
   0x7   :  { %s9571_s29 = sld [smem:[%s10809_s0 + %s9448_s26]]   ;;  %s9451_s10 = smov 10  }
   0x8   :  { %10839 = sst [smem:[#allocation75_spill]] %s9546_s9  ;;  %s9452_s15 = smov 11  }
   0x9   :  { %10840 = sst [smem:[#allocation76_spill]] %s9551_s13  ;;  %s9453_s20 = smov 12  }
   0xa   :  { %10841 = sst [smem:[#allocation77_spill]] %s9556_s17  ;;  %s9454_s26 = smov 13  }
   0xb   :  { %10842 = sst [smem:[#allocation78_spill]] %s9561_s21  ;;  %s9455_s1 = smov 14  }
   0xc   :  { %10843 = sst [smem:[#allocation79_spill]] %s9566_s25  ;;  %s9456_s7 = smov 15  }
   0xd   :  { %10844 = sst [smem:[#allocation80_spill]] %s9571_s29  ;;  %s9458_s22 = smov 17  }
   0xe   :  { %s9576_s3 = sld [smem:[%s10809_s0 + %s9449_s30]]   ;;  %s9459_s28 = smov 18  }
   0xf   :  { %s9581_s8 = sld [smem:[%s10809_s0 + %s9450_s4]]  }
  0x10   :  { %s9586_s14 = sld [smem:[%s10809_s0 + %s9451_s10]]  }
  0x11   :  { %s9591_s19 = sld [smem:[%s10809_s0 + %s9452_s15]]   ;;  %s9457_s15 = smov 16  }
  0x12   :  { %s9596_s24 = sld [smem:[%s10809_s0 + %s9453_s20]]  }
  0x13   :  { %s9601_s30 = sld [smem:[%s10809_s0 + %s9454_s26]]  }
  0x14   :  { %10845 = sst [smem:[#allocation81_spill]] %s9576_s3 }
  0x15   :  { %10846 = sst [smem:[#allocation82_spill]] %s9581_s8 }
  0x16   :  { %10847 = sst [smem:[#allocation83_spill]] %s9586_s14  ;;  %s100_s14 = sshll.u32 %s9541_s5, 4  ;;  %s101_s14 = int_to_ptr.vmem [resolvable:$true] %s100_s14 }
  0x17   :  { %10848 = sst [smem:[#allocation84_spill]] %s9591_s19  ;;  %p8524_p1 = scmp.lt.s32.totalorder %s101_s14, %s101_s14 }
  0x18   :  { %s9606_s6 = sld [smem:[%s10809_s0 + %s9455_s1]]  }
  0x19   :  { %10849 = sst [smem:[#allocation85_spill]] %s9601_s30  ;;  %s9485_s30 = smov 44  }
  0x1a   :  { %s9611_s12 = sld [smem:[%s10809_s0 + %s9456_s7]]   ;;  %s9460_s7 = smov 19  }
  0x1b   :  { %s9616_s20 = sld [smem:[%s10809_s0 + %s9457_s15]]   ;;  %s9461_s15 = smov 20  }
  0x1c   :  { %s9621_s27 = sld [smem:[%s10809_s0 + %s9458_s22]]   ;;  %s9462_s22 = smov 21  }
  0x1d   :  { %s9626_s4 = sld [smem:[%s10809_s0 + %s9459_s28]]   ;;  %s9463_s28 = smov 22  }
  0x1e   :  { %10850 = sst [smem:[#allocation86_spill]] %s9606_s6 }
  0x1f   :  { %s9631_s13 = sld [smem:[%s10809_s0 + %s9460_s7]]   ;;  %s9464_s7 = smov 23  }
  0x20   :  { %10851 = sst [smem:[#allocation87_spill]] %s9611_s12 }
  0x21   :  { %10852 = sst [smem:[#allocation88_spill]] %s9616_s20 }
  0x22   :  { %10853 = sst [smem:[#allocation89_spill]] %s9621_s27 }
  0x23   :  { %10854 = sst [smem:[#allocation90_spill]] %s9626_s4 }
  0x24   :  { %s9636_s19 = sld [smem:[%s10809_s0 + %s9461_s15]]   ;;  %s9465_s15 = smov 24  }
  0x25   :  { %10855 = sst [smem:[#allocation91_spill]] %s9631_s13 }
  0x26   :  { %s9641_s8 = sld [smem:[%s10809_s0 + %s9462_s22]]   ;;  %s9466_s22 = smov 25  }
  0x27   :  { %s9646_s3 = sld [smem:[%s10809_s0 + %s9463_s28]]   ;;  %s9467_s28 = smov 26  }
  0x28   :  { %s9651_s25 = sld [smem:[%s10809_s0 + %s9464_s7]]   ;;  %s9468_s7 = smov 27  }
  0x29   :  { %s9671_s29 = sld [smem:[%s10809_s0 + %s9468_s7]]   ;;  %s9472_s7 = smov 31  }
  0x2a   :  { %10856 = sst [smem:[#allocation92_spill]] %s9636_s19 }
  0x2b   :  { %s9656_s19 = sld [smem:[%s10809_s0 + %s9465_s15]]   ;;  %s9469_s15 = smov 28  }
  0x2c   :  { %10857 = sst [smem:[#allocation93_spill]] %s9641_s8 }
  0x2d   :  { %10858 = sst [smem:[#allocation94_spill]] %s9646_s3 }
  0x2e   :  { %s9661_s8 = sld [smem:[%s10809_s0 + %s9466_s22]]   ;;  %s9470_s22 = smov 29  }
  0x2f   :  { %s9666_s3 = sld [smem:[%s10809_s0 + %s9467_s28]]   ;;  %s9471_s28 = smov 30  }
  0x30   :  { %10862 = sst [smem:[#allocation98_spill]] %s9671_s29 }
  0x31   :  { %10859 = sst [smem:[#allocation95_spill]] %s9656_s19 }
  0x32   :  { %s9676_s19 = sld [smem:[%s10809_s0 + %s9469_s15]]   ;;  %s9473_s15 = smov 32  }
  0x33   :  { %s9681_s9 = sld [smem:[%s10809_s0 + %s9470_s22]]   ;;  %s9474_s22 = smov 33  }
  0x34   :  { %10860 = sst [smem:[#allocation96_spill]] %s9661_s8 }
  0x35   :  { %10861 = sst [smem:[#allocation97_spill]] %s9666_s3 }
  0x36   :  { %s9686_s8 = sld [smem:[%s10809_s0 + %s9471_s28]]   ;;  %s9475_s28 = smov 34  }
  0x37   :  { %s9691_s29 = sld [smem:[%s10809_s0 + %s9472_s7]]   ;;  %s9476_s7 = smov 35  }
  0x38   :  { %10863 = sst [smem:[#allocation99_spill]] %s9676_s19 }
  0x39   :  { %10864 = sst [smem:[#allocation100_spill]] %s9681_s9 }
  0x3a   :  { %s9696_s13 = sld [smem:[%s10809_s0 + %s9473_s15]]   ;;  %s9477_s15 = smov 36  }
  0x3b   :  { %s9701_s9 = sld [smem:[%s10809_s0 + %s9474_s22]]   ;;  %s9478_s22 = smov 37  }
  0x3c   :  { %10865 = sst [smem:[#allocation101_spill]] %s9686_s8 }
  0x3d   :  { %10866 = sst [smem:[#allocation102_spill]] %s9691_s29 }
  0x3e   :  { %s9706_s27 = sld [smem:[%s10809_s0 + %s9475_s28]]   ;;  %s9479_s28 = smov 38  }
  0x3f   :  { %s9711_s29 = sld [smem:[%s10809_s0 + %s9476_s7]]   ;;  %s9480_s7 = smov 39  }
  0x40   :  { %10867 = sst [smem:[#allocation103_spill]] %s9696_s13 }
  0x41   :  { %10868 = sst [smem:[#allocation104_spill]] %s9701_s9 }
  0x42   :  { %s9716_s12 = sld [smem:[%s10809_s0 + %s9477_s15]]   ;;  %s9481_s15 = smov 40  }
  0x43   :  { %s9721_s9 = sld [smem:[%s10809_s0 + %s9478_s22]]   ;;  %s9482_s22 = smov 41  }
  0x44   :  { %s9726_s10 = sld [smem:[%s10809_s0 + %s9479_s28]]   ;;  %s9483_s28 = smov 42  }
  0x45   :  { %10869 = sst [smem:[#allocation105_spill]] %s9711_s29  ;;  %s9484_s29 = smov 43  }
  0x46   :  { %s9731_s16 = sld [smem:[%s10809_s0 + %s9480_s7]]  }
  0x47   :  { %s9736_s23 = sld [smem:[%s10809_s0 + %s9481_s15]]   ;;  %s8519_s15 = scalar_lea.vmem %s101_s14, 16 }
  0x48   :  { %10870 = sst [smem:[#allocation106_spill]] %s9716_s12  ;;  %p8520_p0 = scmp.ne.s32.totalorder %s101_s14, %s8519_s15 }
  0x49   :  { %10871 = sst [smem:[#allocation107_spill]] %s9721_s9  ;;  %s9486_s9 = smov 45  }
  0x4a   :  { %10872 = sst [smem:[#allocation108_spill]] %s9726_s10  ;;  %p8525_p2 = scmp.lt.s32.totalorder %s8519_s15, %s8519_s15 }
  0x4b   :  { %s9741_s1 = sld [smem:[%s10809_s0 + %s9482_s22]]  }
  0x4c   :  { %10873 = sst [smem:[#allocation109_spill]] %s9731_s16  ;;  %p8526_p3 = por %p8525_p2, %p8524_p1 }
  0x4d   :  { %10874 = sst [smem:[#allocation110_spill]] %s9736_s23 }
  0x4e   :  { %s9746_s17 = sld [smem:[%s10809_s0 + %s9483_s28]]   ;;  %s9487_s28 = smov 46  }
  0x4f   :  { %s9751_s16 = sld [smem:[%s10809_s0 + %s9484_s29]]   ;;  %s9488_s29 = smov 47  }
  0x50   :  { %s9756_s23 = sld [smem:[%s10809_s0 + %s9485_s30]]   ;;  %p8527_p4 = pnand %p8526_p3, %p8520_p0 }
  0x51   :  { %10875 = sst [smem:[#allocation111_spill]] %s9741_s1 }
  0x52   :  { %s9761_s1 = sld [smem:[%s10809_s0 + %s9486_s9]]  }
  0x53   :  { %s9767_s7 = sld [smem:[%s10809_s0 + %s9487_s28]]  }
  0x54   :  { %10876 = sst [smem:[#allocation112_spill]] %s9746_s17 }
  0x55   :  { %10877 = sst [smem:[#allocation113_spill]] %s9751_s16 }
  0x56   :  { %s9772_s30 = sld [smem:[%s10809_s0 + %s9488_s29]]  }
  0x59   :  { %10878 = sst [smem:[#allocation114_spill]] %s9767_s7 }
  0x5a   :  { %8530 = shalt.err (!%p8527_p4)  }
  0x5b   :  { %s9489_s5 = smov [#allocation3]   ;;  %s9490_s18 = smov 1  }
  0x5c   :  { %103 = dma.vmem_to_smem %s101_s14, 16, %s9489_s5, [#allocation2] }
  0x5d   :  { %s7129_s22 = sld [smem:[%s10809_s0 + %s9490_s18]]  }
  0x63   :  { %s104_s26 = sshll.u32 %s7129_s22, 4  ;;  %s105_s26 = int_to_ptr.vmem [resolvable:$true] %s104_s26 }
  0x64   :  { %s8531_s28 = scalar_lea.vmem %s105_s26, 32  ;;  %p8536_p6 = scmp.lt.s32.totalorder %s105_s26, %s105_s26 }
  0x65   :  { %p8532_p5 = scmp.ne.s32.totalorder %s105_s26, %s8531_s28  ;;  %p8537_p7 = scmp.lt.s32.totalorder %s8531_s28, %s8531_s28 }
  0x67   :  { %p8538_p8 = por %p8537_p7, %p8536_p6 }
  0x69   :  { %p8539_p9 = pnand %p8538_p8, %p8532_p5 }
  0x6b   :  { %8542 = shalt.err (!%p8539_p9)  }
  0x6c   :  { %s9491_s16 = smov [#allocation4]  }
  0x6d   :  { %107 = dma.vmem_to_smem %s105_s26, 32, %s9491_s16, [#allocation2] }
  0x6e   :  { %9353 = dma.done.wait [#allocation2], 48 }
  0x6f   :  { %9354 = vsyncadd [#allocation2], 4294967248 }
  0x70   :  { %109 = sfence }
  0x71   :  { %110 = vsyncpa [#allocation6], 0 }
  0x72   :  { %111 = vsyncpa [#allocation9], 0 }
  0x73   :  { %112 = vsyncpa [#allocation12], 0 }
  0x74   :  { %113 = vsyncpa [#allocation15], 0 }
  0x75   :  { %114 = vsyncpa [#allocation18], 0 }
  0x76   :  { %115 = vsyncpa [#allocation21], 0 }
  0x77   :  { %116 = vsyncpa [#allocation24], 0 }
  0x78   :  { %117 = vsyncpa [#allocation27], 0 }
  0x79   :  { %118 = vsyncpa [#allocation30], 0 }
  0x7a   :  { %119 = vsyncpa [#allocation33], 0 }
  0x7b   :  { %120 = vsyncpa [#allocation36], 0 }
  0x7c   :  { %121 = vsyncpa [#allocation39], 0 }
  0x7d   :  { %122 = vsyncpa [#allocation42], 0 }
  0x7e   :  { %123 = vsyncpa [#allocation45], 0 }
  0x7f   :  { %124 = vsyncpa [#allocation48], 0 }
  0x80   :  { %125 = vsyncpa [#allocation51], 0 }
  0x81   :  { %126 = vsyncpa [#allocation54], 0 }
  0x82   :  { %127 = vsyncpa [#allocation7], 0 }
  0x83   :  { %129 = vsyncpa [#allocation7 + $0x1], 0  ;;  %s9777_s0 = smov 0   ;;  %s9779_s14 = smov 0  }
  0x84   :  { %s9781_s2 = smov 0   ;;  %s9783_s29 = smov 0  }
  0x85 LB: > { %10879 = sst [smem:[#allocation115_spill]] %s9437_s2  ;;  %s9798_s11 = sadd.s32 4294967295, %s9441_s29   ;;  %s9441_s29 = sphi %s9783_s29, %s10938_s29   ;;  %s9437_s2 = sphi %s9781_s2, %s10940_s2   ;;  %s9433_s14 = sphi %s9779_s14, %s10942_s14   ;;  %s9429_s0 = sphi %s9777_s0, %s10941_s0  }
  0x86   : > { %s7177_s15 = sadd.s32 4294967294, %s9441_s29   ;;  %s9802_s5 = sadd.s32 1, %s9441_s29  }
  0x87   : > { %10880 = sst [smem:[#allocation116_spill]] %s9802_s5  ;;  %s1097_s18 = sadd.s32 1, %s9437_s2 }
  0x88   : > { %s1094_s17 = ssub.s32 %s9441_s29, %s9802_s5  ;;  %p1107_p10 = scmp.ne.s32.totalorder %s9437_s2, %s9433_s14 }
  0x89   : > { %p1095_p11 = scmp.eq.s32.totalorder %s1094_s17, 0  ;;  %p1108_p12 = scmp.eq.s32.totalorder %s9798_s11, 1 }
  0x8a   : > { %p1113_p13 = scmp.ne.s32.totalorder %s9433_s14, %s9429_s0  ;;  %p1114_p0 = scmp.eq.s32.totalorder %s7177_s15, 1 }
  0x8b   : > { %s9813_s9 = scalar_select %p1095_p11, %s9437_s2, %s1097_s18  }
  0x8c   : > { %p9815_p1 = por %p1108_p12, %p1107_p10  ;;  %p9819_p2 = por %p1114_p0, %p1113_p13 }
  0x8d   : > { %10881 = sst [smem:[#allocation117_spill]] %s9813_s9  ;;  %p7178_p3 = scmp.ge.s32.totalorder %s9441_s29, 1 }
  0x8e   : > { %s10882_s22 = scalar_select %p9815_p1, 1, 0 }
  0x8f   : > { %s10883_s26 = scalar_select %p9819_p2, 1, 0 }
  0x90   : > { %p1121_p4 = scmp.lt.s32.totalorder %s9441_s29, 3 }
  0x91   : > { %10884 = sst [smem:[#allocation118_spill]] %s10883_s26 }
  0x92   : > { %p9825_p5 = pnand %p7178_p3, %p1121_p4 }
  0x93   : > { %p8269_p6 = scmp.eq.s32.totalorder (!%p9825_p5), %s9798_s11, 0  ;;  %s9492_s16 = smov (!%p9825_p5), [#allocation8]  }
  0x94   : > { %1125 = sbr.rel (%p9825_p5) target bundleno = 519 (0x207), region = 12  ;;  %s1147_s15 = sshll.u32 (!%p9825_p5), %s9492_s16, 4  ;;  %s1148_s15 = int_to_ptr.vmem [resolvable:$true] %s1147_s15 }
  0x95   : > { %s8553_s18 = scalar_lea.vmem (!%p9825_p5), %s1148_s15, 16  ;;  %s8559_s17 = scalar_lea.vmem (!%p9825_p5), %s1148_s15, 32 }
  0x96   : > { %p8554_p7 = scmp.ne.s32.totalorder (!%p9825_p5), %s1148_s15, %s8553_s18  ;;  %p8560_p10 = scmp.lt.s32.totalorder (!%p9825_p5), %s1148_s15, %s1148_s15 }
  0x97   : > { %p8561_p11 = scmp.lt.s32.totalorder (!%p9825_p5), %s8559_s17, %s8553_s18 }
  0x98   : > { %p8555_p8 = pnand (!%p9825_p5), %p8554_p7, %p8269_p6 }
  0x99   : > { %p8562_p12 = por %p8561_p11, %p8560_p10 }
  0x9a   : > { %p8556_p9 = pneg %p8555_p8 }
  0x9c   : > { %p8563_p13 = pnand %p8562_p12, %p8556_p9 }
  0x9e   : > { %8566 = shalt.err (!%p8563_p13)
}
  0x9f   : > { %s10886_s21 = sld [smem:[#allocation78_spill]]  ;;  %s9493_s9 = smov [#allocation11]  }
  0xa0   : > { %s1185_s2 = sshll.u32 %s9493_s9, 4  ;;  %s1186_s2 = int_to_ptr.vmem [resolvable:$true] %s1185_s2 }
  0xa1   : > { %s8577_s16 = scalar_lea.vmem %s1186_s2, 32  ;;  %p8584_p7 = scmp.lt.s32.totalorder %s1186_s2, %s1186_s2 }
  0xa2   : > { %p8578_p0 = scmp.ne.s32.totalorder %s1186_s2, %s8577_s16  ;;  %p8585_p8 = scmp.lt.s32.totalorder %s8577_s16, %s8577_s16 }
  0xa4   : > { %p8579_p3 = pnand %p8578_p0, %p8269_p6  ;;  %p8586_p2 = por %p8585_p8, %p8584_p7 }
  0xa5   : > { %8138 = dma.hbm_to_vmem [thread:$0]  (%p8269_p6), %s10886_s21, 16, %s1148_s15, [#allocation9]  }
  0xa6   : > { %p8580_p4 = pneg %p8579_p3 }
  0xa8   : > { %p8587_p1 = pnand %p8586_p2, %p8580_p4 }
  0xaa   : > { %8590 = shalt.err (!%p8587_p1)
}
  0xab   : > { %s10824_s18 = smov 16   ;;  %s10826_s17 = smov 1  }
  0xac   : > { %8142 = dma.hbm_to_vmem [thread:$0]  (%p8269_p6), %s9596_s24, 32, %s1186_s2, [#allocation12], %s10824_s18, %s10824_s18, %s10826_s17  }
  0xad   : > { %s9496_s9 = smov [#allocation14]   ;;  %s9497_s21 = smov [#allocation17]  }
  0xae   : > { %s1211_s15 = sshll.u32 %s9496_s9, 4  ;;  %s1237_s5 = sshll.u32 %s9497_s21, 4  ;;  %s1212_s15 = int_to_ptr.vmem [resolvable:$true] %s1211_s15  ;;  %s1238_s5 = int_to_ptr.vmem [resolvable:$true] %s1237_s5 }
  0xaf   : > { %s8601_s26 = scalar_lea.vmem %s1212_s15, 256  ;;  %p8608_p10 = scmp.lt.s32.totalorder %s1212_s15, %s1212_s15 }
  0xb0   : > { %p8602_p9 = scmp.ne.s32.totalorder %s1212_s15, %s8601_s26  ;;  %p8609_p11 = scmp.lt.s32.totalorder %s8601_s26, %s8601_s26 }
  0xb2   : > { %p8603_p2 = pnand %p8602_p9, %p8269_p6  ;;  %p8610_p12 = por %p8609_p11, %p8608_p10 }
  0xb4   : > { %p8604_p1 = pneg %p8603_p2 }
  0xb6   : > { %p8611_p13 = pnand %p8610_p12, %p8604_p1 }
  0xb8   : > { %8614 = shalt.err (!%p8611_p13)
}
  0xb9   : > { %s10828_s16 = smov 128   ;;  %s10887_s6 = sld [smem:[#allocation86_spill]] }
  0xba   : > { %s10830_s2 = smov 8   ;;  %s8625_s21 = scalar_lea.vmem %s1238_s5, 256 }
  0xbb   : > { %p8626_p0 = scmp.ne.s32.totalorder %s1238_s5, %s8625_s21  ;;  %p8632_p7 = scmp.lt.s32.totalorder %s1238_s5, %s1238_s5 }
  0xbc   : > { %p8633_p8 = scmp.lt.s32.totalorder %s8625_s21, %s8625_s21 }
  0xbd   : > { %p8627_p3 = pnand %p8626_p0, %p8269_p6 }
  0xbe   : > { %p8634_p9 = por %p8633_p8, %p8632_p7 }
  0xbf   : > { %8146 = dma.hbm_to_vmem [thread:$0]  (%p8269_p6), %s10887_s6, 256, %s1212_s15, [#allocation15], %s10828_s16, %s10828_s16, %s10830_s2  }
  0xc0   : > { %p8628_p4 = pneg %p8627_p3 }
  0xc2   : > { %p8635_p2 = pnand %p8634_p9, %p8628_p4 }
  0xc4   : > { %8638 = shalt.err (!%p8635_p2)
}
  0xc5   : > { %s10888_s20 = sld [smem:[#allocation88_spill]]  ;;  %s9500_s26 = smov [#allocation20]  }
  0xc6   : > { %s1264_s9 = sshll.u32 %s9500_s26, 4  ;;  %s9501_s15 = smov [#allocation23]   ;;  %s1265_s9 = int_to_ptr.vmem [resolvable:$true] %s1264_s9 }
  0xc7   : > { %s1294_s18 = sshll.u32 %s9501_s15, 4  ;;  %s8649_s17 = scalar_lea.vmem %s1265_s9, 16  ;;  %s1295_s18 = int_to_ptr.vmem [resolvable:$true] %s1294_s18 }
  0xc8   : > { %p8650_p1 = scmp.ne.s32.totalorder %s1265_s9, %s8649_s17  ;;  %s8655_s21 = scalar_lea.vmem %s1265_s9, 32 }
  0xc9   : > { %p8656_p12 = scmp.lt.s32.totalorder %s1265_s9, %s1265_s9  ;;  %p8657_p13 = scmp.lt.s32.totalorder %s8655_s21, %s8649_s17 }
  0xca   : > { %p8651_p10 = pnand %p8650_p1, %p8269_p6 }
  0xcb   : > { %8150 = dma.hbm_to_vmem [thread:$0]  (%p8269_p6), %s10888_s20, 256, %s1238_s5, [#allocation18], %s10828_s16, %s10828_s16, %s10830_s2  }
  0xcc   : > { %p8652_p11 = pneg %p8651_p10  ;;  %p8658_p0 = por %p8657_p13, %p8656_p12 }
  0xce   : > { %p8659_p3 = pnand %p8658_p0, %p8652_p11 }
  0xd0   : > { %8662 = shalt.err (!%p8659_p3)
}
  0xd1   : > { %s10889_s4 = sld [smem:[#allocation90_spill]]  ;;  %s8673_s5 = scalar_lea.vmem %s1295_s18, 32 }
  0xd2   : > { %p8674_p4 = scmp.ne.s32.totalorder %s1295_s18, %s8673_s5  ;;  %p8680_p9 = scmp.lt.s32.totalorder %s1295_s18, %s1295_s18 }
  0xd3   : > { %p8681_p2 = scmp.lt.s32.totalorder %s8673_s5, %s8673_s5 }
  0xd4   : > { %p8675_p7 = pnand %p8674_p4, %p8269_p6 }
  0xd5   : > { %p8682_p1 = por %p8681_p2, %p8680_p9 }
  0xd6   : > { %p8676_p8 = pneg %p8675_p7 }
  0xd7   : > { %8154 = dma.hbm_to_vmem [thread:$0]  (%p8269_p6), %s10889_s4, 16, %s1265_s9, [#allocation21]  }
  0xd8   : > { %p8683_p10 = pnand %p8682_p1, %p8676_p8 }
  0xda   : > { %8686 = shalt.err (!%p8683_p10)
}
  0xdb   : > { %s10890_s17 = smov 1   ;;  %s10891_s26 = smov 16  }
  0xdc   : > { %8158 = dma.hbm_to_vmem [thread:$0]  (%p8269_p6), %s9651_s25, 32, %s1295_s18, [#allocation24], %s10891_s26, %s10891_s26, %s10890_s17  }
  0xdd   : > { %s9502_s9 = smov [#allocation26]   ;;  %s9503_s21 = smov [#allocation29]  }
  0xde   : > { %s1323_s15 = sshll.u32 %s9502_s9, 4  ;;  %s1349_s16 = sshll.u32 %s9503_s21, 4  ;;  %s1324_s15 = int_to_ptr.vmem [resolvable:$true] %s1323_s15  ;;  %s1350_s16 = int_to_ptr.vmem [resolvable:$true] %s1349_s16 }
  0xdf   : > { %s8697_s2 = scalar_lea.vmem %s1324_s15, 256  ;;  %p8704_p0 = scmp.lt.s32.totalorder %s1324_s15, %s1324_s15 }
  0xe0   : > { %p8698_p11 = scmp.ne.s32.totalorder %s1324_s15, %s8697_s2  ;;  %p8705_p3 = scmp.lt.s32.totalorder %s8697_s2, %s8697_s2 }
  0xe2   : > { %p8699_p12 = pnand %p8698_p11, %p8269_p6  ;;  %p8706_p4 = por %p8705_p3, %p8704_p0 }
  0xe4   : > { %p8700_p13 = pneg %p8699_p12 }
  0xe6   : > { %p8707_p7 = pnand %p8706_p4, %p8700_p13 }
  0xe8   : > { %8710 = shalt.err (!%p8707_p7)
}
  0xe9   : > { %s10892_s5 = smov 8   ;;  %s10893_s4 = smov 128  }
  0xea   : > { %s10894_s3 = sld [smem:[#allocation97_spill]]  ;;  %s8721_s18 = scalar_lea.vmem %s1350_s16, 256 }
  0xeb   : > { %p8722_p8 = scmp.ne.s32.totalorder %s1350_s16, %s8721_s18  ;;  %p8728_p1 = scmp.lt.s32.totalorder %s1350_s16, %s1350_s16 }
  0xec   : > { %p8729_p10 = scmp.lt.s32.totalorder %s8721_s18, %s8721_s18 }
  0xed   : > { %p8723_p9 = pnand %p8722_p8, %p8269_p6 }
  0xee   : > { %p8730_p11 = por %p8729_p10, %p8728_p1 }
  0xef   : > { %p8724_p2 = pneg %p8723_p9 }
  0xf0   : > { %8162 = dma.hbm_to_vmem [thread:$0]  (%p8269_p6), %s10894_s3, 256, %s1324_s15, [#allocation27], %s10893_s4, %s10893_s4, %s10892_s5  }
  0xf1   : > { %p8731_p12 = pnand %p8730_p11, %p8724_p2 }
  0xf3   : > { %8734 = shalt.err (!%p8731_p12)
}
  0xf4   : > { %s10895_s19 = sld [smem:[#allocation99_spill]]  ;;  %s9504_s2 = smov [#allocation32]  }
  0xf5   : > { %s1376_s9 = sshll.u32 %s9504_s2, 4  ;;  %s9505_s15 = smov [#allocation35]   ;;  %s1377_s9 = int_to_ptr.vmem [resolvable:$true] %s1376_s9 }
  0xf6   : > { %s1400_s21 = sshll.u32 %s9505_s15, 4  ;;  %s8745_s3 = scalar_lea.vmem %s1377_s9, 32  ;;  %s1401_s21 = int_to_ptr.vmem [resolvable:$true] %s1400_s21 }
  0xf7   : > { %p8746_p13 = scmp.ne.s32.totalorder %s1377_s9, %s8745_s3  ;;  %p8752_p4 = scmp.lt.s32.totalorder %s1377_s9, %s1377_s9 }
  0xf8   : > { %p8753_p7 = scmp.lt.s32.totalorder %s8745_s3, %s8745_s3 }
  0xf9   : > { %p8747_p0 = pnand %p8746_p13, %p8269_p6 }
  0xfa   : > { %8166 = dma.hbm_to_vmem [thread:$0]  (%p8269_p6), %s10895_s19, 256, %s1350_s16, [#allocation30], %s10893_s4, %s10893_s4, %s10892_s5  }
  0xfb   : > { %p8748_p3 = pneg %p8747_p0  ;;  %p8754_p8 = por %p8753_p7, %p8752_p4 }
  0xfd   : > { %p8755_p9 = pnand %p8754_p8, %p8748_p3 }
  0xff   : > { %8758 = shalt.err (!%p8755_p9)
}
 0x100   : > { %s10896_s8 = sld [smem:[#allocation101_spill]]  ;;  %s8769_s16 = scalar_lea.vmem %s1401_s21, 16 }
 0x101   : > { %p8770_p2 = scmp.ne.s32.totalorder %s1401_s21, %s8769_s16  ;;  %s8775_s18 = scalar_lea.vmem %s1401_s21, 32 }
 0x102   : > { %p8776_p11 = scmp.lt.s32.totalorder %s1401_s21, %s1401_s21  ;;  %p8777_p12 = scmp.lt.s32.totalorder %s8775_s18, %s8769_s16 }
 0x103   : > { %p8771_p1 = pnand %p8770_p2, %p8269_p6 }
 0x104   : > { %p8778_p13 = por %p8777_p12, %p8776_p11 }
 0x105   : > { %p8772_p10 = pneg %p8771_p1 }
 0x106   : > { %8170 = dma.hbm_to_vmem [thread:$0]  (%p8269_p6), %s10896_s8, 32, %s1377_s9, [#allocation33]  }
 0x107   : > { %p8779_p0 = pnand %p8778_p13, %p8772_p10 }
 0x109   : > { %8782 = shalt.err (!%p8779_p0)
}
 0x10a   : > { %s10897_s13 = sld [smem:[#allocation103_spill]]  ;;  %s9506_s3 = smov [#allocation38]  }
 0x10b   : > { %s1424_s2 = sshll.u32 %s9506_s3, 4  ;;  %s9507_s9 = smov [#allocation41]   ;;  %s1425_s2 = int_to_ptr.vmem [resolvable:$true] %s1424_s2 }
 0x10c   : > { %s1448_s15 = sshll.u32 %s9507_s9, 4  ;;  %s8793_s6 = scalar_lea.vmem %s1425_s2, 16  ;;  %s1449_s15 = int_to_ptr.vmem [resolvable:$true] %s1448_s15 }
 0x10d   : > { %p8794_p3 = scmp.ne.s32.totalorder %s1425_s2, %s8793_s6  ;;  %s8799_s8 = scalar_lea.vmem %s1425_s2, 32 }
 0x10e   : > { %p8800_p8 = scmp.lt.s32.totalorder %s1425_s2, %s1425_s2  ;;  %p8801_p9 = scmp.lt.s32.totalorder %s8799_s8, %s8793_s6 }
 0x10f   : > { %p8795_p4 = pnand %p8794_p3, %p8269_p6 }
 0x110   : > { %8174 = dma.hbm_to_vmem [thread:$0]  (%p8269_p6), %s10897_s13, 16, %s1401_s21, [#allocation36]  }
 0x111   : > { %p8796_p7 = pneg %p8795_p4  ;;  %p8802_p2 = por %p8801_p9, %p8800_p8 }
 0x113   : > { %p8803_p1 = pnand %p8802_p2, %p8796_p7 }
 0x115   : > { %8806 = shalt.err (!%p8803_p1)
}
 0x116   : > { %8178 = dma.hbm_to_vmem [thread:$0]  (%p8269_p6), %s9706_s27, 16, %s1425_s2, [#allocation39]  }
 0x117   : > { %s8817_s21 = scalar_lea.vmem %s1449_s15, 16  ;;  %s8823_s16 = scalar_lea.vmem %s1449_s15, 32 }
 0x118   : > { %p8818_p10 = scmp.ne.s32.totalorder %s1449_s15, %s8817_s21  ;;  %p8824_p13 = scmp.lt.s32.totalorder %s1449_s15, %s1449_s15 }
 0x119   : > { %p8825_p0 = scmp.lt.s32.totalorder %s8823_s16, %s8817_s21 }
 0x11a   : > { %p8819_p11 = pnand %p8818_p10, %p8269_p6 }
 0x11b   : > { %p8826_p3 = por %p8825_p0, %p8824_p13 }
 0x11c   : > { %p8820_p12 = pneg %p8819_p11 }
 0x11e   : > { %p8827_p4 = pnand %p8826_p3, %p8820_p12 }
 0x120   : > { %8830 = shalt.err (!%p8827_p4)
}
 0x121   : > { %s10898_s12 = sld [smem:[#allocation106_spill]]  ;;  %s9508_s8 = smov [#allocation44]  }
 0x122   : > { %s1472_s6 = sshll.u32 %s9508_s8, 4  ;;  %s9509_s18 = smov [#allocation47]   ;;  %s1473_s6 = int_to_ptr.vmem [resolvable:$true] %s1472_s6 }
 0x123   : > { %s1497_s3 = sshll.u32 %s9509_s18, 4  ;;  %s8841_s2 = scalar_lea.vmem %s1473_s6, 16  ;;  %s1498_s3 = int_to_ptr.vmem [resolvable:$true] %s1497_s3 }
 0x124   : > { %p8842_p7 = scmp.ne.s32.totalorder %s1473_s6, %s8841_s2  ;;  %s8847_s9 = scalar_lea.vmem %s1473_s6, 32 }
 0x125   : > { %p8848_p2 = scmp.lt.s32.totalorder %s1473_s6, %s1473_s6  ;;  %p8849_p1 = scmp.lt.s32.totalorder %s8847_s9, %s8841_s2 }
 0x126   : > { %p8843_p8 = pnand %p8842_p7, %p8269_p6 }
 0x127   : > { %8182 = dma.hbm_to_vmem [thread:$0]  (%p8269_p6), %s10898_s12, 16, %s1449_s15, [#allocation42]  }
 0x128   : > { %p8844_p9 = pneg %p8843_p8  ;;  %p8850_p10 = por %p8849_p1, %p8848_p2 }
 0x12a   : > { %p8851_p11 = pnand %p8850_p10, %p8844_p9 }
 0x12c   : > { %8854 = shalt.err (!%p8851_p11)
}
 0x12d   : > { %s10899_s10 = sld [smem:[#allocation108_spill]]  ;;  %s8865_s15 = scalar_lea.vmem %s1498_s3, 128 }
 0x12e   : > { %p8866_p12 = scmp.ne.s32.totalorder %s1498_s3, %s8865_s15  ;;  %p8872_p3 = scmp.lt.s32.totalorder %s1498_s3, %s1498_s3 }
 0x12f   : > { %p8873_p4 = scmp.lt.s32.totalorder %s8865_s15, %s8865_s15 }
 0x130   : > { %p8867_p13 = pnand %p8866_p12, %p8269_p6 }
 0x131   : > { %p8874_p7 = por %p8873_p4, %p8872_p3 }
 0x132   : > { %p8868_p0 = pneg %p8867_p13 }
 0x133   : > { %8186 = dma.hbm_to_vmem [thread:$0]  (%p8269_p6), %s10899_s10, 16, %s1473_s6, [#allocation45]  }
 0x134   : > { %p8875_p8 = pnand %p8874_p7, %p8868_p0 }
 0x136   : > { %8878 = shalt.err (!%p8875_p8)
}
 0x137   : > { %s10900_s21 = sld [smem:[#allocation111_spill]]  ;;  %s9510_s16 = smov [#allocation50]  }
 0x138   : > { %s1519_s8 = sshll.u32 %s9510_s16, 4  ;;  %s1520_s8 = int_to_ptr.vmem [resolvable:$true] %s1519_s8 }
 0x139   : > { %s8889_s6 = scalar_lea.vmem %s1520_s8, 128  ;;  %p8896_p10 = scmp.lt.s32.totalorder %s1520_s8, %s1520_s8 }
 0x13a   : > { %p8890_p9 = scmp.ne.s32.totalorder %s1520_s8, %s8889_s6  ;;  %p8897_p11 = scmp.lt.s32.totalorder %s8889_s6, %s8889_s6 }
 0x13c   : > { %p8891_p2 = pnand %p8890_p9, %p8269_p6  ;;  %p8898_p12 = por %p8897_p11, %p8896_p10 }
 0x13d   : > { %8190 = dma.hbm_to_vmem [thread:$0]  (%p8269_p6), %s10900_s21, 128, %s1498_s3, [#allocation48]  }
 0x13e   : > { %p8892_p1 = pneg %p8891_p2 }
 0x140   : > { %p8899_p13 = pnand %p8898_p12, %p8892_p1 }
 0x142   : > { %8902 = shalt.err (!%p8899_p13)
}
 0x143   : > { %s10901_s18 = sld [smem:[#allocation113_spill]]  ;;  %s9511_s2 = smov [#allocation5]  }
 0x144   : > { %s1133_s3 = sshll.u32 %s9511_s2, 4  ;;  %s9512_s9 = smov [#allocation10]   ;;  %s1134_s3 = int_to_ptr.vmem [resolvable:$true] %s1133_s3 }
 0x145   : > { %s1169_s15 = sshll.u32 %s9512_s9, 4  ;;  %s8913_s21 = scalar_lea.vmem %s1134_s3, 512  ;;  %s1170_s15 = int_to_ptr.vmem [resolvable:$true] %s1169_s15 }
 0x146   : > { %p8914_p0 = scmp.ne.s32.totalorder %s1134_s3, %s8913_s21  ;;  %p8920_p7 = scmp.lt.s32.totalorder %s1134_s3, %s1134_s3 }
 0x147   : > { %p8921_p8 = scmp.lt.s32.totalorder %s8913_s21, %s8913_s21 }
 0x148   : > { %p8915_p3 = pnand %p8914_p0, %p8269_p6 }
 0x149   : > { %8194 = dma.hbm_to_vmem [thread:$0]  (%p8269_p6), %s10901_s18, 128, %s1520_s8, [#allocation51]  }
 0x14a   : > { %p8916_p4 = pneg %p8915_p3  ;;  %p8922_p9 = por %p8921_p8, %p8920_p7 }
 0x14c   : > { %p8923_p2 = pnand %p8922_p9, %p8916_p4 }
 0x14e   : > { %8926 = shalt.err (!%p8923_p2)
}
 0x14f   : > { %s10902_s16 = sld [smem:[#allocation77_spill]]  ;;  %s8937_s8 = scalar_lea.vmem %s1170_s15, 32 }
 0x150   : > { %p8938_p1 = scmp.ne.s32.totalorder %s1170_s15, %s8937_s8  ;;  %p8944_p12 = scmp.lt.s32.totalorder %s1170_s15, %s1170_s15 }
 0x151   : > { %p8945_p13 = scmp.lt.s32.totalorder %s8937_s8, %s8937_s8 }
 0x152   : > { %p8939_p10 = pnand %p8938_p1, %p8269_p6 }
 0x153   : > { %p8946_p0 = por %p8945_p13, %p8944_p12 }
 0x154   : > { %p8940_p11 = pneg %p8939_p10 }
 0x155   : > { %8136 = dma.hbm_to_vmem [thread:$0]  (%p8269_p6), %s10902_s16, 512, %s1134_s3, [#allocation6], %s10893_s4, %s10893_s4, %s10892_s5  }
 0x156   : > { %p8947_p3 = pnand %p8946_p0, %p8940_p11 }
 0x158   : > { %8950 = shalt.err (!%p8947_p3)
}
 0x159   : > { %s10903_s6 = sld [smem:[#allocation83_spill]]  ;;  %s9513_s18 = smov [#allocation13]  }
 0x15a   : > { %s1198_s2 = sshll.u32 %s9513_s18, 4  ;;  %s9514_s3 = smov [#allocation16]   ;;  %s1199_s2 = int_to_ptr.vmem [resolvable:$true] %s1198_s2 }
 0x15b   : > { %s1224_s9 = sshll.u32 %s9514_s3, 4  ;;  %s8961_s21 = scalar_lea.vmem %s1199_s2, 256  ;;  %s1225_s9 = int_to_ptr.vmem [resolvable:$true] %s1224_s9 }
 0x15c   : > { %p8962_p4 = scmp.ne.s32.totalorder %s1199_s2, %s8961_s21  ;;  %p8968_p9 = scmp.lt.s32.totalorder %s1199_s2, %s1199_s2 }
 0x15d   : > { %p8969_p2 = scmp.lt.s32.totalorder %s8961_s21, %s8961_s21 }
 0x15e   : > { %p8963_p7 = pnand %p8962_p4, %p8269_p6 }
 0x15f   : > { %8140 = dma.hbm_to_vmem [thread:$0]  (%p8269_p6), %s10903_s6, 32, %s1170_s15, [#allocation9], %s10891_s26, %s10891_s26, %s10890_s17  }
 0x160   : > { %p8964_p8 = pneg %p8963_p7  ;;  %p8970_p1 = por %p8969_p2, %p8968_p9 }
 0x162   : > { %p8971_p10 = pnand %p8970_p1, %p8964_p8 }
 0x164   : > { %8974 = shalt.err (!%p8971_p10)
}
 0x165   : > { %s10904_s15 = sld [smem:[#allocation85_spill]]  ;;  %s8985_s16 = scalar_lea.vmem %s1225_s9, 256 }
 0x166   : > { %p8986_p11 = scmp.ne.s32.totalorder %s1225_s9, %s8985_s16  ;;  %p8992_p0 = scmp.lt.s32.totalorder %s1225_s9, %s1225_s9 }
 0x167   : > { %p8993_p3 = scmp.lt.s32.totalorder %s8985_s16, %s8985_s16 }
 0x168   : > { %p8987_p12 = pnand %p8986_p11, %p8269_p6 }
 0x169   : > { %p8994_p4 = por %p8993_p3, %p8992_p0 }
 0x16a   : > { %p8988_p13 = pneg %p8987_p12 }
 0x16b   : > { %8144 = dma.hbm_to_vmem [thread:$0]  (%p8269_p6), %s10904_s15, 256, %s1199_s2, [#allocation12], %s10893_s4, %s10893_s4, %s10892_s5  }
 0x16c   : > { %p8995_p7 = pnand %p8994_p4, %p8988_p13 }
 0x16e   : > { %8998 = shalt.err (!%p8995_p7)
}
 0x16f   : > { %s10905_s8 = sld [smem:[#allocation87_spill]]  ;;  %s9515_s6 = smov [#allocation19]  }
 0x170   : > { %s1250_s18 = sshll.u32 %s9515_s6, 4  ;;  %s9516_s2 = smov [#allocation22]   ;;  %s1251_s18 = int_to_ptr.vmem [resolvable:$true] %s1250_s18 }
 0x171   : > { %s1275_s3 = sshll.u32 %s9516_s2, 4  ;;  %s9009_s21 = scalar_lea.vmem %s1251_s18, 512  ;;  %s1276_s3 = int_to_ptr.vmem [resolvable:$true] %s1275_s3 }
 0x172   : > { %p9010_p8 = scmp.ne.s32.totalorder %s1251_s18, %s9009_s21  ;;  %p9016_p1 = scmp.lt.s32.totalorder %s1251_s18, %s1251_s18 }
 0x173   : > { %p9017_p10 = scmp.lt.s32.totalorder %s9009_s21, %s9009_s21 }
 0x174   : > { %p9011_p9 = pnand %p9010_p8, %p8269_p6 }
 0x175   : > { %8148 = dma.hbm_to_vmem [thread:$0]  (%p8269_p6), %s10905_s8, 256, %s1225_s9, [#allocation15], %s10893_s4, %s10893_s4, %s10892_s5  }
 0x176   : > { %p9012_p2 = pneg %p9011_p9  ;;  %p9018_p11 = por %p9017_p10, %p9016_p1 }
 0x178   : > { %p9019_p12 = pnand %p9018_p11, %p9012_p2 }
 0x17a   : > { %9022 = shalt.err (!%p9019_p12)
}
 0x17b   : > { %s10906_s9 = sld [smem:[#allocation89_spill]]  ;;  %s9033_s15 = scalar_lea.vmem %s1276_s3, 128 }
 0x17c   : > { %p9034_p13 = scmp.ne.s32.totalorder %s1276_s3, %s9033_s15  ;;  %p9040_p4 = scmp.lt.s32.totalorder %s1276_s3, %s1276_s3 }
 0x17d   : > { %p9041_p7 = scmp.lt.s32.totalorder %s9033_s15, %s9033_s15 }
 0x17e   : > { %p9035_p0 = pnand %p9034_p13, %p8269_p6 }
 0x17f   : > { %p9042_p8 = por %p9041_p7, %p9040_p4 }
 0x180   : > { %p9036_p3 = pneg %p9035_p0 }
 0x181   : > { %8152 = dma.hbm_to_vmem [thread:$0]  (%p8269_p6), %s10906_s9, 512, %s1251_s18, [#allocation18], %s10893_s4, %s10893_s4, %s10892_s5  }
 0x182   : > { %p9043_p9 = pnand %p9042_p8, %p9036_p3 }
 0x184   : > { %9046 = shalt.err (!%p9043_p9)
}
 0x185   : > { %s10907_s16 = sld [smem:[#allocation91_spill]]  ;;  %s9517_s8 = smov [#allocation25]  }
 0x186   : > { %s1310_s6 = sshll.u32 %s9517_s8, 4  ;;  %s9518_s18 = smov [#allocation28]   ;;  %s1311_s6 = int_to_ptr.vmem [resolvable:$true] %s1310_s6 }
 0x187   : > { %s1336_s2 = sshll.u32 %s9518_s18, 4  ;;  %s9057_s21 = scalar_lea.vmem %s1311_s6, 32  ;;  %s1337_s2 = int_to_ptr.vmem [resolvable:$true] %s1336_s2 }
 0x188   : > { %p9058_p2 = scmp.ne.s32.totalorder %s1311_s6, %s9057_s21  ;;  %p9064_p11 = scmp.lt.s32.totalorder %s1311_s6, %s1311_s6 }
 0x189   : > { %p9065_p12 = scmp.lt.s32.totalorder %s9057_s21, %s9057_s21 }
 0x18a   : > { %p9059_p1 = pnand %p9058_p2, %p8269_p6 }
 0x18b   : > { %8156 = dma.hbm_to_vmem [thread:$0]  (%p8269_p6), %s10907_s16, 128, %s1276_s3, [#allocation21]  }
 0x18c   : > { %p9060_p10 = pneg %p9059_p1  ;;  %p9066_p13 = por %p9065_p12, %p9064_p11 }
 0x18e   : > { %p9067_p0 = pnand %p9066_p13, %p9060_p10 }
 0x190   : > { %9070 = shalt.err (!%p9067_p0)
}
 0x191   : > { %s10908_s3 = sld [smem:[#allocation96_spill]]  ;;  %s9081_s9 = scalar_lea.vmem %s1337_s2, 256 }
 0x192   : > { %p9082_p3 = scmp.ne.s32.totalorder %s1337_s2, %s9081_s9  ;;  %p9088_p8 = scmp.lt.s32.totalorder %s1337_s2, %s1337_s2 }
 0x193   : > { %p9089_p9 = scmp.lt.s32.totalorder %s9081_s9, %s9081_s9 }
 0x194   : > { %p9083_p4 = pnand %p9082_p3, %p8269_p6 }
 0x195   : > { %p9090_p2 = por %p9089_p9, %p9088_p8 }
 0x196   : > { %p9084_p7 = pneg %p9083_p4 }
 0x197   : > { %8160 = dma.hbm_to_vmem [thread:$0]  (%p8269_p6), %s10908_s3, 32, %s1311_s6, [#allocation24], %s10891_s26, %s10891_s26, %s10890_s17  }
 0x198   : > { %p9091_p1 = pnand %p9090_p2, %p9084_p7 }
 0x19a   : > { %9094 = shalt.err (!%p9091_p1)
}
 0x19b   : > { %s10909_s15 = sld [smem:[#allocation98_spill]]  ;;  %s9519_s17 = smov [#allocation31]  }
 0x19c   : > { %s1362_s26 = sshll.u32 %s9519_s17, 4  ;;  %s9520_s16 = smov [#allocation34]   ;;  %s1363_s26 = int_to_ptr.vmem [resolvable:$true] %s1362_s26 }
 0x19d   : > { %s1386_s8 = sshll.u32 %s9520_s16, 4  ;;  %s9105_s6 = scalar_lea.vmem %s1363_s26, 256  ;;  %s1387_s8 = int_to_ptr.vmem [resolvable:$true] %s1386_s8 }
 0x19e   : > { %p9106_p10 = scmp.ne.s32.totalorder %s1363_s26, %s9105_s6  ;;  %p9112_p13 = scmp.lt.s32.totalorder %s1363_s26, %s1363_s26 }
 0x19f   : > { %p9113_p0 = scmp.lt.s32.totalorder %s9105_s6, %s9105_s6 }
 0x1a0   : > { %p9107_p11 = pnand %p9106_p10, %p8269_p6 }
 0x1a1   : > { %8164 = dma.hbm_to_vmem [thread:$0]  (%p8269_p6), %s10909_s15, 256, %s1337_s2, [#allocation27], %s10893_s4, %s10893_s4, %s10892_s5  }
 0x1a2   : > { %p9108_p12 = pneg %p9107_p11  ;;  %p9114_p3 = por %p9113_p0, %p9112_p13 }
 0x1a4   : > { %p9115_p4 = pnand %p9114_p3, %p9108_p12 }
 0x1a6   : > { %9118 = shalt.err (!%p9115_p4)
}
 0x1a7   : > { %s10910_s18 = sld [smem:[#allocation100_spill]]  ;;  %s9129_s2 = scalar_lea.vmem %s1387_s8, 512 }
 0x1a8   : > { %p9130_p7 = scmp.ne.s32.totalorder %s1387_s8, %s9129_s2  ;;  %p9136_p2 = scmp.lt.s32.totalorder %s1387_s8, %s1387_s8 }
 0x1a9   : > { %p9137_p1 = scmp.lt.s32.totalorder %s9129_s2, %s9129_s2 }
 0x1aa   : > { %p9131_p8 = pnand %p9130_p7, %p8269_p6 }
 0x1ab   : > { %p9138_p10 = por %p9137_p1, %p9136_p2 }
 0x1ac   : > { %p9132_p9 = pneg %p9131_p8 }
 0x1ad   : > { %8168 = dma.hbm_to_vmem [thread:$0]  (%p8269_p6), %s10910_s18, 256, %s1363_s26, [#allocation30], %s10893_s4, %s10893_s4, %s10892_s5  }
 0x1ae   : > { %p9139_p11 = pnand %p9138_p10, %p9132_p9 }
 0x1b0   : > { %9142 = shalt.err (!%p9139_p11)
}
 0x1b1   : > { %s10911_s21 = sld [smem:[#allocation102_spill]]  ;;  %s9521_s3 = smov [#allocation37]  }
 0x1b2   : > { %s1410_s9 = sshll.u32 %s9521_s3, 4  ;;  %s9522_s15 = smov [#allocation40]   ;;  %s1411_s9 = int_to_ptr.vmem [resolvable:$true] %s1410_s9 }
 0x1b3   : > { %s1434_s17 = sshll.u32 %s9522_s15, 4  ;;  %s9153_s26 = scalar_lea.vmem %s1411_s9, 512  ;;  %s1435_s17 = int_to_ptr.vmem [resolvable:$true] %s1434_s17 }
 0x1b4   : > { %p9154_p12 = scmp.ne.s32.totalorder %s1411_s9, %s9153_s26  ;;  %p9160_p3 = scmp.lt.s32.totalorder %s1411_s9, %s1411_s9 }
 0x1b5   : > { %p9161_p4 = scmp.lt.s32.totalorder %s9153_s26, %s9153_s26 }
 0x1b6   : > { %p9155_p13 = pnand %p9154_p12, %p8269_p6 }
 0x1b7   : > { %8172 = dma.hbm_to_vmem [thread:$0]  (%p8269_p6), %s10911_s21, 512, %s1387_s8, [#allocation33], %s10893_s4, %s10893_s4, %s10892_s5  }
 0x1b8   : > { %p9156_p0 = pneg %p9155_p13  ;;  %p9162_p7 = por %p9161_p4, %p9160_p3 }
 0x1ba   : > { %p9163_p8 = pnand %p9162_p7, %p9156_p0 }
 0x1bc   : > { %9166 = shalt.err (!%p9163_p8)
}
 0x1bd   : > { %s10912_s16 = sld [smem:[#allocation104_spill]]  ;;  %s9177_s8 = scalar_lea.vmem %s1435_s17, 512 }
 0x1be   : > { %p9178_p9 = scmp.ne.s32.totalorder %s1435_s17, %s9177_s8  ;;  %p9184_p10 = scmp.lt.s32.totalorder %s1435_s17, %s1435_s17 }
 0x1bf   : > { %p9185_p11 = scmp.lt.s32.totalorder %s9177_s8, %s9177_s8 }
 0x1c0   : > { %p9179_p2 = pnand %p9178_p9, %p8269_p6 }
 0x1c1   : > { %p9186_p12 = por %p9185_p11, %p9184_p10 }
 0x1c2   : > { %p9180_p1 = pneg %p9179_p2 }
 0x1c3   : > { %8176 = dma.hbm_to_vmem [thread:$0]  (%p8269_p6), %s10912_s16, 512, %s1411_s9, [#allocation36], %s10893_s4, %s10893_s4, %s10892_s5  }
 0x1c4   : > { %p9187_p13 = pnand %p9186_p12, %p9180_p1 }
 0x1c6   : > { %9190 = shalt.err (!%p9187_p13)
}
 0x1c7   : > { %s10913_s6 = sld [smem:[#allocation105_spill]]  ;;  %s9523_s18 = smov [#allocation43]  }
 0x1c8   : > { %s1458_s2 = sshll.u32 %s9523_s18, 4  ;;  %s9524_s21 = smov [#allocation46]   ;;  %s1459_s2 = int_to_ptr.vmem [resolvable:$true] %s1458_s2 }
 0x1c9   : > { %s1486_s3 = sshll.u32 %s9524_s21, 4  ;;  %s9201_s9 = scalar_lea.vmem %s1459_s2, 512  ;;  %s1487_s3 = int_to_ptr.vmem [resolvable:$true] %s1486_s3 }
 0x1ca   : > { %p9202_p0 = scmp.ne.s32.totalorder %s1459_s2, %s9201_s9  ;;  %p9208_p7 = scmp.lt.s32.totalorder %s1459_s2, %s1459_s2 }
 0x1cb   : > { %p9209_p8 = scmp.lt.s32.totalorder %s9201_s9, %s9201_s9 }
 0x1cc   : > { %p9203_p3 = pnand %p9202_p0, %p8269_p6 }
 0x1cd   : > { %8180 = dma.hbm_to_vmem [thread:$0]  (%p8269_p6), %s10913_s6, 512, %s1435_s17, [#allocation39], %s10893_s4, %s10893_s4, %s10892_s5  }
 0x1ce   : > { %p9204_p4 = pneg %p9203_p3  ;;  %p9210_p9 = por %p9209_p8, %p9208_p7 }
 0x1d0   : > { %p9211_p2 = pnand %p9210_p9, %p9204_p4 }
 0x1d2   : > { %9214 = shalt.err (!%p9211_p2)
}
 0x1d3   : > { %s10914_s15 = sld [smem:[#allocation107_spill]]  ;;  %s9225_s17 = scalar_lea.vmem %s1487_s3, 16 }
 0x1d4   : > { %p9226_p1 = scmp.ne.s32.totalorder %s1487_s3, %s9225_s17  ;;  %s9231_s26 = scalar_lea.vmem %s1487_s3, 32 }
 0x1d5   : > { %p9232_p12 = scmp.lt.s32.totalorder %s1487_s3, %s1487_s3  ;;  %p9233_p13 = scmp.lt.s32.totalorder %s9231_s26, %s9225_s17 }
 0x1d6   : > { %p9227_p10 = pnand %p9226_p1, %p8269_p6 }
 0x1d7   : > { %p9234_p0 = por %p9233_p13, %p9232_p12 }
 0x1d8   : > { %p9228_p11 = pneg %p9227_p10 }
 0x1d9   : > { %8184 = dma.hbm_to_vmem [thread:$0]  (%p8269_p6), %s10914_s15, 512, %s1459_s2, [#allocation42], %s10893_s4, %s10893_s4, %s10892_s5  }
 0x1da   : > { %p9235_p3 = pnand %p9234_p0, %p9228_p11 }
 0x1dc   : > { %9238 = shalt.err (!%p9235_p3)
}
 0x1dd   : > { %s10915_s16 = sld [smem:[#allocation110_spill]]  ;;  %s9525_s8 = smov [#allocation49]  }
 0x1de   : > { %s1508_s6 = sshll.u32 %s9525_s8, 4  ;;  %s9526_s4 = smov [#allocation52]   ;;  %s1509_s6 = int_to_ptr.vmem [resolvable:$true] %s1508_s6 }
 0x1df   : > { %s1530_s5 = sshll.u32 %s9526_s4, 4  ;;  %s9249_s18 = scalar_lea.vmem %s1509_s6, 128  ;;  %s1531_s5 = int_to_ptr.vmem [resolvable:$true] %s1530_s5 }
 0x1e0   : > { %p9250_p4 = scmp.ne.s32.totalorder %s1509_s6, %s9249_s18  ;;  %p9256_p9 = scmp.lt.s32.totalorder %s1509_s6, %s1509_s6 }
 0x1e1   : > { %p9257_p2 = scmp.lt.s32.totalorder %s9249_s18, %s9249_s18 }
 0x1e2   : > { %p9251_p7 = pnand %p9250_p4, %p8269_p6 }
 0x1e3   : > { %8188 = dma.hbm_to_vmem [thread:$0]  (%p8269_p6), %s10915_s16, 16, %s1487_s3, [#allocation45]  }
 0x1e4   : > { %p9252_p8 = pneg %p9251_p7  ;;  %p9258_p1 = por %p9257_p2, %p9256_p9 }
 0x1e6   : > { %p9259_p10 = pnand %p9258_p1, %p9252_p8 }
 0x1e8   : > { %9262 = shalt.err (!%p9259_p10)
}
 0x1e9   : > { %s10916_s2 = sld [smem:[#allocation112_spill]]  ;;  %s9273_s21 = scalar_lea.vmem %s1531_s5, 128 }
 0x1ea   : > { %p9274_p11 = scmp.ne.s32.totalorder %s1531_s5, %s9273_s21  ;;  %p9280_p0 = scmp.lt.s32.totalorder %s1531_s5, %s1531_s5 }
 0x1eb   : > { %p9281_p3 = scmp.lt.s32.totalorder %s9273_s21, %s9273_s21 }
 0x1ec   : > { %p9275_p12 = pnand %p9274_p11, %p8269_p6 }
 0x1ed   : > { %p9282_p4 = por %p9281_p3, %p9280_p0 }
 0x1ee   : > { %p9276_p13 = pneg %p9275_p12 }
 0x1ef   : > { %8192 = dma.hbm_to_vmem [thread:$0]  (%p8269_p6), %s10916_s2, 128, %s1509_s6, [#allocation48]  }
 0x1f0   : > { %p9283_p7 = pnand %p9282_p4, %p9276_p13 }
 0x1f2   : > { %9286 = shalt.err (!%p9283_p7)
}
 0x1f3   : > { %8196 = dma.hbm_to_vmem [thread:$0]  (%p8269_p6), %s9756_s23, 128, %s1531_s5, [#allocation51]  }
 0x1f4   : > { %s9527_s3 = smov [#allocation53]  }
 0x1f5   : > { %s1544_s9 = sshll.u32 %s9527_s3, 4  ;;  %s1545_s9 = int_to_ptr.vmem [resolvable:$true] %s1544_s9 }
 0x1f6   : > { %s9297_s15 = scalar_lea.vmem %s1545_s9, 16  ;;  %s9303_s17 = scalar_lea.vmem %s1545_s9, 32 }
 0x1f7   : > { %p9298_p8 = scmp.ne.s32.totalorder %s1545_s9, %s9297_s15  ;;  %p9304_p1 = scmp.lt.s32.totalorder %s1545_s9, %s1545_s9 }
 0x1f8   : > { %p9305_p10 = scmp.lt.s32.totalorder %s9303_s17, %s9297_s15 }
 0x1f9   : > { %p9299_p9 = pnand %p9298_p8, %p8269_p6 }
 0x1fa   : > { %p9306_p11 = por %p9305_p10, %p9304_p1 }
 0x1fb   : > { %p9300_p2 = pneg %p9299_p9 }
 0x1fd   : > { %p9307_p12 = pnand %p9306_p11, %p9300_p2 }
 0x1ff   : > { %9310 = shalt.err (!%p9307_p12)
}
 0x200   : > { %s10917_s7 = sld [smem:[#allocation114_spill]] }
 0x206   : > { %8198 = dma.hbm_to_vmem [thread:$0]  (%p8269_p6), %s10917_s7, 16, %s1545_s9, [#allocation54]  }
 0x207 PF: > { %1571 = sbr.rel (%p9825_p5) target bundleno = 13427 (0x3473), region = 200  ;;  %p8301_p13 = scmp.eq.s32.totalorder (!%p9825_p5), %s9798_s11, 0 }
 0x20c   : > { %9356 = dma.done.wait (%p8301_p13), [#allocation6], 512  }
 0x20d   : > { %9358 = vsyncadd (%p8301_p13), [#allocation6], 4294966784 }
 0x20e   : > { %9360 = dma.done.wait (%p8301_p13), [#allocation9], 48  }
 0x20f   : > { %9362 = vsyncadd (%p8301_p13), [#allocation9], 4294967248 }
 0x210   : > { %9364 = dma.done.wait (%p8301_p13), [#allocation12], 288  }
 0x211   : > { %9366 = vsyncadd (%p8301_p13), [#allocation12], 4294967008 }
 0x212   : > { %9368 = dma.done.wait (%p8301_p13), [#allocation15], 512  }
 0x213   : > { %9370 = vsyncadd (%p8301_p13), [#allocation15], 4294966784 }
 0x214   : > { %9372 = dma.done.wait (%p8301_p13), [#allocation18], 768  }
 0x215   : > { %9374 = vsyncadd (%p8301_p13), [#allocation18], 4294966528 }
 0x216   : > { %9376 = dma.done.wait (%p8301_p13), [#allocation21], 144  }
 0x217   : > { %9378 = vsyncadd (%p8301_p13), [#allocation21], 4294967152 }
 0x218   : > { %9380 = dma.done.wait (%p8301_p13), [#allocation24], 64  }
 0x219   : > { %9382 = vsyncadd (%p8301_p13), [#allocation24], 4294967232 }
 0x21a   : > { %9384 = dma.done.wait (%p8301_p13), [#allocation27], 512  }
 0x21b   : > { %9386 = vsyncadd (%p8301_p13), [#allocation27], 4294966784 }
 0x21c   : > { %9388 = dma.done.wait (%p8301_p13), [#allocation30], 512  }
 0x21d   : > { %9390 = vsyncadd (%p8301_p13), [#allocation30], 4294966784 }
 0x21e   : > { %9392 = dma.done.wait (%p8301_p13), [#allocation33], 544  }
 0x21f   : > { %9394 = vsyncadd (%p8301_p13), [#allocation33], 4294966752 }
 0x220   : > { %9396 = dma.done.wait (%p8301_p13), [#allocation36], 528  }
 0x221   : > { %9398 = vsyncadd (%p8301_p13), [#allocation36], 4294966768 }
 0x222   : > { %9400 = dma.done.wait (%p8301_p13), [#allocation39], 528  }
 0x223   : > { %9402 = vsyncadd (%p8301_p13), [#allocation39], 4294966768 }
 0x224   : > { %9404 = dma.done.wait (%p8301_p13), [#allocation42], 528  }
 0x225   : > { %9406 = vsyncadd (%p8301_p13), [#allocation42], 4294966768 }
 0x226   : > { %9408 = dma.done.wait (%p8301_p13), [#allocation45], 32  }
 0x227   : > { %9410 = vsyncadd (%p8301_p13), [#allocation45], 4294967264 }
 0x228   : > { %9412 = dma.done.wait (%p8301_p13), [#allocation48], 256  }
 0x229   : > { %9414 = vsyncadd (%p8301_p13), [#allocation48], 4294967040 }
 0x22a   : > { %9416 = dma.done.wait (%p8301_p13), [#allocation51], 256  }
 0x22b   : > { %9418 = vsyncadd (%p8301_p13), [#allocation51], 4294967040 }
 0x22c   : > { %9420 = dma.done.wait (%p8301_p13), [#allocation54], 16  }
 0x22d   : > { %9422 = vsyncadd (%p8301_p13), [#allocation54], 4294967280  ;;  %s10918_s28 = sld [smem:[#allocation75_spill]]  ;;  %p1805_p5 = scmp.lt.s32.totalorder %s9798_s11, 1  ;;  %v9528_v0 = vmov 0.0   ;;  %vm9529_vm0 = vmmov 0   ;;  %v1814_v36 = vlaneseq }
 0x22e   : > { %7614 = vmatprep.subr.mxu0 %v9528_v0  ;;  %7622 = vmatprep.mubr.msk.f32.mxu0 %vm9529_vm0, %v9528_v0  ;;  %v1823_v1 = vld [vmem:[#allocation5 + $0x18] sm:$0xff]  ;;  %v1822_v2 = vld [vmem:[#allocation5 + $0x10] sm:$0xff]  ;;  %s10919_s8 = sld [smem:[#allocation80_spill]]  ;;  %v1821_v3 = vld [vmem:[#allocation5 + $0x8] sm:$0xff]  ;;  %vm1831_vm1 = vcmask 261120   ;;  %vm2145_vm2 = vcmask 130048  }
 0x22f   : > { %s10122_s26 = scalar_select %p1805_p5, %s9798_s11, 1  ;;  %7625 = vmatprep.subr.mxu1 %v9528_v0  ;;  %7633 = vmatprep.mubr.msk.f32.mxu1 %vm9529_vm0, %v9528_v0  ;;  %v1820_v4 = vld [vmem:[#allocation5] sm:$0xff]  ;;  %v1815_v37 = vand.u32 127, %v1814_v36  ;;  %vm2300_vm4 = vcmask 64512   ;;  %vm2686_vm5 = vcmask 523264   ;;  %vm3737_vm6 = vcmask 1040384  }
 0x230   : > { %7615 = vmatpush3.msra.mxu0 %v1823_v1  ;;  %s10920_s4 = sld [smem:[#allocation79_spill]]  ;;  %v7247_v14 = vld [vmem:[#allocation8] ss:$0 sm:$0xff]  ;;  %s10834_s5 = smov 112   ;;  %vm3739_vm7 = vcmask 1041408   ;;  %vm3741_vm8 = vcmask 1042432  }
 0x231   : > { %s7245_s16 = sshll.u32 %s10122_s26, 3  ;;  %7616 = vmatprep.subr.mxu0 %v9528_v0  ;;  %s1813_s18 = sld [smem:[#allocation3 + %s9798_s11]]  ;;  %vm3743_vm9 = vcmask 1043456   ;;  %vm3745_vm10 = vcmask 1044480   ;;  %vm3747_vm11 = vcmask 1045504   ;;  %vm3749_vm12 = vcmask 1046528  }
 0x232   : > { %7617 = vmatpush3.msra.mxu0 %v1822_v2  ;;  %s10923_s2 = sld [smem:[#allocation81_spill]]  ;;  %s10832_s3 = smov 16   ;;  %vm6646_vm13 = vcmask 39936   ;;  %vm6722_vm14 = vcmask 32768  }
 0x233   : > { %s1808_s6 = scalar_lea.vmem %s10918_s28, %s7245_s16  ;;  %7618 = vmatprep.subr.mxu0 %v9528_v0  ;;  %s10925_s9 = sld [smem:[#allocation82_spill]] }
 0x234   : > { %7619 = vmatpush3.msra.mxu0 %v1821_v3  ;;  %v1818_v5 = vld [vmem:[%s1808_s6] sm:$0xff]  ;;  %v1911_v6 = vld [vmem:[%s10919_s8 + $0x18] sm:$0xff]  ;;  %v1910_v8 = vld [vmem:[%s10919_s8 + $0x10] sm:$0xff]  ;;  %s10926_s17 = sld [smem:[#allocation84_spill]]  ;;  %s7313_s26 = sshll.u32 %s9798_s11, 7 }
 0x235   : > { %7620 = vmatprep.subr.mxu0 %v9528_v0  ;;  %7626 = vmatpush3.msra.mxu1 %v1911_v6  ;;  %v7253_v7 = vld [vmem:[%s10919_s8 + $0x38] sm:$0xff]  ;;  %v7252_v9 = vld [vmem:[%s10919_s8 + $0x30] sm:$0xff]  ;;  %v1909_v10 = vld [vmem:[%s10919_s8 + $0x8] sm:$0xff]  ;;  %s3708_s10 = sadd.s32 6, %s7313_s26  ;;  %s3712_s20 = sadd.s32 7, %s7313_s26 }
 0x236   : > { %7621 = vmatpush3.msra.mxu0 %v1820_v4  ;;  %7627 = vmatprep.subr.mxu1 %v9528_v0  ;;  %v7251_v11 = vld [vmem:[%s10919_s8 + $0x28] sm:$0xff]  ;;  %v1908_v12 = vld [vmem:[%s10919_s8] sm:$0xff]  ;;  %v7258_v22 = vld [vmem:[%s10919_s8 + $0x58] sm:$0xff]  ;;  %s3709_s19 = sld [smem:[#allocation4 + %s3708_s10]]  ;;  %s10931_s10 = smov 16  }
 0x237   : > { %7623 = vmatmul.mubr.msk.f32.vlgmr.msra.gmra.mxu0 %vm1831_vm1, %v1818_v5  ;;  %7636 = vmatprep.subr.mxu0 %v9528_v0  ;;  %v7250_v13 = vld [vmem:[%s10919_s8 + $0x20] sm:$0xff]  ;;  %v7257_v23 = vld [vmem:[%s10919_s8 + $0x50] sm:$0xff]  ;;  %v7256_v24 = vld [vmem:[%s10919_s8 + $0x48] sm:$0xff]  ;;  %v1816_v38 = vstv %s1813_s18  ;;  %p10935_p0 = scmp.ne.s32.totalorder %s10882_s22, 0 }
 0x238   : > { %7644 = vmatprep.mubr.msk.f32.mxu0 %vm9529_vm0, %v9528_v0  ;;  %7637 = vmatpush3.msra.mxu0 %v7253_v7  ;;  %v1819_v19 = vld [vmem:[%s10920_s4] sm:$0xff]  ;;  %vm10192_vm3 = vcmp.lt.s32.totalorder %v1815_v37, %v1816_v38  ;;  %s10924_s21 = smov %s10923_s2  ;;  %v2477_v2 = vld [vmem:[%s10923_s2 + $0x18] sm:$0xff] }
 0x239   : > { %7628 = vmatpush3.msra.mxu1 %v1910_v8  ;;  %7638 = vmatprep.subr.mxu0 %v9528_v0  ;;  %v7255_v25 = vld [vmem:[%s10919_s8 + $0x40] sm:$0xff]  ;;  %v2476_v3 = vld [vmem:[%s10924_s21 + $0x10] sm:$0xff]  ;;  %v2475_v4 = vld [vmem:[%s10924_s21 + $0x8] sm:$0xff] }
 0x23a   : > { %7629 = vmatprep.subr.mxu1 %v9528_v0  ;;  %7639 = vmatpush3.msra.mxu0 %v7252_v9  ;;  %v2474_v5 = vld [vmem:[%s10924_s21] sm:$0xff]  ;;  %v2674_v37 = vld [vmem:[%s10926_s17 + $0x18] sm:$0xff] }
 0x23b   : > { %7630 = vmatpush3.msra.mxu1 %v1909_v10  ;;  %7640 = vmatprep.subr.mxu0 %v9528_v0 }
 0x23c   : > { %7631 = vmatprep.subr.mxu1 %v9528_v0  ;;  %7641 = vmatpush3.msra.mxu0 %v7251_v11 }
 0x23d   : > { %7632 = vmatpush3.msra.mxu1 %v1908_v12  ;;  %7642 = vmatprep.subr.mxu0 %v9528_v0 }
 0x23e   : > { %7643 = vmatpush3.msra.mxu0 %v7250_v13  ;;  %7647 = vmatprep.subr.mxu1 %v9528_v0 }
 0x23f   : > { %7658 = vmatprep.subr.mxu0 %v9528_v0 }
 0x2f7   : > { %v1901_v15 = vpop.f32.mrf.mxu0 }
 0x2f8   : > { %v1902_v16 = vadd.f32 %v7247_v14, %v1901_v15 }
 0x2f9   : > { %v7624_v17 = vpop.f32.mrf.mxu0 }
 0x2fa   : > { %v1905_v18 = vmax.f32 %v1902_v16, 0.0 }
 0x2fc   : > { %v1906_v20 = vmul.f32 5.656854, %v1905_v18 }
 0x2fe   : > { %v10155_v21 = vadd.f32 %v1906_v20, %v1819_v19 }
 0x300   : > { %7634 = vmatmul.mubr.msk.f32.vlgmr.msra.gmra.mxu1 %vm1831_vm1, %v10155_v21  ;;  %7645 = vmatmul.mubr.msk.f32.vlgmr.msra.gmra.mxu0 %vm1831_vm1, %v10155_v21 }
 0x301   : > { %7648 = vmatpush3.msra.mxu1 %v7258_v22  ;;  %7655 = vmatprep.mubr.msk.f32.mxu1 %vm9529_vm0, %v9528_v0 }
 0x302   : > { %7649 = vmatprep.subr.mxu1 %v9528_v0  ;;  %7660 = vmatprep.mubr.msk.f32.mxu0 %vm9529_vm0, %v9528_v0 }
 0x303   : > { %7650 = vmatpush3.msra.mxu1 %v7257_v23 }
 0x304   : > { %7651 = vmatprep.subr.mxu1 %v9528_v0 }
 0x305   : > { %7652 = vmatpush3.msra.mxu1 %v7256_v24 }
 0x306   : > { %7653 = vmatprep.subr.mxu1 %v9528_v0 }
 0x307   : > { %7654 = vmatpush3.msra.mxu1 %v7255_v25 }
 0x308   : > { %7656 = vmatmul.mubr.msk.f32.vlgmr.msra.gmra.mxu1 %vm1831_vm1, %v10155_v21  ;;  %7673 = vmatprep.subr.mxu1 %v9528_v0 }
 0x309   : > { %7675 = vmatprep.mubr.msk.f32.mxu1 %vm9529_vm0, %v9528_v0 }
 0x3c0   : > { %v1981_v26 = vpop.f32.mrf.mxu1  ;;  %v2056_v27 = vpop.f32.mrf.mxu0 }
 0x3c1   : > { %2139 = vrot.lane.b32.xlu0 %v2056_v27, %s10834_s5  ;;  %7659 = vmatpush3.xpose.msk.msra.mxu0 %vm2145_vm2, %v2056_v27 }
 0x3c2   : > { %v7635_v28 = vpop.f32.mrf.mxu1  ;;  %v7646_v29 = vpop.f32.mrf.mxu0  ;;  %7663 = vmatprep.subr.mxu0 %v9528_v0 }
 0x3c3   : > { %v2589_v28 = vld [vmem:[%s10925_s9 + $0x18] sm:$0xff]  ;;  %v2588_v29 = vld [vmem:[%s10925_s9 + $0x10] sm:$0xff] }
 0x3c4   : > { %7661 = vmatmul.mubr.msk.f32.vlgmr.msra.gmra.mxu0 %vm2145_vm2, %v1981_v26 }
 0x3c5   : > { %2136 = vrot.lane.b32.xlu0 %v1981_v26, %s10834_s5  ;;  %7665 = vmatprep.mubr.msk.f32.mxu0 %vm9529_vm0, %v9528_v0 }
 0x3c8   : > { %v2131_v30 = vpop.f32.mrf.mxu1 }
 0x3ca   : > { %v7657_v31 = vpop.f32.mrf.mxu1 }
 0x3cb   : > { %v2586_v31 = vld [vmem:[%s10925_s9] sm:$0xff] }
 0x433   : > { %v2140_v32 = vpop.permute.xlu0 %2139 }
 0x434   : > { %7664 = vmatpush3.xpose.msk.msra.mxu0 %vm2145_vm2, %v2140_v32  ;;  %v2678_v32 = vld [vmem:[%s10926_s17 + $0x38] sm:$0xff] }
 0x435   : > { %7668 = vmatprep.subr.mxu0 %v9528_v0 }
 0x437   : > { %v2137_v33 = vpop.permute.xlu0 %2136 }
 0x438   : > { %7666 = vmatmul.mubr.msk.f32.vlgmr.msra.gmra.mxu0 %vm2145_vm2, %v2137_v33  ;;  %v2677_v33 = vld [vmem:[%s10926_s17 + $0x30] sm:$0xff] }
 0x439   : > { %7669 = vmatpush3.msra.mxu0 %v2131_v30  ;;  %7670 = vmatprep.mubr.msk.f32.mxu0 %vm9529_vm0, %v9528_v0 }
 0x43a   : > { %7678 = vmatprep.subr.mxu0 %v9528_v0 }
 0x484   : > { %v2216_v34 = vpop.f32.mrf.mxu0 }
 0x485   : > { %v2294_v40 = vmul.f32 0.25, %v2216_v34  ;;  %v2676_v34 = vld [vmem:[%s10926_s17 + $0x28] sm:$0xff] }
 0x486   : > { %v7662_v35 = vpop.f32.mrf.mxu0 }
 0x487   : > { %v2298_v46 = vsel %vm10192_vm3, %v2294_v40, -1000000.0  ;;  %v2675_v35 = vld [vmem:[%s10926_s17 + $0x20] sm:$0xff] }
 0x488   : > { %v2301_v47 = vsel %vm2300_vm4, %v2298_v46, -inf }
 0x4f8   : > { %v2290_v39 = vpop.f32.mrf.mxu0 }
 0x4f9   : > { %v2295_v41 = vmul.f32 0.25, %v2290_v39 }
 0x4fa   : > { %v7667_v42 = vpop.f32.mrf.mxu0 }
 0x4fb   : > { %v2299_v44 = vsel %vm10192_vm3, %v2295_v41, -1000000.0 }
 0x4fc   : > { %v2304_v45 = vsel %vm2300_vm4, %v2299_v44, -inf }
 0x4fd   : > { %2305 = vmax.xlane.f32.xlu1 %v2304_v45 }
 0x501   : > { %2302 = vmax.xlane.f32.xlu1 %v2301_v47 }
 0x512   : > { %2142 = vrot.lane.b32.xlu1 %v2131_v30, %s10834_s5  ;;  %v2587_v30 = vld [vmem:[%s10925_s9 + $0x8] sm:$0xff] }
 0x586   : > { %v2306_v48 = vpop.xlane.xlu1 %2305 }
 0x587   : > { %v2308_v49 = vsub.f32 %v2299_v44, %v2306_v48 }
 0x589   : > { %v2311_v50 = vmul.f32 1.442695, %v2308_v49 }
 0x58a   : > { %v2303_v51 = vpop.xlane.xlu1 %2302 }
 0x58b   : > { %8455 = vpow2.f32 %v2311_v50  ;;  %v2307_v52 = vsub.f32 %v2298_v46, %v2303_v51  ;;  %v2552_v50 = vld [vmem:[#allocation13] sm:$0xff] }
 0x58d   : > { %v2309_v53 = vmul.f32 1.442695, %v2307_v52  ;;  %v2553_v52 = vld [vmem:[#allocation14] sm:$0xff] }
 0x58e   : > { %v2143_v54 = vpop.permute.xlu1 %2142 }
 0x58f   : > { %8457 = vpow2.f32 %v2309_v53  ;;  %7674 = vmatpush3.msra.mxu1 %v2143_v54 }
 0x590   : > { %7689 = vmatprep.subr.mxu1 %v9528_v0 }
 0x598   : > { %v8456_v55 = vpop.eup %8455 }
 0x599   : > { %v2316_v56 = vsel %vm2300_vm4, %v8456_v55, 0.0 }
 0x59a   : > { %2317 = vadd.xlane.f32.xlu0 %v2316_v56  ;;  %v2672_v56 = vld [vmem:[%s10926_s17 + $0x8] sm:$0xff] }
 0x59c   : > { %v8458_v57 = vpop.eup %8457 }
 0x59d   : > { %v2313_v58 = vsel %vm2300_vm4, %v8458_v57, 0.0 }
 0x59e   : > { %2314 = vadd.xlane.f32.xlu1 %v2313_v58  ;;  %v7267_v58 = vld [vmem:[#allocation10] ss:$0 sm:$0xff] }
 0x623   : > { %v2318_v59 = vpop.xlane.xlu0 %2317 }
 0x624   : > { %8459 = vrcp.f32 %v2318_v59 }
 0x627   : > { %v2315_v60 = vpop.xlane.xlu1 %2314 }
 0x628   : > { %8461 = vrcp.f32 %v2315_v60 }
 0x631   : > { %v8460_v61 = vpop.eup %8459 }
 0x632   : > { %v2322_v62 = vmul.f32 %v8460_v61, %v8456_v55  ;;  %v2673_v55 = vld [vmem:[%s10926_s17 + $0x10] sm:$0xff] }
 0x634   : > { %7676 = vmatmul.mubr.msk.f32.vlgmr.msra.gmra.mxu1 %vm2300_vm4, %v2322_v62 }
 0x635   : > { %v8462_v63 = vpop.eup %8461  ;;  %7697 = vmatprep.mubr.msk.f32.mxu1 %vm9529_vm0, %v9528_v0  ;;  %7690 = vmatpush3.msra.mxu1 %v2589_v28 }
 0x636   : > { %v2321_v1 = vmul.f32 %v8462_v63, %v8458_v57  ;;  %7691 = vmatprep.subr.mxu1 %v9528_v0  ;;  %v2671_v57 = vld [vmem:[%s10926_s17] sm:$0xff] }
 0x637   : > { %7692 = vmatpush3.msra.mxu1 %v2588_v29  ;;  %v7269_v63 = vld [vmem:[#allocation11] ss:$0 sm:$0xff] }
 0x638   : > { %7671 = vmatmul.mubr.msk.f32.vlgmr.msra.gmra.mxu0 %vm2300_vm4, %v2321_v1  ;;  %7693 = vmatprep.subr.mxu1 %v9528_v0 }
 0x639   : > { %7686 = vmatprep.mubr.msk.f32.mxu0 %vm9529_vm0, %v9528_v0  ;;  %7679 = vmatpush3.msra.mxu0 %v2477_v2 }
 0x63a   : > { %7680 = vmatprep.subr.mxu0 %v9528_v0  ;;  %7694 = vmatpush3.msra.mxu1 %v2587_v30 }
 0x63b   : > { %7681 = vmatpush3.msra.mxu0 %v2476_v3  ;;  %7695 = vmatprep.subr.mxu1 %v9528_v0 }
 0x63c   : > { %7682 = vmatprep.subr.mxu0 %v9528_v0  ;;  %7696 = vmatpush3.msra.mxu1 %v2586_v31 }
 0x63d   : > { %7683 = vmatpush3.msra.mxu0 %v2475_v4  ;;  %7719 = vmatprep.subr.mxu1 %v9528_v0 }
 0x63e   : > { %7684 = vmatprep.subr.mxu0 %v9528_v0 }
 0x63f   : > { %7685 = vmatpush3.msra.mxu0 %v2474_v5 }
 0x640   : > { %7700 = vmatprep.subr.mxu0 %v9528_v0 }
 0x6f4   : > { %v2465_v6 = vpop.f32.mrf.mxu1 }
 0x6f5   : > { %2470 = vrot.lane.b32.xlu0 %v2465_v6, %s10832_s3 }
 0x6f6   : > { %v7677_v7 = vpop.f32.mrf.mxu1 }
 0x6f8   : > { %v2392_v8 = vpop.f32.mrf.mxu0 }
 0x6fa   : > { %v7672_v9 = vpop.f32.mrf.mxu0 }
 0x767   : > { %v2471_v10 = vpop.permute.xlu0 %2470 }
 0x768   : > { %v2473_v11 = vsel %vm2145_vm2, %v2392_v8, %v2471_v10 }
 0x769   : > { %7687 = vmatmul.mubr.msk.f32.vlgmr.msra.gmra.mxu0 %vm1831_vm1, %v2473_v11 }
 0x76a   : > { %7716 = vmatprep.mubr.msk.f32.mxu0 %vm9529_vm0, %v9528_v0  ;;  %7701 = vmatpush3.msra.mxu0 %v2678_v32 }
 0x76b   : > { %7702 = vmatprep.subr.mxu0 %v9528_v0 }
 0x76c   : > { %7703 = vmatpush3.msra.mxu0 %v2677_v33 }
 0x76d   : > { %7704 = vmatprep.subr.mxu0 %v9528_v0 }
 0x76e   : > { %7705 = vmatpush3.msra.mxu0 %v2676_v34 }
 0x76f   : > { %7706 = vmatprep.subr.mxu0 %v9528_v0 }
 0x770   : > { %7707 = vmatpush3.msra.mxu0 %v2675_v35 }
 0x771   : > { %7708 = vmatprep.subr.mxu0 %v9528_v0 }
 0x772   : > { %7709 = vmatpush3.msra.mxu0 %v2674_v37 }
 0x773   : > { %7710 = vmatprep.subr.mxu0 %v9528_v0 }
 0x774   : > { %7711 = vmatpush3.msra.mxu0 %v2673_v55 }
 0x775   : > { %7712 = vmatprep.subr.mxu0 %v9528_v0 }
 0x776   : > { %7713 = vmatpush3.msra.mxu0 %v2672_v56 }
 0x777   : > { %7714 = vmatprep.subr.mxu0 %v9528_v0 }
 0x778   : > { %7715 = vmatpush3.msra.mxu0 %v2671_v57 }
 0x779   : > { %7741 = vmatprep.subr.mxu0 %v9528_v0 }
 0x829   : > { %v2547_v12 = vpop.f32.mrf.mxu0 }
 0x82a   : > { %v2551_v13 = vadd.f32 %v2547_v12, %v10155_v21 }
 0x82b   : > { %v7688_v14 = vpop.f32.mrf.mxu0 }
 0x82c   : > { %v2554_v15 = vsel %vm1831_vm1, %v2551_v13, 0.0 }
 0x82d   : > { %2555 = vadd.xlane.f32.xlu0 %v2554_v15 }
 0x8b6   : > { %v2556_v16 = vpop.xlane.xlu0 %2555 }
 0x8b7   : > { %v2557_v17 = vrot.slane %v2556_v16, 4 }
 0x8b9   : > { %v2558_v18 = vadd.f32 %v2557_v17, %v2556_v16 }
 0x8bb   : > { %v2559_v19 = vrot.slane %v2558_v18, 2 }
 0x8bd   : > { %v2560_v20 = vadd.f32 %v2559_v19, %v2558_v18  ;;  %v7274_v18 = vld [vmem:[%s10919_s8 + $0x78] sm:$0xff] }
 0x8be   : > { %v7284_v19 = vld [vmem:[%s10919_s8 + $0xb8] sm:$0xff] }
 0x8bf   : > { %v2561_v22 = vrot.slane %v2560_v20, 1 }
 0x8c1   : > { %v2562_v23 = vadd.f32 %v2561_v22, %v2560_v20  ;;  %v7273_v20 = vld [vmem:[%s10919_s8 + $0x70] sm:$0xff] }
 0x8c2   : > { %v7283_v22 = vld [vmem:[%s10919_s8 + $0xb0] sm:$0xff] }
 0x8c3   : > { %8095 = vpush %v2562_v23  ;;  %v7272_v23 = vld [vmem:[%s10919_s8 + $0x68] sm:$0xff] }
 0x8f4   : > { %s8096_s15 = spop %8095 }
 0x8f5   : > { %v2564_v24 = vstv %s8096_s15  ;;  %s10927_s15 = sld [smem:[#allocation76_spill]] }
 0x8f6   : > { %v2566_v25 = vmul.f32 0.00390625, %v2564_v24  ;;  %v7282_v24 = vld [vmem:[%s10919_s8 + $0xa8] sm:$0xff] }
 0x8f8   : > { %v2567_v21 = vsub.f32 %v2551_v13, %v2566_v25  ;;  %v7271_v25 = vld [vmem:[%s10919_s8 + $0x60] sm:$0xff] }
 0x8fa   : > { %v2568_v26 = vmul.f32 %v2567_v21, %v2567_v21 }
 0x8fc   : > { %v2569_v27 = vsel %vm1831_vm1, %v2568_v26, 0.0 }
 0x8fd   : > { %2570 = vadd.xlane.f32.xlu1 %v2569_v27 }
 0x986   : > { %v2571_v38 = vpop.xlane.xlu1 %2570 }
 0x987   : > { %v2572_v39 = vrot.slane %v2571_v38, 4 }
 0x989   : > { %v2573_v40 = vadd.f32 %v2572_v39, %v2571_v38  ;;  %v2761_v38 = vld [vmem:[#allocation16] sm:$0xff] }
 0x98b   : > { %v2574_v41 = vrot.slane %v2573_v40, 2 }
 0x98d   : > { %v2575_v42 = vadd.f32 %v2574_v41, %v2573_v40  ;;  %v2762_v40 = vld [vmem:[#allocation17] sm:$0xff] }
 0x98f   : > { %v2576_v44 = vrot.slane %v2575_v42, 1 }
 0x991   : > { %v2577_v45 = vadd.f32 %v2576_v44, %v2575_v42  ;;  %v7279_v44 = vld [vmem:[%s10919_s8 + $0x98] sm:$0xff] }
 0x993   : > { %8097 = vpush %v2577_v45  ;;  %v7278_v45 = vld [vmem:[%s10919_s8 + $0x90] sm:$0xff] }
 0x9c4   : > { %s8098_s28 = spop %8097 }
 0x9c5   : > { %v2579_v46 = vstv %s8098_s28  ;;  %s1812_s28 = scalar_lea.vmem %s10927_s15, %s7245_s16  ;;  %s3688_s16 = sadd.s32 1, %s7313_s26 }
 0x9c6   : > { %v2580_v47 = vmul.f32 0.00390625, %v2579_v46  ;;  %v7277_v46 = vld [vmem:[%s10919_s8 + $0x88] sm:$0xff]  ;;  %s3696_s15 = sadd.s32 3, %s7313_s26 }
 0x9c8   : > { %v2581_v48 = vadd.f32 1e-05, %v2580_v47  ;;  %v7276_v47 = vld [vmem:[%s10919_s8 + $0x80] sm:$0xff] }
 0x9ca   : > { %8463 = vrsqrt.f32 %v2581_v48 }
 0x9d7   : > { %v8464_v49 = vpop.eup %8463 }
 0x9d8   : > { %v2583_v51 = vmul.f32 %v8464_v49, %v2567_v21  ;;  %v7281_v21 = vld [vmem:[%s10919_s8 + $0xa0] sm:$0xff]  ;;  %s3704_s8 = sadd.s32 5, %s7313_s26 }
 0x9d9   : > { %s3705_s12 = sld [smem:[#allocation4 + %s3704_s8]] }
 0x9da   : > { %v2584_v53 = vmul.f32 %v2583_v51, %v2552_v50 }
 0x9dc   : > { %v2585_v54 = vadd.f32 %v2584_v53, %v2553_v52 }
 0x9de   : > { %7698 = vmatmul.mubr.msk.f32.vlgmr.msra.gmra.mxu1 %vm1831_vm1, %v2585_v54 }
 0x9df   : > { %7727 = vmatprep.mubr.msk.f32.mxu1 %vm9529_vm0, %v9528_v0  ;;  %7720 = vmatpush3.msra.mxu1 %v7274_v18  ;;  %s3706_s8 = scalar_lea.vmem [#allocation32], %s3705_s12  ;;  %s10930_s12 = sld [smem:[#allocation93_spill]] }
 0x9e0   : > { %7721 = vmatprep.subr.mxu1 %v9528_v0 }
 0x9e1   : > { %7722 = vmatpush3.msra.mxu1 %v7273_v20  ;;  %v7294_v20 = vld [vmem:[%s10924_s21 + $0x30] sm:$0xff] }
 0x9e2   : > { %7723 = vmatprep.subr.mxu1 %v9528_v0 }
 0x9e3   : > { %7724 = vmatpush3.msra.mxu1 %v7272_v23  ;;  %v7292_v23 = vld [vmem:[%s10924_s21 + $0x20] sm:$0xff] }
 0x9e4   : > { %7725 = vmatprep.subr.mxu1 %v9528_v0 }
 0x9e5   : > { %7726 = vmatpush3.msra.mxu1 %v7271_v25 }
 0x9e6   : > { %7730 = vmatprep.subr.mxu1 %v9528_v0 }
 0xa9e   : > { %v2666_v59 = vpop.f32.mrf.mxu1 }
 0xa9f   : > { %v2667_v60 = vadd.f32 %v7267_v58, %v2666_v59 }
 0xaa0   : > { %v7699_v61 = vpop.f32.mrf.mxu1 }
 0xaa1   : > { %v2670_v62 = vmax.f32 %v2667_v60, 0.0 }
 0xaa3   : > { %7717 = vmatmul.mubr.msk.f32.vlgmr.msra.gmra.mxu0 %vm2686_vm5, %v2670_v62 }
 0xaa4   : > { %7749 = vmatprep.mubr.msk.f32.mxu0 %vm9529_vm0, %v9528_v0  ;;  %7742 = vmatpush3.msra.mxu0 %v7284_v19  ;;  %v7295_v19 = vld [vmem:[%s10924_s21 + $0x38] sm:$0xff] }
 0xaa5   : > { %7743 = vmatprep.subr.mxu0 %v9528_v0 }
 0xaa6   : > { %7744 = vmatpush3.msra.mxu0 %v7283_v22  ;;  %v7293_v22 = vld [vmem:[%s10924_s21 + $0x28] sm:$0xff] }
 0xaa7   : > { %7745 = vmatprep.subr.mxu0 %v9528_v0 }
 0xaa8   : > { %7746 = vmatpush3.msra.mxu0 %v7282_v24 }
 0xaa9   : > { %7747 = vmatprep.subr.mxu0 %v9528_v0 }
 0xaaa   : > { %7748 = vmatpush3.msra.mxu0 %v7281_v21 }
 0xaab   : > { %7762 = vmatprep.subr.mxu0 %v9528_v0 }
 0xb63   : > { %v2756_v1 = vpop.f32.mrf.mxu0 }
 0xb64   : > { %v2757_v2 = vadd.f32 %v7269_v63, %v2756_v1 }
 0xb65   : > { %v7718_v3 = vpop.f32.mrf.mxu0 }
 0xb66   : > { %v2760_v4 = vadd.f32 %v2757_v2, %v2585_v54 }
 0xb68   : > { %v2763_v5 = vsel %vm1831_vm1, %v2760_v4, 0.0 }
 0xb69   : > { %2764 = vadd.xlane.f32.xlu1 %v2763_v5 }
 0xbf2   : > { %v2765_v6 = vpop.xlane.xlu1 %2764 }
 0xbf3   : > { %v2766_v7 = vrot.slane %v2765_v6, 4 }
 0xbf5   : > { %v2767_v8 = vadd.f32 %v2766_v7, %v2765_v6 }
 0xbf7   : > { %v2768_v9 = vrot.slane %v2767_v8, 2 }
 0xbf9   : > { %v2769_v10 = vadd.f32 %v2768_v9, %v2767_v8 }
 0xbfb   : > { %v2770_v11 = vrot.slane %v2769_v10, 1 }
 0xbfd   : > { %v2771_v12 = vadd.f32 %v2770_v11, %v2769_v10 }
 0xbff   : > { %8099 = vpush %v2771_v12 }
 0xc30   : > { %s8100_s6 = spop %8099 }
 0xc31   : > { %v2773_v13 = vstv %s8100_s6  ;;  %s10928_s6 = sld [smem:[#allocation92_spill]] }
 0xc32   : > { %v2774_v14 = vmul.f32 0.00390625, %v2773_v13 }
 0xc34   : > { %v2775_v15 = vsub.f32 %v2760_v4, %v2774_v14 }
 0xc36   : > { %v2776_v16 = vmul.f32 %v2775_v15, %v2775_v15 }
 0xc38   : > { %v2777_v17 = vsel %vm1831_vm1, %v2776_v16, 0.0 }
 0xc39   : > { %2778 = vadd.xlane.f32.xlu1 %v2777_v17 }
 0xcc2   : > { %v2779_v26 = vpop.xlane.xlu1 %2778 }
 0xcc3   : > { %v2780_v27 = vrot.slane %v2779_v26, 4 }
 0xcc5   : > { %v2781_v28 = vadd.f32 %v2780_v27, %v2779_v26 }
 0xcc7   : > { %v2782_v29 = vrot.slane %v2781_v28, 2 }
 0xcc9   : > { %v2783_v30 = vadd.f32 %v2782_v29, %v2781_v28 }
 0xccb   : > { %v2784_v31 = vrot.slane %v2783_v30, 1 }
 0xccd   : > { %v2785_v32 = vadd.f32 %v2784_v31, %v2783_v30 }
 0xccf   : > { %8101 = vpush %v2785_v32 }
 0xd00   : > { %s8102_s4 = spop %8101 }
 0xd01   : > { %v2787_v33 = vstv %s8102_s4  ;;  %s3689_s4 = sld [smem:[#allocation4 + %s3688_s16]] }
 0xd02   : > { %v2788_v34 = vmul.f32 0.00390625, %v2787_v33 }
 0xd04   : > { %v2789_v35 = vadd.f32 1e-05, %v2788_v34 }
 0xd06   : > { %8465 = vrsqrt.f32 %v2789_v35 }
 0xd13   : > { %v8466_v37 = vpop.eup %8465 }
 0xd14   : > { %v2791_v39 = vmul.f32 %v8466_v37, %v2775_v15 }
 0xd16   : > { %v2792_v41 = vmul.f32 %v2791_v39, %v2761_v38 }
 0xd18   : > { %v10276_v42 = vadd.f32 %v2792_v41, %v2762_v40 }
 0xd1a   : > { %7728 = vmatmul.mubr.msk.f32.vlgmr.msra.gmra.mxu1 %vm1831_vm1, %v10276_v42  ;;  %7750 = vmatmul.mubr.msk.f32.vlgmr.msra.gmra.mxu0 %vm1831_vm1, %v10276_v42 }
 0xd1b   : > { %7731 = vmatpush3.msra.mxu1 %v7279_v44  ;;  %7738 = vmatprep.mubr.msk.f32.mxu1 %vm9529_vm0, %v9528_v0 }
 0xd1c   : > { %7732 = vmatprep.subr.mxu1 %v9528_v0  ;;  %7764 = vmatprep.mubr.msk.f32.mxu0 %vm9529_vm0, %v9528_v0 }
 0xd1d   : > { %7733 = vmatpush3.msra.mxu1 %v7278_v45 }
 0xd1e   : > { %7734 = vmatprep.subr.mxu1 %v9528_v0 }
 0xd1f   : > { %7735 = vmatpush3.msra.mxu1 %v7277_v46 }
 0xd20   : > { %7736 = vmatprep.subr.mxu1 %v9528_v0 }
 0xd21   : > { %7737 = vmatpush3.msra.mxu1 %v7276_v47  ;;  %v7300_v47 = vld [vmem:[%s10925_s9 + $0x38] sm:$0xff] }
 0xd22   : > { %7739 = vmatmul.mubr.msk.f32.vlgmr.msra.gmra.mxu1 %vm1831_vm1, %v10276_v42  ;;  %7752 = vmatprep.subr.mxu1 %v9528_v0 }
 0xd23   : > { %7754 = vmatprep.mubr.msk.f32.mxu1 %vm9529_vm0, %v9528_v0 }
 0xdda   : > { %v2868_v48 = vpop.f32.mrf.mxu1  ;;  %v3018_v49 = vpop.f32.mrf.mxu0 }
 0xddb   : > { %7763 = vmatpush3.msra.mxu0 %v3018_v49 }
 0xddc   : > { %v7729_v50 = vpop.f32.mrf.mxu1  ;;  %v7751_v51 = vpop.f32.mrf.mxu0  ;;  %7772 = vmatprep.subr.mxu0 %v9528_v0 }
 0xddd   : > { %v7297_v50 = vld [vmem:[%s10925_s9 + $0x20] sm:$0xff]  ;;  %v7310_v51 = vld [vmem:[%s10926_s17 + $0x78] sm:$0xff] }
 0xde2   : > { %v2943_v52 = vpop.f32.mrf.mxu1 }
 0xde3   : > { %3026 = vrot.lane.b32.xlu1 %v2943_v52, %s10834_s5  ;;  %7753 = vmatpush3.xpose.msk.msra.mxu1 %vm2145_vm2, %v2943_v52  ;;  %v7309_v52 = vld [vmem:[%s10926_s17 + $0x70] sm:$0xff] }
 0xde4   : > { %v7740_v53 = vpop.f32.mrf.mxu1  ;;  %7757 = vmatprep.subr.mxu1 %v9528_v0 }
 0xde5   : > { %v7308_v53 = vld [vmem:[%s10926_s17 + $0x68] sm:$0xff] }
 0xde6   : > { %7755 = vmatmul.mubr.msk.f32.vlgmr.msra.gmra.mxu1 %vm2145_vm2, %v2868_v48 }
 0xde7   : > { %3023 = vrot.lane.b32.xlu1 %v2868_v48, %s10834_s5  ;;  %7759 = vmatprep.mubr.msk.f32.mxu1 %vm9529_vm0, %v9528_v0  ;;  %v7299_v48 = vld [vmem:[%s10925_s9 + $0x30] sm:$0xff] }
 0xe55   : > { %v3027_v54 = vpop.permute.xlu1 %3026 }
 0xe56   : > { %7758 = vmatpush3.xpose.msk.msra.mxu1 %vm2145_vm2, %v3027_v54  ;;  %v7307_v54 = vld [vmem:[%s10926_s17 + $0x60] sm:$0xff] }
 0xe57   : > { %7767 = vmatprep.subr.mxu1 %v9528_v0 }
 0xe59   : > { %v3024_v55 = vpop.permute.xlu1 %3023 }
 0xe5a   : > { %7760 = vmatmul.mubr.msk.f32.vlgmr.msra.gmra.mxu1 %vm2145_vm2, %v3024_v55  ;;  %v7306_v55 = vld [vmem:[%s10926_s17 + $0x58] sm:$0xff] }
 0xe5b   : > { %7769 = vmatprep.mubr.msk.f32.mxu1 %vm9529_vm0, %v9528_v0 }
 0xea6   : > { %v3102_v56 = vpop.f32.mrf.mxu1 }
 0xea7   : > { %v3180_v57 = vmul.f32 0.25, %v3102_v56 }
 0xea8   : > { %v7756_v58 = vpop.f32.mrf.mxu1 }
 0xea9   : > { %v3182_v59 = vsel %vm10192_vm3, %v3180_v57, -1000000.0 }
 0xeaa   : > { %v3184_v60 = vsel %vm2300_vm4, %v3182_v59, -inf }
 0xeab   : > { %3185 = vmax.xlane.f32.xlu1 %v3184_v60 }
 0xf1a   : > { %v3176_v61 = vpop.f32.mrf.mxu1 }
 0xf1b   : > { %v3181_v62 = vmul.f32 0.25, %v3176_v61 }
 0xf1c   : > { %v7761_v63 = vpop.f32.mrf.mxu1 }
 0xf1d   : > { %v3183_v1 = vsel %vm10192_vm3, %v3181_v62, -1000000.0 }
 0xf1e   : > { %v3187_v2 = vsel %vm2300_vm4, %v3183_v1, -inf }
 0xf1f   : > { %3188 = vmax.xlane.f32.xlu0 %v3187_v2 }
 0xf34   : > { %v3186_v8 = vpop.xlane.xlu1 %3185 }
 0xf35   : > { %v3190_v9 = vsub.f32 %v3182_v59, %v3186_v8 }
 0xf37   : > { %v3192_v10 = vmul.f32 1.442695, %v3190_v9  ;;  %v3757_v9 = vld [vmem:[#allocation19 + $0x18] sm:$0xff] }
 0xfa8   : > { %v3189_v3 = vpop.xlane.xlu0 %3188 }
 0xfa9   : > { %v3191_v4 = vsub.f32 %v3183_v1, %v3189_v3 }
 0xfab   : > { %v3194_v5 = vmul.f32 1.442695, %v3191_v4  ;;  %v3437_v4 = vld [vmem:[#allocation13 + $0x8] sm:$0xff] }
 0xfad   : > { %8467 = vpow2.f32 %v3194_v5 }
 0xfae   : > { %8469 = vpow2.f32 %v3192_v10  ;;  %v3756_v10 = vld [vmem:[#allocation19 + $0x10] sm:$0xff] }
 0xfba   : > { %v8468_v6 = vpop.eup %8467 }
 0xfbb   : > { %v3199_v7 = vsel %vm2300_vm4, %v8468_v6, 0.0  ;;  %v8470_v11 = vpop.eup %8469 }
 0xfbc   : > { %3200 = vadd.xlane.f32.xlu0 %v3199_v7  ;;  %v3196_v43 = vsel %vm2300_vm4, %v8470_v11, 0.0 }
 0xfd2   : > { %3029 = vrot.lane.b32.xlu0 %v3018_v49, %s10834_s5  ;;  %v7298_v49 = vld [vmem:[%s10925_s9 + $0x28] sm:$0xff]  ;;  %s3700_s5 = sadd.s32 4, %s7313_s26  ;;  %s3690_s9 = scalar_lea.vmem [#allocation32], %s3689_s4 }
 0xfd3   : > { %s3701_s7 = sld [smem:[#allocation4 + %s3700_s5]] }
 0xfd9   : > { %s3702_s5 = scalar_lea.vmem [#allocation32], %s3701_s7 }
 0xff1   : > { %3197 = vadd.xlane.f32.xlu0 %v3196_v43  ;;  %v3754_v43 = vld [vmem:[#allocation19] sm:$0xff] }
0x1045   : > { %v3201_v12 = vpop.xlane.xlu0 %3200 }
0x1046   : > { %8471 = vrcp.f32 %v3201_v12  ;;  %v3751_v12 = vld [vmem:[%s1812_s28] sm:$0xff]  ;;  %s3685_s28 = sld [smem:[#allocation4 + %s7313_s26]] }
0x1049   : > { %v3030_v13 = vpop.permute.xlu0 %3029 }
0x104a   : > { %7768 = vmatpush3.msra.mxu1 %v3030_v13  ;;  %v7305_v13 = vld [vmem:[%s10926_s17 + $0x50] sm:$0xff] }
0x104b   : > { %7783 = vmatprep.subr.mxu1 %v9528_v0 }
0x1053   : > { %v8472_v14 = vpop.eup %8471 }
0x1054   : > { %v3205_v15 = vmul.f32 %v8472_v14, %v8468_v6  ;;  %v3439_v6 = vld [vmem:[#allocation14 + $0x8] sm:$0xff]  ;;  %v7304_v14 = vld [vmem:[%s10926_s17 + $0x48] sm:$0xff] }
0x1056   : > { %7770 = vmatmul.mubr.msk.f32.vlgmr.msra.gmra.mxu1 %vm2300_vm4, %v3205_v15  ;;  %v7303_v15 = vld [vmem:[%s10926_s17 + $0x40] sm:$0xff]  ;;  %s3686_s17 = scalar_lea.vmem [#allocation32], %s3685_s28 }
0x1057   : > { %7791 = vmatprep.mubr.msk.f32.mxu1 %vm9529_vm0, %v9528_v0  ;;  %7784 = vmatpush3.msra.mxu1 %v7300_v47 }
0x1058   : > { %7785 = vmatprep.subr.mxu1 %v9528_v0 }
0x1059   : > { %7786 = vmatpush3.msra.mxu1 %v7299_v48 }
0x105a   : > { %7787 = vmatprep.subr.mxu1 %v9528_v0 }
0x105b   : > { %7788 = vmatpush3.msra.mxu1 %v7298_v49  ;;  %v7319_v49 = vld [vmem:[%s10928_s6 + $0x30] sm:$0xff] }
0x105c   : > { %7789 = vmatprep.subr.mxu1 %v9528_v0 }
0x105d   : > { %7790 = vmatpush3.msra.mxu1 %v7297_v50  ;;  %v7314_v50 = vld [vmem:[#allocation20] ss:$0 sm:$0xff] }
0x105e   : > { %7813 = vmatprep.subr.mxu1 %v9528_v0 }
0x107a   : > { %v3198_v16 = vpop.xlane.xlu0 %3197 }
0x107b   : > { %8473 = vrcp.f32 %v3198_v16  ;;  %v3844_v16 = vld [vmem:[%s10928_s6 + $0x18] sm:$0xff] }
0x1088   : > { %v8474_v17 = vpop.eup %8473 }
0x1089   : > { %v3204_v18 = vmul.f32 %v8474_v17, %v8470_v11  ;;  %v3755_v11 = vld [vmem:[#allocation19 + $0x8] sm:$0xff] }
0x108a   : > { %v3843_v17 = vld [vmem:[%s10928_s6 + $0x10] sm:$0xff] }
0x108b   : > { %7765 = vmatmul.mubr.msk.f32.vlgmr.msra.gmra.mxu0 %vm2300_vm4, %v3204_v18  ;;  %v3842_v18 = vld [vmem:[%s10928_s6 + $0x8] sm:$0xff] }
0x108c   : > { %7780 = vmatprep.mubr.msk.f32.mxu0 %vm9529_vm0, %v9528_v0  ;;  %7773 = vmatpush3.msra.mxu0 %v7295_v19  ;;  %v3841_v19 = vld [vmem:[%s10928_s6] sm:$0xff] }
0x108d   : > { %7774 = vmatprep.subr.mxu0 %v9528_v0 }
0x108e   : > { %7775 = vmatpush3.msra.mxu0 %v7294_v20  ;;  %v3691_v20 = vld [vmem:[%s3690_s9] sm:$0x1] }
0x108f   : > { %7776 = vmatprep.subr.mxu0 %v9528_v0 }
0x1090   : > { %7777 = vmatpush3.msra.mxu0 %v7293_v22 }
0x1091   : > { %7778 = vmatprep.subr.mxu0 %v9528_v0 }
0x1092   : > { %7779 = vmatpush3.msra.mxu0 %v7292_v23  ;;  %v3717_v23 = vrot.slane %v3691_v20, 7 }
0x1093   : > { %7794 = vmatprep.subr.mxu0 %v9528_v0 }
0x1116   : > { %v3348_v24 = vpop.f32.mrf.mxu1 }
0x1117   : > { %3353 = vrot.lane.b32.xlu1 %v3348_v24, %s10832_s3  ;;  %s3697_s3 = sld [smem:[#allocation4 + %s3696_s15]]  ;;  %v3687_v24 = vld [vmem:[%s3686_s17] sm:$0x1] }
0x1118   : > { %v7771_v25 = vpop.f32.mrf.mxu1 }
0x111d   : > { %s3698_s16 = scalar_lea.vmem [#allocation32], %s3697_s3  ;;  %s10932_s3 = sld [smem:[#allocation94_spill]] }
0x111e   : > { %v3699_v25 = vld [vmem:[%s3698_s16] sm:$0x1] }
0x114b   : > { %v3275_v21 = vpop.f32.mrf.mxu0 }
0x114d   : > { %v7766_v26 = vpop.f32.mrf.mxu0 }
0x114e   : > { %v3738_v26 = vsel %vm3737_vm6, %v3687_v24, %v3717_v23 }
0x1189   : > { %v3354_v27 = vpop.permute.xlu1 %3353 }
0x118a   : > { %v3356_v28 = vsel %vm2145_vm2, %v3275_v21, %v3354_v27  ;;  %v3703_v27 = vld [vmem:[%s3702_s5] sm:$0x1] }
0x118b   : > { %7781 = vmatmul.mubr.msk.f32.vlgmr.msra.gmra.mxu0 %vm1831_vm1, %v3356_v28  ;;  %v3723_v28 = vrot.slane %v3699_v25, 5 }
0x118c   : > { %7810 = vmatprep.mubr.msk.f32.mxu0 %vm9529_vm0, %v9528_v0  ;;  %7795 = vmatpush3.msra.mxu0 %v7310_v51  ;;  %v7318_v51 = vld [vmem:[%s10928_s6 + $0x28] sm:$0xff] }
0x118d   : > { %7796 = vmatprep.subr.mxu0 %v9528_v0 }
0x118e   : > { %7797 = vmatpush3.msra.mxu0 %v7309_v52 }
0x118f   : > { %7798 = vmatprep.subr.mxu0 %v9528_v0 }
0x1190   : > { %7799 = vmatpush3.msra.mxu0 %v7308_v53  ;;  %v3752_v53 = vld [vmem:[#allocation22] sm:$0xff] }
0x1191   : > { %7800 = vmatprep.subr.mxu0 %v9528_v0 }
0x1192   : > { %7801 = vmatpush3.msra.mxu0 %v7307_v54 }
0x1193   : > { %7802 = vmatprep.subr.mxu0 %v9528_v0 }
0x1194   : > { %7803 = vmatpush3.msra.mxu0 %v7306_v55 }
0x1195   : > { %7804 = vmatprep.subr.mxu0 %v9528_v0 }
0x1196   : > { %7805 = vmatpush3.msra.mxu0 %v7305_v13 }
0x1197   : > { %7806 = vmatprep.subr.mxu0 %v9528_v0 }
0x1198   : > { %7807 = vmatpush3.msra.mxu0 %v7304_v14 }
0x1199   : > { %7808 = vmatprep.subr.mxu0 %v9528_v0 }
0x119a   : > { %7809 = vmatpush3.msra.mxu0 %v7303_v15 }
0x119b   : > { %7835 = vmatprep.subr.mxu0 %v9528_v0 }
0x124b   : > { %v3431_v29 = vpop.f32.mrf.mxu0 }
0x124c   : > { %v3435_v30 = vadd.f32 %v3431_v29, %v10276_v42 }
0x124d   : > { %v7782_v31 = vpop.f32.mrf.mxu0 }
0x124e   : > { %v3440_v32 = vsel %vm1831_vm1, %v3435_v30, 0.0  ;;  %v3726_v31 = vrot.slane %v3703_v27, 4 }
0x124f   : > { %3441 = vadd.xlane.f32.xlu1 %v3440_v32 }
0x12d8   : > { %v3442_v33 = vpop.xlane.xlu1 %3441 }
0x12d9   : > { %v3443_v34 = vrot.slane %v3442_v33, 4 }
0x12db   : > { %v3444_v35 = vadd.f32 %v3443_v34, %v3442_v33  ;;  %v7301_v33 = vld [vmem:[#allocation10 + $0x1] ss:$0 sm:$0xff] }
0x12dd   : > { %v3445_v37 = vrot.slane %v3444_v35, 2 }
0x12df   : > { %v3446_v38 = vadd.f32 %v3445_v37, %v3444_v35 }
0x12e1   : > { %v3447_v39 = vrot.slane %v3446_v38, 1 }
0x12e3   : > { %v3448_v40 = vadd.f32 %v3447_v39, %v3446_v38 }
0x12e5   : > { %8103 = vpush %v3448_v40 }
0x1316   : > { %s8104_s18 = spop %8103 }
0x1317   : > { %v3450_v41 = vstv %s8104_s18  ;;  %s3692_s18 = sadd.s32 2, %s7313_s26  ;;  %s10933_s26 = sld [smem:[#allocation95_spill]] }
0x1318   : > { %v3451_v44 = vmul.f32 0.00390625, %v3450_v41 }
0x131a   : > { %v3452_v42 = vsub.f32 %v3435_v30, %v3451_v44  ;;  %v3707_v30 = vld [vmem:[%s3706_s8] sm:$0x1] }
0x131b   : > { %v3729_v35 = vrot.slane %v3707_v30, 3 }
0x131c   : > { %v3453_v45 = vmul.f32 %v3452_v42, %v3452_v42 }
0x131e   : > { %v3454_v46 = vsel %vm1831_vm1, %v3453_v45, 0.0 }
0x131f   : > { %3455 = vadd.xlane.f32.xlu0 %v3454_v46  ;;  %v7320_v46 = vld [vmem:[%s10928_s6 + $0x38] sm:$0xff] }
0x13a8   : > { %v3456_v56 = vpop.xlane.xlu0 %3455 }
0x13a9   : > { %v3457_v57 = vrot.slane %v3456_v56, 4 }
0x13ab   : > { %v3458_v58 = vadd.f32 %v3457_v57, %v3456_v56  ;;  %v7317_v56 = vld [vmem:[%s10928_s6 + $0x20] sm:$0xff] }
0x13ad   : > { %v3459_v59 = vrot.slane %v3458_v58, 2 }
0x13af   : > { %v3460_v60 = vadd.f32 %v3459_v59, %v3458_v58 }
0x13b1   : > { %v3461_v61 = vrot.slane %v3460_v60, 1 }
0x13b3   : > { %v3462_v62 = vadd.f32 %v3461_v61, %v3460_v60 }
0x13b5   : > { %8105 = vpush %v3462_v62  ;;  %v7325_v62 = vld [vmem:[%s10928_s6 + $0x58] sm:$0xff] }
0x13e6   : > { %s8106_s2 = spop %8105 }
0x13e7   : > { %v3464_v63 = vstv %s8106_s2  ;;  %s3693_s2 = sld [smem:[#allocation4 + %s3692_s18]] }
0x13e8   : > { %v3465_v1 = vmul.f32 0.00390625, %v3464_v63  ;;  %s3713_s18 = sld [smem:[#allocation4 + %s3712_s20]]  ;;  %v7324_v63 = vld [vmem:[%s10928_s6 + $0x50] sm:$0xff] }
0x13ea   : > { %v3466_v2 = vadd.f32 1e-05, %v3465_v1  ;;  %v7323_v1 = vld [vmem:[%s10928_s6 + $0x48] sm:$0xff] }
0x13ec   : > { %8475 = vrsqrt.f32 %v3466_v2  ;;  %v7322_v2 = vld [vmem:[%s10928_s6 + $0x40] sm:$0xff] }
0x13ed   : > { %s3694_s13 = scalar_lea.vmem [#allocation32], %s3693_s2 }
0x13ee   : > { %v3695_v22 = vld [vmem:[%s3694_s13] sm:$0x1]  ;;  %s3710_s13 = scalar_lea.vmem [#allocation32], %s3709_s19  ;;  %s3714_s20 = scalar_lea.vmem [#allocation32], %s3713_s18 }
0x13ef   : > { %v3720_v21 = vrot.slane %v3695_v22, 6  ;;  %v3711_v34 = vld [vmem:[%s3710_s13] sm:$0x1]  ;;  %s10929_s19 = smov 112   ;;  %s10934_s13 = sld [smem:[#allocation109_spill]] }
0x13f0   : > { %v3715_v40 = vld [vmem:[%s3714_s20] sm:$0x1]  ;;  %v3732_v41 = vrot.slane %v3711_v34, 2 }
0x13f1   : > { %v3740_v29 = vsel %vm3739_vm7, %v3738_v26, %v3720_v21  ;;  %v3735_v47 = vrot.slane %v3715_v40, 1  ;;  %v4403_v40 = vld [vmem:[%s10930_s12 + $0x10] sm:$0xff] }
0x13f2   : > { %v3742_v32 = vsel %vm3741_vm8, %v3740_v29, %v3723_v28 }
0x13f3   : > { %v3744_v37 = vsel %vm3743_vm9, %v3742_v32, %v3726_v31 }
0x13f9   : > { %v8476_v3 = vpop.eup %8475 }
0x13fa   : > { %v3468_v5 = vmul.f32 %v8476_v3, %v3452_v42  ;;  %v3746_v42 = vsel %vm3745_vm10, %v3744_v37, %v3729_v35 }
0x13fb   : > { %v3748_v48 = vsel %vm3747_vm11, %v3746_v42, %v3732_v41  ;;  %v4402_v41 = vld [vmem:[%s10930_s12 + $0x8] sm:$0xff] }
0x13fc   : > { %v3469_v7 = vmul.f32 %v3468_v5, %v3437_v4  ;;  %v3750_v52 = vsel %vm3749_vm12, %v3748_v48, %v3735_v47 }
0x13fd   : > { %v3753_v58 = vadd.f32 %v3752_v53, %v3750_v52 }
0x13fe   : > { %v10361_v8 = vadd.f32 %v3469_v7, %v3439_v6 }
0x1400   : > { %7792 = vmatmul.mubr.msk.f32.vlgmr.msra.gmra.mxu1 %vm1831_vm1, %v10361_v8 }
0x1401   : > { %7814 = vmatpush3.msra.mxu1 %v3757_v9  ;;  %7821 = vmatprep.mubr.msk.f32.mxu1 %vm9529_vm0, %v9528_v0 }
0x1402   : > { %7815 = vmatprep.subr.mxu1 %v9528_v0 }
0x1403   : > { %7816 = vmatpush3.msra.mxu1 %v3756_v10 }
0x1404   : > { %7817 = vmatprep.subr.mxu1 %v9528_v0 }
0x1405   : > { %7818 = vmatpush3.msra.mxu1 %v3755_v11 }
0x1406   : > { %7819 = vmatprep.subr.mxu1 %v9528_v0 }
0x1407   : > { %7820 = vmatpush3.msra.mxu1 %v3754_v43 }
0x1408   : > { %7822 = vmatmul.mubr.msk.f32.vlgmr.msra.gmra.mxu1 %vm1831_vm1, %v3751_v12  ;;  %7824 = vmatprep.subr.mxu1 %v9528_v0 }
0x1409   : > { %7832 = vmatprep.mubr.msk.f32.mxu1 %vm9529_vm0, %v9528_v0  ;;  %7825 = vmatpush3.msra.mxu1 %v3844_v16 }
0x140a   : > { %7826 = vmatprep.subr.mxu1 %v9528_v0 }
0x140b   : > { %7827 = vmatpush3.msra.mxu1 %v3843_v17 }
0x140c   : > { %7828 = vmatprep.subr.mxu1 %v9528_v0 }
0x140d   : > { %7829 = vmatpush3.msra.mxu1 %v3842_v18 }
0x140e   : > { %7830 = vmatprep.subr.mxu1 %v9528_v0 }
0x140f   : > { %7831 = vmatpush3.msra.mxu1 %v3841_v19 }
0x1410   : > { %7846 = vmatprep.subr.mxu1 %v9528_v0 }
0x14c0   : > { %v3553_v38 = vpop.f32.mrf.mxu1 }
0x14c1   : > { %v3554_v39 = vadd.f32 %v7301_v33, %v3553_v38 }
0x14c2   : > { %v7793_v44 = vpop.f32.mrf.mxu1 }
0x14c3   : > { %v3557_v45 = vmax.f32 %v3554_v39, 0.0  ;;  %v4404_v39 = vld [vmem:[%s10930_s12 + $0x18] sm:$0xff]  ;;  %v4401_v44 = vld [vmem:[%s10930_s12] sm:$0xff] }
0x14c5   : > { %7811 = vmatmul.mubr.msk.f32.vlgmr.msra.gmra.mxu0 %vm2686_vm5, %v3557_v45 }
0x14c6   : > { %7836 = vmatpush3.msra.mxu0 %v7320_v46  ;;  %7843 = vmatprep.mubr.msk.f32.mxu0 %vm9529_vm0, %v9528_v0  ;;  %v7311_v46 = vld [vmem:[#allocation11 + $0x1] ss:$0 sm:$0xff] }
0x14c7   : > { %7837 = vmatprep.subr.mxu0 %v9528_v0 }
0x14c8   : > { %v3834_v54 = vpop.f32.mrf.mxu1  ;;  %7838 = vmatpush3.msra.mxu0 %v7319_v49 }
0x14c9   : > { %v3835_v55 = vadd.f32 %v7314_v50, %v3834_v54  ;;  %7839 = vmatprep.subr.mxu0 %v9528_v0 }
0x14ca   : > { %v7823_v57 = vpop.f32.mrf.mxu1  ;;  %7840 = vmatpush3.msra.mxu0 %v7318_v51 }
0x14cb   : > { %v3838_v59 = vmax.f32 %v3835_v55, 0.0  ;;  %7841 = vmatprep.subr.mxu0 %v9528_v0 }
0x14cc   : > { %7842 = vmatpush3.msra.mxu0 %v7317_v56 }
0x14cd   : > { %v3839_v60 = vmul.f32 5.656854, %v3838_v59  ;;  %7857 = vmatprep.subr.mxu0 %v9528_v0 }
0x14cf   : > { %v10403_v61 = vadd.f32 %v3839_v60, %v3753_v58 }
0x14d1   : > { %7833 = vmatmul.mubr.msk.f32.vlgmr.msra.gmra.mxu1 %vm1831_vm1, %v10403_v61  ;;  %7844 = vmatmul.mubr.msk.f32.vlgmr.msra.gmra.mxu0 %vm1831_vm1, %v10403_v61 }
0x14d2   : > { %7847 = vmatpush3.msra.mxu1 %v7325_v62  ;;  %7854 = vmatprep.mubr.msk.f32.mxu1 %vm9529_vm0, %v9528_v0 }
0x14d3   : > { %7848 = vmatprep.subr.mxu1 %v9528_v0  ;;  %7859 = vmatprep.mubr.msk.f32.mxu0 %vm9529_vm0, %v9528_v0 }
0x14d4   : > { %7849 = vmatpush3.msra.mxu1 %v7324_v63 }
0x14d5   : > { %7850 = vmatprep.subr.mxu1 %v9528_v0 }
0x14d6   : > { %7851 = vmatpush3.msra.mxu1 %v7323_v1 }
0x14d7   : > { %7852 = vmatprep.subr.mxu1 %v9528_v0 }
0x14d8   : > { %7853 = vmatpush3.msra.mxu1 %v7322_v2 }
0x14d9   : > { %7855 = vmatmul.mubr.msk.f32.vlgmr.msra.gmra.mxu1 %vm1831_vm1, %v10403_v61  ;;  %7862 = vmatprep.subr.mxu1 %v9528_v0 }
0x14da   : > { %7864 = vmatprep.mubr.msk.f32.mxu1 %vm9529_vm0, %v9528_v0 }
0x1585   : > { %v10425_v3 = vpop.f32.mrf.mxu0 }
0x1586   : > { %v3645_v47 = vadd.f32 %v7311_v46, %v10425_v3 }
0x1587   : > { %v7812_v4 = vpop.f32.mrf.mxu0 }
0x1588   : > { %v3648_v48 = vadd.f32 %v3645_v47, %v10361_v8  ;;  %v4479_v47 = vld [vmem:[#allocation26] sm:$0xff] }
0x158a   : > { %v3653_v49 = vsel %vm1831_vm1, %v3648_v48, 0.0 }
0x1591   : > { %v3914_v5 = vpop.f32.mrf.mxu1  ;;  %v3989_v6 = vpop.f32.mrf.mxu0 }
0x1592   : > { %4072 = vrot.lane.b32.xlu0 %v3989_v6, %s10929_s19  ;;  %7858 = vmatpush3.xpose.msk.msra.mxu0 %vm2145_vm2, %v3989_v6 }
0x1593   : > { %v7834_v7 = vpop.f32.mrf.mxu1  ;;  %v7845_v9 = vpop.f32.mrf.mxu0  ;;  %7867 = vmatprep.subr.mxu0 %v9528_v0 }
0x1595   : > { %7860 = vmatmul.mubr.msk.f32.vlgmr.msra.gmra.mxu0 %vm2145_vm2, %v3914_v5 }
0x1596   : > { %4069 = vrot.lane.b32.xlu0 %v3914_v5, %s10929_s19  ;;  %7869 = vmatprep.mubr.msk.f32.mxu0 %vm9529_vm0, %v9528_v0 }
0x1599   : > { %v4064_v10 = vpop.f32.mrf.mxu1 }
0x159a   : > { %7868 = vmatpush3.msra.mxu0 %v4064_v10 }
0x159b   : > { %v7856_v11 = vpop.f32.mrf.mxu1  ;;  %7877 = vmatprep.subr.mxu0 %v9528_v0 }
0x1604   : > { %v4073_v43 = vpop.permute.xlu0 %4072 }
0x1605   : > { %7863 = vmatpush3.xpose.msk.msra.mxu1 %vm2145_vm2, %v4073_v43 }
0x1606   : > { %7872 = vmatprep.subr.mxu1 %v9528_v0 }
0x1608   : > { %v4070_v12 = vpop.permute.xlu0 %4069 }
0x1609   : > { %7865 = vmatmul.mubr.msk.f32.vlgmr.msra.gmra.mxu1 %vm2145_vm2, %v4070_v12 }
0x160a   : > { %7874 = vmatprep.mubr.msk.f32.mxu1 %vm9529_vm0, %v9528_v0 }
0x1655   : > { %v4148_v13 = vpop.f32.mrf.mxu0 }
0x1656   : > { %v4226_v14 = vmul.f32 0.25, %v4148_v13 }
0x1657   : > { %v7861_v15 = vpop.f32.mrf.mxu0 }
0x1658   : > { %v4228_v16 = vsel %vm2300_vm4, %v4226_v14, -inf }
0x1659   : > { %4229 = vmax.xlane.f32.xlu1 %v4228_v16 }
0x16c9   : > { %v4222_v17 = vpop.f32.mrf.mxu1 }
0x16ca   : > { %v4227_v18 = vmul.f32 0.25, %v4222_v17 }
0x16cb   : > { %v7866_v19 = vpop.f32.mrf.mxu1 }
0x16cc   : > { %v4231_v20 = vsel %vm2300_vm4, %v4227_v18, -inf }
0x16cd   : > { %4232 = vmax.xlane.f32.xlu0 %v4231_v20 }
0x16e2   : > { %v4230_v26 = vpop.xlane.xlu1 %4229 }
0x16e3   : > { %v4234_v27 = vsub.f32 %v4226_v14, %v4230_v26  ;;  %v4514_v26 = vld [vmem:[%s10932_s3 + $0x10] sm:$0xff] }
0x16e5   : > { %v4236_v28 = vmul.f32 1.442695, %v4234_v27  ;;  %v4513_v27 = vld [vmem:[%s10932_s3 + $0x8] sm:$0xff] }
0x1756   : > { %v4233_v22 = vpop.xlane.xlu0 %4232 }
0x1757   : > { %v4235_v23 = vsub.f32 %v4227_v18, %v4233_v22 }
0x1759   : > { %v4238_v24 = vmul.f32 1.442695, %v4235_v23 }
0x175b   : > { %8477 = vpow2.f32 %v4238_v24 }
0x175c   : > { %8479 = vpow2.f32 %v4236_v28  ;;  %v4512_v28 = vld [vmem:[%s10932_s3] sm:$0xff] }
0x1768   : > { %v8478_v25 = vpop.eup %8477 }
0x1769   : > { %v4243_v21 = vsel %vm2300_vm4, %v8478_v25, 0.0  ;;  %v8480_v29 = vpop.eup %8479 }
0x176a   : > { %4244 = vadd.xlane.f32.xlu1 %v4243_v21  ;;  %v4240_v30 = vsel %vm2300_vm4, %v8480_v29, 0.0  ;;  %v4515_v21 = vld [vmem:[%s10932_s3 + $0x18] sm:$0xff] }
0x177b   : > { %4075 = vrot.lane.b32.xlu1 %v4064_v10, %s10929_s19 }
0x179f   : > { %4241 = vadd.xlane.f32.xlu1 %v4240_v30  ;;  %v4603_v30 = vld [vmem:[%s10933_s26 + $0x30] sm:$0xff] }
0x17f3   : > { %v4245_v31 = vpop.xlane.xlu1 %4244 }
0x17f4   : > { %8481 = vrcp.f32 %v4245_v31  ;;  %v4602_v31 = vld [vmem:[%s10933_s26 + $0x28] sm:$0xff] }
0x17f7   : > { %v4076_v32 = vpop.permute.xlu1 %4075 }
0x17f8   : > { %7873 = vmatpush3.msra.mxu1 %v4076_v32  ;;  %v4601_v32 = vld [vmem:[%s10933_s26 + $0x20] sm:$0xff] }
0x17f9   : > { %7888 = vmatprep.subr.mxu1 %v9528_v0 }
0x1801   : > { %v8482_v33 = vpop.eup %8481 }
0x1802   : > { %v4249_v34 = vmul.f32 %v8482_v33, %v8478_v25  ;;  %v4600_v33 = vld [vmem:[%s10933_s26 + $0x18] sm:$0xff] }
0x1804   : > { %7875 = vmatmul.mubr.msk.f32.vlgmr.msra.gmra.mxu1 %vm2300_vm4, %v4249_v34 }
0x1805   : > { %7896 = vmatprep.mubr.msk.f32.mxu1 %vm9529_vm0, %v9528_v0  ;;  %7889 = vmatpush3.msra.mxu1 %v4515_v21 }
0x1806   : > { %7890 = vmatprep.subr.mxu1 %v9528_v0 }
0x1807   : > { %7891 = vmatpush3.msra.mxu1 %v4514_v26 }
0x1808   : > { %7892 = vmatprep.subr.mxu1 %v9528_v0 }
0x1809   : > { %7893 = vmatpush3.msra.mxu1 %v4513_v27 }
0x180a   : > { %7894 = vmatprep.subr.mxu1 %v9528_v0 }
0x180b   : > { %7895 = vmatpush3.msra.mxu1 %v4512_v28 }
0x180c   : > { %7918 = vmatprep.subr.mxu1 %v9528_v0 }
0x1828   : > { %v4242_v35 = vpop.xlane.xlu1 %4241 }
0x1829   : > { %8483 = vrcp.f32 %v4242_v35 }
0x1836   : > { %v8484_v37 = vpop.eup %8483 }
0x1837   : > { %v4248_v38 = vmul.f32 %v8484_v37, %v8480_v29  ;;  %v4604_v29 = vld [vmem:[%s10933_s26 + $0x38] sm:$0xff] }
0x1839   : > { %7870 = vmatmul.mubr.msk.f32.vlgmr.msra.gmra.mxu0 %vm2300_vm4, %v4248_v38 }
0x183a   : > { %7885 = vmatprep.mubr.msk.f32.mxu0 %vm9529_vm0, %v9528_v0  ;;  %7878 = vmatpush3.msra.mxu0 %v4404_v39 }
0x183b   : > { %7879 = vmatprep.subr.mxu0 %v9528_v0 }
0x183c   : > { %7880 = vmatpush3.msra.mxu0 %v4403_v40 }
0x183d   : > { %7881 = vmatprep.subr.mxu0 %v9528_v0 }
0x183e   : > { %7882 = vmatpush3.msra.mxu0 %v4402_v41 }
0x183f   : > { %7883 = vmatprep.subr.mxu0 %v9528_v0 }
0x1840   : > { %7884 = vmatpush3.msra.mxu0 %v4401_v44 }
0x1841   : > { %7899 = vmatprep.subr.mxu0 %v9528_v0 }
0x18c4   : > { %v4392_v42 = vpop.f32.mrf.mxu1 }
0x18c5   : > { %4397 = vrot.lane.b32.xlu0 %v4392_v42, %s10931_s10 }
0x18c6   : > { %v7876_v45 = vpop.f32.mrf.mxu1 }
0x18e4   : > { %3654 = vadd.xlane.f32.xlu0 %v3653_v49  ;;  %v4480_v49 = vld [vmem:[#allocation28] sm:$0xff] }
0x18f9   : > { %v4319_v50 = vpop.f32.mrf.mxu0 }
0x18fb   : > { %v7871_v51 = vpop.f32.mrf.mxu0 }
0x1937   : > { %v4398_v52 = vpop.permute.xlu0 %4397 }
0x1938   : > { %v4400_v53 = vsel %vm2145_vm2, %v4319_v50, %v4398_v52  ;;  %v4599_v52 = vld [vmem:[%s10933_s26 + $0x10] sm:$0xff] }
0x1939   : > { %7886 = vmatmul.mubr.msk.f32.vlgmr.msra.gmra.mxu0 %vm1831_vm1, %v4400_v53  ;;  %v4598_v53 = vld [vmem:[%s10933_s26 + $0x8] sm:$0xff] }
0x193a   : > { %7915 = vmatprep.mubr.msk.f32.mxu0 %vm9529_vm0, %v9528_v0  ;;  %7900 = vmatpush3.msra.mxu0 %v4604_v29 }
0x193b   : > { %7901 = vmatprep.subr.mxu0 %v9528_v0 }
0x193c   : > { %7902 = vmatpush3.msra.mxu0 %v4603_v30 }
0x193d   : > { %7903 = vmatprep.subr.mxu0 %v9528_v0 }
0x193e   : > { %7904 = vmatpush3.msra.mxu0 %v4602_v31 }
0x193f   : > { %7905 = vmatprep.subr.mxu0 %v9528_v0 }
0x1940   : > { %7906 = vmatpush3.msra.mxu0 %v4601_v32 }
0x1941   : > { %7907 = vmatprep.subr.mxu0 %v9528_v0 }
0x1942   : > { %7908 = vmatpush3.msra.mxu0 %v4600_v33 }
0x1943   : > { %7909 = vmatprep.subr.mxu0 %v9528_v0 }
0x1944   : > { %7910 = vmatpush3.msra.mxu0 %v4599_v52 }
0x1945   : > { %7911 = vmatprep.subr.mxu0 %v9528_v0 }
0x1946   : > { %7912 = vmatpush3.msra.mxu0 %v4598_v53 }
0x1947   : > { %7913 = vmatprep.subr.mxu0 %v9528_v0 }
0x196d   : > { %v3655_v54 = vpop.xlane.xlu0 %3654 }
0x196e   : > { %v3656_v55 = vrot.slane %v3655_v54, 4 }
0x1970   : > { %v3657_v56 = vadd.f32 %v3656_v55, %v3655_v54  ;;  %v4597_v54 = vld [vmem:[%s10933_s26] sm:$0xff]  ;;  %v7334_v55 = vld [vmem:[#allocation23] ss:$0 sm:$0xff] }
0x1971   : > { %7914 = vmatpush3.msra.mxu0 %v4597_v54 }
0x1972   : > { %v3658_v57 = vrot.slane %v3657_v56, 2  ;;  %7940 = vmatprep.subr.mxu0 %v9528_v0 }
0x1974   : > { %v3659_v58 = vadd.f32 %v3658_v57, %v3657_v56 }
0x1976   : > { %v3660_v59 = vrot.slane %v3659_v58, 1 }
0x1978   : > { %v3661_v8 = vadd.f32 %v3660_v59, %v3659_v58 }
0x197a   : > { %8107 = vpush %v3661_v8  ;;  %v7336_v8 = vld [vmem:[#allocation25] ss:$0 sm:$0xff] }
0x19ab   : > { %s8108_s7 = spop %8107 }
0x19ac   : > { %v3663_v60 = vstv %s8108_s7  ;;  %s1803_s7 = sand.u32 1, %s9433_s14  }
0x19ad   : > { %v3664_v62 = vmul.f32 0.00390625, %v3663_v60 }
0x19af   : > { %v10468_v63 = vsub.f32 %v3648_v48, %v3664_v62 }
0x19b1   : > { %v3666_v1 = vmul.f32 %v10468_v63, %v10468_v63 }
0x19b3   : > { %v3667_v2 = vsel %vm1831_vm1, %v3666_v1, 0.0 }
0x19b4   : > { %3668 = vadd.xlane.f32.xlu1 %v3667_v2 }
0x19f9   : > { %v4474_v3 = vpop.f32.mrf.mxu0 }
0x19fa   : > { %v4478_v4 = vadd.f32 %v4474_v3, %v10403_v61 }
0x19fb   : > { %v7887_v5 = vpop.f32.mrf.mxu0 }
0x19fc   : > { %v4481_v6 = vsel %vm1831_vm1, %v4478_v4, 0.0 }
0x19fd   : > { %4482 = vadd.xlane.f32.xlu1 %v4481_v6 }
0x1a3d   : > { %v3669_v7 = vpop.xlane.xlu1 %3668 }
0x1a3e   : > { %v3670_v9 = vrot.slane %v3669_v7, 4 }
0x1a40   : > { %v3671_v10 = vadd.f32 %v3670_v9, %v3669_v7 }
0x1a42   : > { %v3672_v11 = vrot.slane %v3671_v10, 2 }
0x1a44   : > { %v3673_v43 = vadd.f32 %v3672_v11, %v3671_v10 }
0x1a46   : > { %v3674_v12 = vrot.slane %v3673_v43, 1 }
0x1a48   : > { %v3675_v13 = vadd.f32 %v3674_v12, %v3673_v43 }
0x1a4a   : > { %8109 = vpush %v3675_v13 }
0x1a7b   : > { %s10475_s9 = spop %8109 }
0x1a86   : > { %v4483_v14 = vpop.xlane.xlu1 %4482 }
0x1a87   : > { %v4484_v15 = vrot.slane %v4483_v14, 4 }
0x1a89   : > { %v4485_v16 = vadd.f32 %v4484_v15, %v4483_v14 }
0x1a8b   : > { %v4486_v17 = vrot.slane %v4485_v16, 2 }
0x1a8d   : > { %v4487_v18 = vadd.f32 %v4486_v17, %v4485_v16  ;;  %v7341_v16 = vld [vmem:[%s10928_s6 + $0x78] sm:$0xff] }
0x1a8e   : > { %v7351_v17 = vld [vmem:[%s10928_s6 + $0xb8] sm:$0xff] }
0x1a8f   : > { %v4488_v61 = vrot.slane %v4487_v18, 1 }
0x1a91   : > { %v4489_v19 = vadd.f32 %v4488_v61, %v4487_v18  ;;  %v7340_v18 = vld [vmem:[%s10928_s6 + $0x70] sm:$0xff] }
0x1a92   : > { %v7350_v61 = vld [vmem:[%s10928_s6 + $0xb0] sm:$0xff] }
0x1a93   : > { %8111 = vpush %v4489_v19  ;;  %v7339_v19 = vld [vmem:[%s10928_s6 + $0x68] sm:$0xff] }
0x1ac4   : > { %s8112_s17 = spop %8111 }
0x1ac5   : > { %v4491_v20 = vstv %s8112_s17  ;;  %s1804_s17 = scalar_lea.vmem [#allocation55], %s1803_s7 }
0x1ac6   : > { %v4492_v22 = vmul.f32 0.00390625, %v4491_v20  ;;  %v7349_v20 = vld [vmem:[%s10928_s6 + $0xa8] sm:$0xff] }
0x1ac8   : > { %v4493_v23 = vsub.f32 %v4478_v4, %v4492_v22  ;;  %v7338_v22 = vld [vmem:[%s10928_s6 + $0x60] sm:$0xff] }
0x1aca   : > { %v4494_v24 = vmul.f32 %v4493_v23, %v4493_v23 }
0x1acc   : > { %v4495_v25 = vsel %vm1831_vm1, %v4494_v24, 0.0 }
0x1acd   : > { %4496 = vadd.xlane.f32.xlu1 %v4495_v25 }
0x1b56   : > { %v4497_v34 = vpop.xlane.xlu1 %4496 }
0x1b57   : > { %v4498_v35 = vrot.slane %v4497_v34, 4 }
0x1b59   : > { %v4499_v37 = vadd.f32 %v4498_v35, %v4497_v34  ;;  %v4686_v34 = vld [vmem:[#allocation29] sm:$0xff] }
0x1b5b   : > { %v4500_v38 = vrot.slane %v4499_v37, 2 }
0x1b5d   : > { %v4501_v39 = vadd.f32 %v4500_v38, %v4499_v37  ;;  %v4687_v37 = vld [vmem:[#allocation31] sm:$0xff] }
0x1b5f   : > { %v4502_v40 = vrot.slane %v4501_v39, 1 }
0x1b61   : > { %v4503_v41 = vadd.f32 %v4502_v40, %v4501_v39  ;;  %v7346_v40 = vld [vmem:[%s10928_s6 + $0x98] sm:$0xff] }
0x1b63   : > { %8113 = vpush %v4503_v41  ;;  %v7345_v41 = vld [vmem:[%s10928_s6 + $0x90] sm:$0xff] }
0x1b94   : > { %s8114_s4 = spop %8113 }
0x1b95   : > { %v4505_v44 = vstv %s8114_s4  ;;  %s6748_s4 = sshll.u32 %s1804_s17, 4  ;;  %s6749_s4 = int_to_ptr.vmem [resolvable:$true] %s6748_s4 }
0x1b96   : > { %v4506_v42 = vmul.f32 0.00390625, %v4505_v44  ;;  %v7344_v44 = vld [vmem:[%s10928_s6 + $0x88] sm:$0xff] }
0x1b98   : > { %v4507_v45 = vadd.f32 1e-05, %v4506_v42  ;;  %v7343_v42 = vld [vmem:[%s10928_s6 + $0x80] sm:$0xff] }
0x1b9a   : > { %8485 = vrsqrt.f32 %v4507_v45 }
0x1ba7   : > { %v8486_v46 = vpop.eup %8485 }
0x1ba8   : > { %v4509_v48 = vmul.f32 %v8486_v46, %v4493_v23  ;;  %v7348_v23 = vld [vmem:[%s10928_s6 + $0xa0] sm:$0xff] }
0x1baa   : > { %v4510_v50 = vmul.f32 %v4509_v48, %v4479_v47 }
0x1bac   : > { %v4511_v51 = vadd.f32 %v4510_v50, %v4480_v49 }
0x1bae   : > { %7897 = vmatmul.mubr.msk.f32.vlgmr.msra.gmra.mxu1 %vm1831_vm1, %v4511_v51 }
0x1baf   : > { %7926 = vmatprep.mubr.msk.f32.mxu1 %vm9529_vm0, %v9528_v0  ;;  %7919 = vmatpush3.msra.mxu1 %v7341_v16  ;;  %v7362_v16 = vld [vmem:[%s10930_s12 + $0x38] sm:$0xff] }
0x1bb0   : > { %7920 = vmatprep.subr.mxu1 %v9528_v0 }
0x1bb1   : > { %7921 = vmatpush3.msra.mxu1 %v7340_v18  ;;  %v7360_v18 = vld [vmem:[%s10930_s12 + $0x28] sm:$0xff] }
0x1bb2   : > { %7922 = vmatprep.subr.mxu1 %v9528_v0 }
0x1bb3   : > { %7923 = vmatpush3.msra.mxu1 %v7339_v19 }
0x1bb4   : > { %7924 = vmatprep.subr.mxu1 %v9528_v0 }
0x1bb5   : > { %7925 = vmatpush3.msra.mxu1 %v7338_v22 }
0x1bb6   : > { %7929 = vmatprep.subr.mxu1 %v9528_v0 }
0x1c6e   : > { %v4592_v56 = vpop.f32.mrf.mxu1 }
0x1c6f   : > { %v4593_v57 = vadd.f32 %v7334_v55, %v4592_v56 }
0x1c70   : > { %v7898_v58 = vpop.f32.mrf.mxu1 }
0x1c71   : > { %v4596_v59 = vmax.f32 %v4593_v57, 0.0 }
0x1c73   : > { %7916 = vmatmul.mubr.msk.f32.vlgmr.msra.gmra.mxu0 %vm2686_vm5, %v4596_v59 }
0x1c74   : > { %7948 = vmatprep.mubr.msk.f32.mxu0 %vm9529_vm0, %v9528_v0  ;;  %7941 = vmatpush3.msra.mxu0 %v7351_v17  ;;  %v7361_v17 = vld [vmem:[%s10930_s12 + $0x30] sm:$0xff] }
0x1c75   : > { %7942 = vmatprep.subr.mxu0 %v9528_v0 }
0x1c76   : > { %7943 = vmatpush3.msra.mxu0 %v7350_v61  ;;  %v7359_v61 = vld [vmem:[%s10930_s12 + $0x20] sm:$0xff] }
0x1c77   : > { %7944 = vmatprep.subr.mxu0 %v9528_v0 }
0x1c78   : > { %7945 = vmatpush3.msra.mxu0 %v7349_v20 }
0x1c79   : > { %7946 = vmatprep.subr.mxu0 %v9528_v0 }
0x1c7a   : > { %7947 = vmatpush3.msra.mxu0 %v7348_v23 }
0x1c7b   : > { %7961 = vmatprep.subr.mxu0 %v9528_v0 }
0x1d33   : > { %v4681_v60 = vpop.f32.mrf.mxu0 }
0x1d34   : > { %v4682_v62 = vadd.f32 %v7336_v8, %v4681_v60 }
0x1d35   : > { %v7917_v1 = vpop.f32.mrf.mxu0 }
0x1d36   : > { %v4685_v2 = vadd.f32 %v4682_v62, %v4511_v51 }
0x1d38   : > { %v4688_v3 = vsel %vm1831_vm1, %v4685_v2, 0.0 }
0x1d39   : > { %4689 = vadd.xlane.f32.xlu1 %v4688_v3 }
0x1dc2   : > { %v4690_v4 = vpop.xlane.xlu1 %4689 }
0x1dc3   : > { %v4691_v5 = vrot.slane %v4690_v4, 4 }
0x1dc5   : > { %v4692_v6 = vadd.f32 %v4691_v5, %v4690_v4 }
0x1dc7   : > { %v4693_v7 = vrot.slane %v4692_v6, 2 }
0x1dc9   : > { %v4694_v9 = vadd.f32 %v4693_v7, %v4692_v6 }
0x1dcb   : > { %v4695_v10 = vrot.slane %v4694_v9, 1 }
0x1dcd   : > { %v4696_v11 = vadd.f32 %v4695_v10, %v4694_v9 }
0x1dcf   : > { %8115 = vpush %v4696_v11 }
0x1e00   : > { %s8116_s2 = spop %8115 }
0x1e01   : > { %v4698_v43 = vstv %s8116_s2 }
0x1e02   : > { %v4699_v12 = vmul.f32 0.00390625, %v4698_v43 }
0x1e04   : > { %v4700_v13 = vsub.f32 %v4685_v2, %v4699_v12 }
0x1e06   : > { %v4701_v14 = vmul.f32 %v4700_v13, %v4700_v13 }
0x1e08   : > { %v4702_v15 = vsel %vm1831_vm1, %v4701_v14, 0.0 }
0x1e09   : > { %4703 = vadd.xlane.f32.xlu1 %v4702_v15 }
0x1e92   : > { %v4704_v24 = vpop.xlane.xlu1 %4703 }
0x1e93   : > { %v4705_v25 = vrot.slane %v4704_v24, 4 }
0x1e95   : > { %v4706_v21 = vadd.f32 %v4705_v25, %v4704_v24 }
0x1e97   : > { %v4707_v26 = vrot.slane %v4706_v21, 2 }
0x1e99   : > { %v4708_v27 = vadd.f32 %v4707_v26, %v4706_v21 }
0x1e9b   : > { %v4709_v28 = vrot.slane %v4708_v27, 1 }
0x1e9d   : > { %v4710_v29 = vadd.f32 %v4709_v28, %v4708_v27 }
0x1e9f   : > { %8117 = vpush %v4710_v29 }
0x1ed0   : > { %s8118_s15 = spop %8117 }
0x1ed1   : > { %v4712_v30 = vstv %s8118_s15  ;;  %s6736_s15 = scalar_lea.sflag [#allocation7], %s1803_s7 }
0x1ed2   : > { %v4713_v31 = vmul.f32 0.00390625, %v4712_v30 }
0x1ed4   : > { %v4714_v32 = vadd.f32 1e-05, %v4713_v31 }
0x1ed6   : > { %8487 = vrsqrt.f32 %v4714_v32 }
0x1ee3   : > { %v8488_v33 = vpop.eup %8487 }
0x1ee4   : > { %v4716_v35 = vmul.f32 %v8488_v33, %v4700_v13 }
0x1ee6   : > { %v4717_v38 = vmul.f32 %v4716_v35, %v4686_v34 }
0x1ee8   : > { %v10526_v39 = vadd.f32 %v4717_v38, %v4687_v37 }
0x1eea   : > { %7927 = vmatmul.mubr.msk.f32.vlgmr.msra.gmra.mxu1 %vm1831_vm1, %v10526_v39  ;;  %7949 = vmatmul.mubr.msk.f32.vlgmr.msra.gmra.mxu0 %vm1831_vm1, %v10526_v39 }
0x1eeb   : > { %7930 = vmatpush3.msra.mxu1 %v7346_v40  ;;  %7937 = vmatprep.mubr.msk.f32.mxu1 %vm9529_vm0, %v9528_v0 }
0x1eec   : > { %7931 = vmatprep.subr.mxu1 %v9528_v0  ;;  %7963 = vmatprep.mubr.msk.f32.mxu0 %vm9529_vm0, %v9528_v0 }
0x1eed   : > { %7932 = vmatpush3.msra.mxu1 %v7345_v41 }
0x1eee   : > { %7933 = vmatprep.subr.mxu1 %v9528_v0 }
0x1eef   : > { %7934 = vmatpush3.msra.mxu1 %v7344_v44  ;;  %v7367_v44 = vld [vmem:[%s10932_s3 + $0x38] sm:$0xff] }
0x1ef0   : > { %7935 = vmatprep.subr.mxu1 %v9528_v0 }
0x1ef1   : > { %7936 = vmatpush3.msra.mxu1 %v7343_v42  ;;  %v7366_v42 = vld [vmem:[%s10932_s3 + $0x30] sm:$0xff] }
0x1ef2   : > { %7938 = vmatmul.mubr.msk.f32.vlgmr.msra.gmra.mxu1 %vm1831_vm1, %v10526_v39  ;;  %7951 = vmatprep.subr.mxu1 %v9528_v0 }
0x1ef3   : > { %7953 = vmatprep.mubr.msk.f32.mxu1 %vm9529_vm0, %v9528_v0 }
0x1faa   : > { %v4793_v45 = vpop.f32.mrf.mxu1  ;;  %v4943_v46 = vpop.f32.mrf.mxu0 }
0x1fab   : > { %4948 = vrot.lane.b32.xlu0 %v4793_v45, %s10929_s19  ;;  %7962 = vmatpush3.msra.mxu0 %v4943_v46 }
0x1fac   : > { %v7928_v47 = vpop.f32.mrf.mxu1  ;;  %v7950_v48 = vpop.f32.mrf.mxu0  ;;  %7971 = vmatprep.subr.mxu0 %v9528_v0 }
0x1fad   : > { %v7377_v47 = vld [vmem:[%s10933_s26 + $0x78] sm:$0xff]  ;;  %v7376_v48 = vld [vmem:[%s10933_s26 + $0x70] sm:$0xff] }
0x1fb2   : > { %v4868_v49 = vpop.f32.mrf.mxu1 }
0x1fb3   : > { %4951 = vrot.lane.b32.xlu1 %v4868_v49, %s10929_s19  ;;  %7952 = vmatpush3.xpose.msk.msra.mxu1 %vm2145_vm2, %v4868_v49  ;;  %v7375_v49 = vld [vmem:[%s10933_s26 + $0x68] sm:$0xff] }
0x1fb4   : > { %v7939_v50 = vpop.f32.mrf.mxu1  ;;  %7956 = vmatprep.subr.mxu1 %v9528_v0 }
0x1fb5   : > { %v7374_v50 = vld [vmem:[%s10933_s26 + $0x60] sm:$0xff] }
0x1fb6   : > { %7954 = vmatmul.mubr.msk.f32.vlgmr.msra.gmra.mxu1 %vm2145_vm2, %v4793_v45  ;;  %v7365_v45 = vld [vmem:[%s10932_s3 + $0x28] sm:$0xff] }
0x1fb7   : > { %7958 = vmatprep.mubr.msk.f32.mxu1 %vm9529_vm0, %v9528_v0 }
0x201d   : > { %v4949_v52 = vpop.permute.xlu0 %4948 }
0x2025   : > { %v4952_v51 = vpop.permute.xlu1 %4951 }
0x2026   : > { %7957 = vmatpush3.xpose.msk.msra.mxu1 %vm2145_vm2, %v4952_v51  ;;  %v7373_v51 = vld [vmem:[%s10933_s26 + $0x58] sm:$0xff] }
0x2027   : > { %7966 = vmatprep.subr.mxu1 %v9528_v0 }
0x2029   : > { %7959 = vmatmul.mubr.msk.f32.vlgmr.msra.gmra.mxu1 %vm2145_vm2, %v4949_v52 }
0x202a   : > { %7968 = vmatprep.mubr.msk.f32.mxu1 %vm9529_vm0, %v9528_v0 }
0x2076   : > { %v5027_v53 = vpop.f32.mrf.mxu1 }
0x2077   : > { %v5105_v54 = vmul.f32 0.25, %v5027_v53 }
0x2078   : > { %v7955_v55 = vpop.f32.mrf.mxu1 }
0x2079   : > { %v5107_v56 = vsel %vm2300_vm4, %v5105_v54, -inf }
0x207a   : > { %5108 = vmax.xlane.f32.xlu0 %v5107_v56 }
0x2090   : > { %4954 = vrot.lane.b32.xlu0 %v4943_v46, %s10929_s19  ;;  %v7364_v46 = vld [vmem:[%s10932_s3 + $0x20] sm:$0xff] }
0x20e9   : > { %v5101_v57 = vpop.f32.mrf.mxu1 }
0x20ea   : > { %v5106_v58 = vmul.f32 0.25, %v5101_v57 }
0x20eb   : > { %v7960_v59 = vpop.f32.mrf.mxu1 }
0x20ec   : > { %v5110_v8 = vsel %vm2300_vm4, %v5106_v58, -inf  ;;  %v3677_v59 = vstv %s10475_s9  ;;  %s7396_s9 = sshll.u32 %s9798_s11, 4 }
0x20ed   : > { %5111 = vmax.xlane.f32.xlu1 %v5110_v8  ;;  %v3678_v8 = vmul.f32 0.00390625, %v3677_v59  ;;  %s6746_s2 = scalar_lea.hbm %s9772_s30, %s7396_s9 }
0x2103   : > { %v5109_v60 = vpop.xlane.xlu0 %5108 }
0x2104   : > { %v5113_v1 = vsub.f32 %v5105_v54, %v5109_v60 }
0x2106   : > { %v5115_v4 = vmul.f32 1.442695, %v5113_v1  ;;  %v3679_v1 = vadd.f32 1e-05, %v3678_v8 }
0x2107   : > { %v4955_v62 = vpop.permute.xlu0 %4954 }
0x2108   : > { %7967 = vmatpush3.msra.mxu1 %v4955_v62 }
0x2109   : > { %7982 = vmatprep.subr.mxu1 %v9528_v0 }
0x2176   : > { %v5112_v2 = vpop.xlane.xlu1 %5111 }
0x2177   : > { %v5114_v3 = vsub.f32 %v5106_v58, %v5112_v2 }
0x2179   : > { %v5117_v5 = vmul.f32 1.442695, %v5114_v3 }
0x217b   : > { %8489 = vpow2.f32 %v5117_v5 }
0x217c   : > { %8491 = vpow2.f32 %v5115_v4  ;;  %v5360_v4 = vld [vmem:[#allocation26 + $0x8] sm:$0xff] }
0x2188   : > { %v8490_v6 = vpop.eup %8489 }
0x2189   : > { %v5122_v7 = vsel %vm2300_vm4, %v8490_v6, 0.0  ;;  %v8492_v9 = vpop.eup %8491 }
0x218a   : > { %5123 = vadd.xlane.f32.xlu1 %v5122_v7  ;;  %v5119_v10 = vsel %vm2300_vm4, %v8492_v9, 0.0  ;;  %v5362_v7 = vld [vmem:[#allocation28 + $0x8] sm:$0xff] }
0x218e   : > { %5120 = vadd.xlane.f32.xlu1 %v5119_v10 }
0x2213   : > { %v5124_v11 = vpop.xlane.xlu1 %5123 }
0x2214   : > { %8493 = vrcp.f32 %v5124_v11 }
0x2217   : > { %v5121_v43 = vpop.xlane.xlu1 %5120 }
0x2218   : > { %8495 = vrcp.f32 %v5121_v43  ;;  %v5610_v43 = vld [vmem:[#allocation34 + $0x18] sm:$0xff] }
0x2221   : > { %v8494_v12 = vpop.eup %8493 }
0x2222   : > { %v5128_v13 = vmul.f32 %v8494_v12, %v8490_v6  ;;  %v3650_v12 = vld [vmem:[#allocation16 + $0x8] sm:$0xff] }
0x2224   : > { %7969 = vmatmul.mubr.msk.f32.vlgmr.msra.gmra.mxu1 %vm2300_vm4, %v5128_v13  ;;  %v5609_v13 = vld [vmem:[#allocation34 + $0x10] sm:$0xff] }
0x2225   : > { %v8496_v14 = vpop.eup %8495  ;;  %7990 = vmatprep.mubr.msk.f32.mxu1 %vm9529_vm0, %v9528_v0  ;;  %7983 = vmatpush3.msra.mxu1 %v7367_v44 }
0x2226   : > { %v5127_v15 = vmul.f32 %v8496_v14, %v8492_v9  ;;  %7984 = vmatprep.subr.mxu1 %v9528_v0  ;;  %v5608_v14 = vld [vmem:[#allocation34 + $0x8] sm:$0xff] }
0x2227   : > { %7985 = vmatpush3.msra.mxu1 %v7366_v42 }
0x2228   : > { %7964 = vmatmul.mubr.msk.f32.vlgmr.msra.gmra.mxu0 %vm2300_vm4, %v5127_v15  ;;  %7986 = vmatprep.subr.mxu1 %v9528_v0 }
0x2229   : > { %7979 = vmatprep.mubr.msk.f32.mxu0 %vm9529_vm0, %v9528_v0  ;;  %7972 = vmatpush3.msra.mxu0 %v7362_v16  ;;  %v3652_v16 = vld [vmem:[#allocation17 + $0x8] sm:$0xff] }
0x222a   : > { %7973 = vmatprep.subr.mxu0 %v9528_v0  ;;  %7987 = vmatpush3.msra.mxu1 %v7365_v45 }
0x222b   : > { %7974 = vmatpush3.msra.mxu0 %v7361_v17  ;;  %7988 = vmatprep.subr.mxu1 %v9528_v0 }
0x222c   : > { %7975 = vmatprep.subr.mxu0 %v9528_v0  ;;  %7989 = vmatpush3.msra.mxu1 %v7364_v46 }
0x222d   : > { %7976 = vmatpush3.msra.mxu0 %v7360_v18  ;;  %8012 = vmatprep.subr.mxu1 %v9528_v0  ;;  %v7372_v18 = vld [vmem:[%s10933_s26 + $0x50] sm:$0xff] }
0x222e   : > { %7977 = vmatprep.subr.mxu0 %v9528_v0 }
0x222f   : > { %7978 = vmatpush3.msra.mxu0 %v7359_v61  ;;  %v7371_v61 = vld [vmem:[%s10933_s26 + $0x48] sm:$0xff] }
0x2230   : > { %7993 = vmatprep.subr.mxu0 %v9528_v0 }
0x22e4   : > { %v5271_v19 = vpop.f32.mrf.mxu1 }
0x22e5   : > { %5276 = vrot.lane.b32.xlu1 %v5271_v19, %s10931_s10  ;;  %v7370_v19 = vld [vmem:[%s10933_s26 + $0x40] sm:$0xff] }
0x22e6   : > { %v7970_v20 = vpop.f32.mrf.mxu1 }
0x22e7   : > { %v7368_v20 = vld [vmem:[#allocation23 + $0x1] ss:$0 sm:$0xff] }
0x22e8   : > { %v5198_v22 = vpop.f32.mrf.mxu0 }
0x22ea   : > { %v7965_v23 = vpop.f32.mrf.mxu0 }
0x2357   : > { %v5277_v24 = vpop.permute.xlu1 %5276 }
0x2358   : > { %v5279_v25 = vsel %vm2145_vm2, %v5198_v22, %v5277_v24 }
0x2359   : > { %7980 = vmatmul.mubr.msk.f32.vlgmr.msra.gmra.mxu0 %vm1831_vm1, %v5279_v25 }
0x235a   : > { %8009 = vmatprep.mubr.msk.f32.mxu0 %vm9529_vm0, %v9528_v0  ;;  %7994 = vmatpush3.msra.mxu0 %v7377_v47  ;;  %v7380_v47 = vld [vmem:[#allocation35] ss:$0 sm:$0xff] }
0x235b   : > { %7995 = vmatprep.subr.mxu0 %v9528_v0 }
0x235c   : > { %7996 = vmatpush3.msra.mxu0 %v7376_v48 }
0x235d   : > { %7997 = vmatprep.subr.mxu0 %v9528_v0 }
0x235e   : > { %7998 = vmatpush3.msra.mxu0 %v7375_v49  ;;  %v5694_v49 = vld [vmem:[#allocation37 + $0x18] sm:$0xff] }
0x235f   : > { %7999 = vmatprep.subr.mxu0 %v9528_v0 }
0x2360   : > { %8000 = vmatpush3.msra.mxu0 %v7374_v50  ;;  %v5778_v50 = vld [vmem:[#allocation40 + $0x18] sm:$0xff] }
0x2361   : > { %8001 = vmatprep.subr.mxu0 %v9528_v0 }
0x2362   : > { %8002 = vmatpush3.msra.mxu0 %v7373_v51  ;;  %v5693_v51 = vld [vmem:[#allocation37 + $0x10] sm:$0xff] }
0x2363   : > { %8003 = vmatprep.subr.mxu0 %v9528_v0 }
0x2364   : > { %8004 = vmatpush3.msra.mxu0 %v7372_v18 }
0x2365   : > { %8005 = vmatprep.subr.mxu0 %v9528_v0 }
0x2366   : > { %8006 = vmatpush3.msra.mxu0 %v7371_v61 }
0x2367   : > { %8007 = vmatprep.subr.mxu0 %v9528_v0 }
0x2368   : > { %8008 = vmatpush3.msra.mxu0 %v7370_v19 }
0x2369   : > { %8034 = vmatprep.subr.mxu0 %v9528_v0 }
0x2419   : > { %v5354_v21 = vpop.f32.mrf.mxu0 }
0x241a   : > { %v5358_v26 = vadd.f32 %v5354_v21, %v10526_v39 }
0x241b   : > { %v7981_v27 = vpop.f32.mrf.mxu0 }
0x241c   : > { %v5363_v28 = vsel %vm1831_vm1, %v5358_v26, 0.0  ;;  %v7378_v27 = vld [vmem:[#allocation25 + $0x1] ss:$0 sm:$0xff] }
0x241d   : > { %5364 = vadd.xlane.f32.xlu0 %v5363_v28 }
0x24a6   : > { %v5365_v29 = vpop.xlane.xlu0 %5364 }
0x24a7   : > { %v5366_v30 = vrot.slane %v5365_v29, 4 }
0x24a9   : > { %v5367_v31 = vadd.f32 %v5366_v30, %v5365_v29 }
0x24ab   : > { %v5368_v32 = vrot.slane %v5367_v31, 2 }
0x24ad   : > { %v5369_v33 = vadd.f32 %v5368_v32, %v5367_v31 }
0x24af   : > { %v5370_v34 = vrot.slane %v5369_v33, 1 }
0x24b1   : > { %v5371_v35 = vadd.f32 %v5370_v34, %v5369_v33 }
0x24b3   : > { %8119 = vpush %v5371_v35 }
0x24e4   : > { %s8120_s28 = spop %8119 }
0x24e5   : > { %v5373_v37 = vstv %s8120_s28  ;;  %s9311_s28 = scalar_lea.vmem %s6749_s4, 16 }
0x24e6   : > { %v5374_v38 = vmul.f32 0.00390625, %v5373_v37  ;;  %p9312_p6 = scmp.ne.s32.totalorder %s6749_s4, %s9311_s28 }
0x24e8   : > { %v5375_v39 = vsub.f32 %v5358_v26, %v5374_v38  ;;  %p9313_p3 = pnand %p9312_p6, %p10935_p0 }
0x24ea   : > { %v5376_v40 = vmul.f32 %v5375_v39, %v5375_v39  ;;  %p9314_p4 = pneg %p9313_p3 }
0x24ec   : > { %v5377_v41 = vsel %vm1831_vm1, %v5376_v40, 0.0 }
0x24ed   : > { %5378 = vadd.xlane.f32.xlu1 %v5377_v41 }
0x2576   : > { %v5379_v52 = vpop.xlane.xlu1 %5378 }
0x2577   : > { %v5380_v53 = vrot.slane %v5379_v52, 4 }
0x2579   : > { %v5381_v54 = vadd.f32 %v5380_v53, %v5379_v52  ;;  %v5777_v52 = vld [vmem:[#allocation40 + $0x10] sm:$0xff]  ;;  %v5692_v53 = vld [vmem:[#allocation37 + $0x8] sm:$0xff] }
0x257b   : > { %v5382_v55 = vrot.slane %v5381_v54, 2 }
0x257d   : > { %v5383_v56 = vadd.f32 %v5382_v55, %v5381_v54  ;;  %v5776_v54 = vld [vmem:[#allocation40 + $0x8] sm:$0xff]  ;;  %v5691_v55 = vld [vmem:[#allocation37] sm:$0xff] }
0x257f   : > { %v5384_v57 = vrot.slane %v5383_v56, 1 }
0x2581   : > { %v5385_v58 = vadd.f32 %v5384_v57, %v5383_v56  ;;  %v5775_v56 = vld [vmem:[#allocation40] sm:$0xff] }
0x2583   : > { %8121 = vpush %v5385_v58 }
0x25b4   : > { %s8122_s16 = spop %8121 }
0x25b5   : > { %v5387_v60 = vstv %s8122_s16  ;;  %s9532_s16 = smov [#allocation55]  }
0x25b6   : > { %v5388_v62 = vmul.f32 0.00390625, %v5387_v60 }
0x25b8   : > { %v5389_v2 = vadd.f32 1e-05, %v5388_v62 }
0x25ba   : > { %8497 = vrsqrt.f32 %v5389_v2 }
0x25bb   : > { %8499 = vrsqrt.f32 %v3679_v1 }
0x25c7   : > { %v8498_v3 = vpop.eup %8497 }
0x25c8   : > { %v5391_v5 = vmul.f32 %v8498_v3, %v5375_v39  ;;  %v8500_v6 = vpop.eup %8499 }
0x25c9   : > { %v3681_v10 = vmul.f32 %v8500_v6, %v10468_v63  ;;  %v5607_v63 = vld [vmem:[#allocation34] sm:$0xff] }
0x25ca   : > { %v5392_v9 = vmul.f32 %v5391_v5, %v5360_v4  ;;  %v5573_v6 = vld [vmem:[#allocation29 + $0x8] sm:$0xff] }
0x25cb   : > { %v3682_v15 = vmul.f32 %v3681_v10, %v3650_v12  ;;  %v7384_v12 = vld [vmem:[#allocation41] ss:$0 sm:$0xff] }
0x25cc   : > { %v5393_v11 = vadd.f32 %v5392_v9, %v5362_v7  ;;  %v5575_v9 = vld [vmem:[#allocation31 + $0x8] sm:$0xff] }
0x25cd   : > { %v3683_v17 = vadd.f32 %v3682_v15, %v3652_v16 }
0x25ce   : > { %7991 = vmatmul.mubr.msk.f32.vlgmr.msra.gmra.mxu1 %vm1831_vm1, %v5393_v11 }
0x25cf   : > { %8013 = vmatpush3.msra.mxu1 %v5610_v43  ;;  %8020 = vmatprep.mubr.msk.f32.mxu1 %vm9529_vm0, %v9528_v0  ;;  %v7382_v43 = vld [vmem:[#allocation38] ss:$0 sm:$0xff] }
0x25d0   : > { %8014 = vmatprep.subr.mxu1 %v9528_v0 }
0x25d1   : > { %8015 = vmatpush3.msra.mxu1 %v5609_v13 }
0x25d2   : > { %8016 = vmatprep.subr.mxu1 %v9528_v0 }
0x25d3   : > { %8017 = vmatpush3.msra.mxu1 %v5608_v14 }
0x25d4   : > { %8018 = vmatprep.subr.mxu1 %v9528_v0 }
0x25d5   : > { %8019 = vmatpush3.msra.mxu1 %v5607_v63 }
0x25d6   : > { %8021 = vmatmul.mubr.msk.f32.vlgmr.msra.gmra.mxu1 %vm1831_vm1, %v3683_v17  ;;  %8023 = vmatprep.subr.mxu1 %v9528_v0 }
0x25d7   : > { %8031 = vmatprep.mubr.msk.f32.mxu1 %vm9529_vm0, %v9528_v0  ;;  %8024 = vmatpush3.msra.mxu1 %v5694_v49 }
0x25d8   : > { %8025 = vmatprep.subr.mxu1 %v9528_v0 }
0x25d9   : > { %8026 = vmatpush3.msra.mxu1 %v5693_v51 }
0x25da   : > { %8027 = vmatprep.subr.mxu1 %v9528_v0 }
0x25db   : > { %8028 = vmatpush3.msra.mxu1 %v5692_v53 }
0x25dc   : > { %8029 = vmatprep.subr.mxu1 %v9528_v0 }
0x25dd   : > { %8030 = vmatpush3.msra.mxu1 %v5691_v55 }
0x25de   : > { %8045 = vmatprep.subr.mxu1 %v9528_v0 }
0x268e   : > { %v5476_v22 = vpop.f32.mrf.mxu1 }
0x268f   : > { %v5477_v23 = vadd.f32 %v7368_v20, %v5476_v22 }
0x2690   : > { %v7992_v24 = vpop.f32.mrf.mxu1 }
0x2691   : > { %v5480_v25 = vmax.f32 %v5477_v23, 0.0 }
0x2693   : > { %8010 = vmatmul.mubr.msk.f32.vlgmr.msra.gmra.mxu0 %vm2686_vm5, %v5480_v25 }
0x2694   : > { %8042 = vmatprep.mubr.msk.f32.mxu0 %vm9529_vm0, %v9528_v0  ;;  %8035 = vmatpush3.msra.mxu0 %v5778_v50 }
0x2695   : > { %8036 = vmatprep.subr.mxu0 %v9528_v0 }
0x2696   : > { %v5687_v21 = vpop.f32.mrf.mxu1  ;;  %8037 = vmatpush3.msra.mxu0 %v5777_v52 }
0x2697   : > { %v10630_v48 = vadd.f32 %v7380_v47, %v5687_v21  ;;  %8038 = vmatprep.subr.mxu0 %v9528_v0 }
0x2698   : > { %v8022_v26 = vpop.f32.mrf.mxu1  ;;  %8039 = vmatpush3.msra.mxu0 %v5776_v54 }
0x2699   : > { %8040 = vmatprep.subr.mxu0 %v9528_v0 }
0x269a   : > { %8041 = vmatpush3.msra.mxu0 %v5775_v56 }
0x269b   : > { %8055 = vmatprep.subr.mxu0 %v9528_v0 }
0x2753   : > { %v5567_v28 = vpop.f32.mrf.mxu0 }
0x2754   : > { %v5568_v29 = vadd.f32 %v7378_v27, %v5567_v28 }
0x2755   : > { %v8011_v30 = vpop.f32.mrf.mxu0 }
0x2756   : > { %v5571_v31 = vadd.f32 %v5568_v29, %v5393_v11 }
0x2758   : > { %v5576_v32 = vsel %vm1831_vm1, %v5571_v31, 0.0 }
0x2759   : > { %5577 = vadd.xlane.f32.xlu0 %v5576_v32 }
0x27e2   : > { %v5578_v33 = vpop.xlane.xlu0 %5577 }
0x27e3   : > { %v5579_v34 = vrot.slane %v5578_v33, 4 }
0x27e5   : > { %v5580_v35 = vadd.f32 %v5579_v34, %v5578_v33 }
0x27e7   : > { %v5581_v37 = vrot.slane %v5580_v35, 2 }
0x27e9   : > { %v5582_v38 = vadd.f32 %v5581_v37, %v5580_v35 }
0x27eb   : > { %v5583_v39 = vrot.slane %v5582_v38, 1 }
0x27ed   : > { %v5584_v40 = vadd.f32 %v5583_v39, %v5582_v38 }
0x27ef   : > { %8123 = vpush %v5584_v40 }
0x2820   : > { %s8124_s18 = spop %8123 }
0x2821   : > { %v5586_v41 = vstv %s8124_s18  ;;  %s9315_s18 = sshll.u32 %s9532_s16, 4  ;;  %s9316_s18 = int_to_ptr.vmem [resolvable:$false] %s9315_s18 }
0x2822   : > { %v5587_v44 = vmul.f32 0.00390625, %v5586_v41  ;;  %p9318_p7 = scmp.lt.s32.totalorder %s6749_s4, %s9316_s18 }
0x2824   : > { %v5588_v42 = vsub.f32 %v5571_v31, %v5587_v44 }
0x2826   : > { %v5589_v45 = vmul.f32 %v5588_v42, %v5588_v42 }
0x2828   : > { %v5590_v46 = vsel %vm1831_vm1, %v5589_v45, 0.0 }
0x2829   : > { %5591 = vadd.xlane.f32.xlu0 %v5590_v46 }
0x283f   : > { %5857 = vrot.lane.b32.xlu0 %v10630_v48, %s10929_s19 }
0x28b2   : > { %v5592_v57 = vpop.xlane.xlu0 %5591 }
0x28b3   : > { %v5593_v58 = vrot.slane %v5592_v57, 4 }
0x28b5   : > { %v5594_v59 = vadd.f32 %v5593_v58, %v5592_v57 }
0x28b6   : > { %v5858_v61 = vpop.permute.xlu0 %5857 }
0x28b7   : > { %v5595_v8 = vrot.slane %v5594_v59, 2 }
0x28b9   : > { %v5596_v60 = vadd.f32 %v5595_v8, %v5594_v59 }
0x28bb   : > { %v5597_v62 = vrot.slane %v5596_v60, 1 }
0x28bd   : > { %v5598_v1 = vadd.f32 %v5597_v62, %v5596_v60 }
0x28bf   : > { %8125 = vpush %v5598_v1 }
0x28f0   : > { %s8126_s5 = spop %8125 }
0x28f1   : > { %v5600_v2 = vstv %s8126_s5  ;;  %s9317_s5 = scalar_lea.vmem %s9316_s18, 32 }
0x28f2   : > { %v5601_v3 = vmul.f32 0.00390625, %v5600_v2  ;;  %p9319_p8 = scmp.lt.s32.totalorder %s9317_s5, %s9311_s28 }
0x28f4   : > { %v5602_v4 = vadd.f32 1e-05, %v5601_v3  ;;  %p9320_p9 = por %p9319_p8, %p9318_p7 }
0x28f6   : > { %8501 = vrsqrt.f32 %v5602_v4  ;;  %v6226_v4 = vld [vmem:[#allocation43 + $0x18] sm:$0xff]  ;;  %p9321_p2 = pnand %p9320_p9, %p9314_p4 }
0x2903   : > { %v8502_v5 = vpop.eup %8501 }
0x2904   : > { %v5604_v7 = vmul.f32 %v8502_v5, %v5588_v42  ;;  %v6225_v5 = vld [vmem:[#allocation43 + $0x10] sm:$0xff] }
0x2906   : > { %v5605_v10 = vmul.f32 %v5604_v7, %v5573_v6  ;;  %v6224_v6 = vld [vmem:[#allocation43 + $0x8] sm:$0xff]  ;;  %v6223_v7 = vld [vmem:[#allocation43] sm:$0xff] }
0x2908   : > { %v5606_v11 = vadd.f32 %v5605_v10, %v5575_v9  ;;  %v6315_v9 = vld [vmem:[%s10934_s13 + $0x38] sm:$0xff]  ;;  %v6314_v10 = vld [vmem:[%s10934_s13 + $0x30] sm:$0xff] }
0x290a   : > { %8032 = vmatmul.mubr.msk.f32.vlgmr.msra.gmra.mxu1 %vm1831_vm1, %v5606_v11  ;;  %8043 = vmatmul.mubr.msk.f32.vlgmr.msra.gmra.mxu0 %vm1831_vm1, %v5606_v11  ;;  %v6313_v11 = vld [vmem:[%s10934_s13 + $0x28] sm:$0xff] }
0x290b   : > { %8047 = vmatprep.mubr.msk.f32.mxu1 %vm9529_vm0, %v9528_v0  ;;  %8057 = vmatprep.mubr.msk.f32.mxu0 %vm9529_vm0, %v9528_v0 }
0x29ca   : > { %v5771_v13 = vpop.f32.mrf.mxu1  ;;  %v5852_v14 = vpop.f32.mrf.mxu0 }
0x29cb   : > { %v5772_v15 = vadd.f32 %v7382_v43, %v5771_v13  ;;  %v5853_v16 = vadd.f32 %v7384_v12, %v5852_v14  ;;  %v6312_v43 = vld [vmem:[%s10934_s13 + $0x20] sm:$0xff]  ;;  %v6311_v12 = vld [vmem:[%s10934_s13 + $0x18] sm:$0xff] }
0x29cc   : > { %v8033_v63 = vpop.f32.mrf.mxu1  ;;  %v8044_v17 = vpop.f32.mrf.mxu0 }
0x29cd   : > { %5860 = vrot.lane.b32.xlu1 %v5772_v15, %s10929_s19  ;;  %8046 = vmatpush3.xpose.msk.msra.mxu1 %vm2145_vm2, %v5772_v15 }
0x29ce   : > { %8056 = vmatpush3.msra.mxu0 %v5853_v16  ;;  %8050 = vmatprep.subr.mxu1 %v9528_v0 }
0x29cf   : > { %8065 = vmatprep.subr.mxu0 %v9528_v0 }
0x29d0   : > { %8048 = vmatmul.mubr.msk.f32.vlgmr.msra.gmra.mxu1 %vm2145_vm2, %v10630_v48 }
0x29d1   : > { %8052 = vmatprep.mubr.msk.f32.mxu1 %vm9529_vm0, %v9528_v0 }
0x2a3f   : > { %v5861_v18 = vpop.permute.xlu1 %5860 }
0x2a40   : > { %8051 = vmatpush3.xpose.msk.msra.mxu1 %vm2145_vm2, %v5861_v18 }
0x2a41   : > { %8060 = vmatprep.subr.mxu1 %v9528_v0 }
0x2a43   : > { %8053 = vmatmul.mubr.msk.f32.vlgmr.msra.gmra.mxu1 %vm2145_vm2, %v5858_v61 }
0x2a44   : > { %8062 = vmatprep.mubr.msk.f32.mxu1 %vm9529_vm0, %v9528_v0 }
0x2a90   : > { %v5936_v19 = vpop.f32.mrf.mxu1 }
0x2a91   : > { %v6014_v20 = vmul.f32 5.656854, %v5936_v19 }
0x2a92   : > { %v8049_v22 = vpop.f32.mrf.mxu1 }
0x2a93   : > { %v6016_v23 = vsel %vm2300_vm4, %v6014_v20, -inf }
0x2a94   : > { %6017 = vmax.xlane.f32.xlu0 %v6016_v23  ;;  %v6190_v23 = vld [vmem:[#allocation47] sm:$0xff] }
0x2aaa   : > { %5863 = vrot.lane.b32.xlu0 %v5853_v16, %s10929_s19 }
0x2b03   : > { %v6010_v24 = vpop.f32.mrf.mxu1 }
0x2b04   : > { %v6015_v25 = vmul.f32 5.656854, %v6010_v24 }
0x2b05   : > { %v8054_v21 = vpop.f32.mrf.mxu1 }
0x2b06   : > { %v6019_v26 = vsel %vm2300_vm4, %v6015_v25, -inf }
0x2b07   : > { %6020 = vmax.xlane.f32.xlu1 %v6019_v26 }
0x2b1d   : > { %v6018_v27 = vpop.xlane.xlu0 %6017 }
0x2b1e   : > { %v6022_v29 = vsub.f32 %v6014_v20, %v6018_v27  ;;  %v6310_v27 = vld [vmem:[%s10934_s13 + $0x10] sm:$0xff] }
0x2b20   : > { %v6024_v32 = vmul.f32 1.442695, %v6022_v29  ;;  %v6308_v29 = vld [vmem:[%s10934_s13] sm:$0xff] }
0x2b21   : > { %v5864_v28 = vpop.permute.xlu0 %5863 }
0x2b22   : > { %8061 = vmatpush3.msra.mxu1 %v5864_v28  ;;  %v6309_v28 = vld [vmem:[%s10934_s13 + $0x8] sm:$0xff] }
0x2b23   : > { %8076 = vmatprep.subr.mxu1 %v9528_v0 }
0x2b90   : > { %v6021_v30 = vpop.xlane.xlu1 %6020 }
0x2b91   : > { %v6023_v31 = vsub.f32 %v6015_v25, %v6021_v30  ;;  %v6191_v25 = vld [vmem:[#allocation49] sm:$0xff]  ;;  %v7392_v30 = vld [vmem:[#allocation44] ss:$0 sm:$0xff] }
0x2b93   : > { %v6026_v33 = vmul.f32 1.442695, %v6023_v31 }
0x2b95   : > { %8503 = vpow2.f32 %v6026_v33 }
0x2b96   : > { %8505 = vpow2.f32 %v6024_v32 }
0x2ba2   : > { %v8504_v34 = vpop.eup %8503 }
0x2ba3   : > { %v6031_v35 = vsel %vm2300_vm4, %v8504_v34, 0.0  ;;  %v8506_v37 = vpop.eup %8505 }
0x2ba4   : > { %6032 = vadd.xlane.f32.xlu1 %v6031_v35  ;;  %v6028_v38 = vsel %vm2300_vm4, %v8506_v37, 0.0  ;;  %v7394_v35 = vld [vmem:[#allocation46] ss:$0 sm:$0xff] }
0x2ba8   : > { %6029 = vadd.xlane.f32.xlu1 %v6028_v38 }
0x2c2d   : > { %v6033_v39 = vpop.xlane.xlu1 %6032 }
0x2c2e   : > { %8507 = vrcp.f32 %v6033_v39 }
0x2c31   : > { %v6030_v40 = vpop.xlane.xlu1 %6029 }
0x2c32   : > { %8509 = vrcp.f32 %v6030_v40 }
0x2c3b   : > { %v8508_v41 = vpop.eup %8507 }
0x2c3c   : > { %v6037_v44 = vmul.f32 %v8508_v41, %v8504_v34 }
0x2c3e   : > { %8063 = vmatmul.mubr.msk.f32.vlgmr.msra.gmra.mxu1 %vm2300_vm4, %v6037_v44 }
0x2c3f   : > { %v8510_v42 = vpop.eup %8509  ;;  %8092 = vmatprep.mubr.msk.f32.mxu1 %vm9529_vm0, %v9528_v0  ;;  %8077 = vmatpush3.msra.mxu1 %v6315_v9 }
0x2c40   : > { %v6036_v45 = vmul.f32 %v8510_v42, %v8506_v37  ;;  %8078 = vmatprep.subr.mxu1 %v9528_v0 }
0x2c41   : > { %8079 = vmatpush3.msra.mxu1 %v6314_v10 }
0x2c42   : > { %8058 = vmatmul.mubr.msk.f32.vlgmr.msra.gmra.mxu0 %vm2300_vm4, %v6036_v45  ;;  %8080 = vmatprep.subr.mxu1 %v9528_v0 }
0x2c43   : > { %8073 = vmatprep.mubr.msk.f32.mxu0 %vm9529_vm0, %v9528_v0  ;;  %8066 = vmatpush3.msra.mxu0 %v6226_v4  ;;  %v6397_v4 = vld [vmem:[#allocation50] sm:$0xff] }
0x2c44   : > { %8067 = vmatprep.subr.mxu0 %v9528_v0  ;;  %8081 = vmatpush3.msra.mxu1 %v6313_v11 }
0x2c45   : > { %8068 = vmatpush3.msra.mxu0 %v6225_v5  ;;  %8082 = vmatprep.subr.mxu1 %v9528_v0 }
0x2c46   : > { %8069 = vmatprep.subr.mxu0 %v9528_v0  ;;  %8083 = vmatpush3.msra.mxu1 %v6312_v43 }
0x2c47   : > { %8070 = vmatpush3.msra.mxu0 %v6224_v6  ;;  %8084 = vmatprep.subr.mxu1 %v9528_v0  ;;  %v6398_v6 = vld [vmem:[#allocation52] sm:$0xff] }
0x2c48   : > { %8071 = vmatprep.subr.mxu0 %v9528_v0  ;;  %8085 = vmatpush3.msra.mxu1 %v6311_v12 }
0x2c49   : > { %8072 = vmatpush3.msra.mxu0 %v6223_v7  ;;  %8086 = vmatprep.subr.mxu1 %v9528_v0 }
0x2c4a   : > { %8087 = vmatpush3.msra.mxu1 %v6310_v27 }
0x2c4b   : > { %8088 = vmatprep.subr.mxu1 %v9528_v0 }
0x2c4c   : > { %8089 = vmatpush3.msra.mxu1 %v6309_v28 }
0x2c4d   : > { %8090 = vmatprep.subr.mxu1 %v9528_v0 }
0x2c4e   : > { %8091 = vmatpush3.msra.mxu1 %v6308_v29 }
0x2cfe   : > { %v6180_v46 = vpop.f32.mrf.mxu1 }
0x2cff   : > { %6185 = vrot.lane.b32.xlu1 %v6180_v46, %s10931_s10 }
0x2d00   : > { %v8064_v47 = vpop.f32.mrf.mxu1 }
0x2d02   : > { %v6107_v49 = vpop.f32.mrf.mxu0 }
0x2d04   : > { %v8059_v50 = vpop.f32.mrf.mxu0 }
0x2d71   : > { %v6186_v51 = vpop.permute.xlu1 %6185 }
0x2d72   : > { %v6188_v52 = vsel %vm2145_vm2, %v6107_v49, %v6186_v51 }
0x2d73   : > { %v6189_v53 = vadd.f32 %v6188_v52, %v10630_v48 }
0x2d75   : > { %v6192_v54 = vsel %vm1831_vm1, %v6189_v53, 0.0 }
0x2d76   : > { %6193 = vadd.xlane.f32.xlu0 %v6192_v54 }
0x2dff   : > { %v6194_v55 = vpop.xlane.xlu0 %6193 }
0x2e00   : > { %v6195_v56 = vrot.slane %v6194_v55, 4 }
0x2e02   : > { %v6196_v57 = vadd.f32 %v6195_v56, %v6194_v55 }
0x2e04   : > { %v6197_v58 = vrot.slane %v6196_v57, 2 }
0x2e06   : > { %v6198_v59 = vadd.f32 %v6197_v58, %v6196_v57 }
0x2e08   : > { %v6199_v8 = vrot.slane %v6198_v59, 1 }
0x2e0a   : > { %v6200_v60 = vadd.f32 %v6199_v8, %v6198_v59 }
0x2e0c   : > { %8127 = vpush %v6200_v60 }
0x2e3d   : > { %s8128_s8 = spop %8127 }
0x2e3e   : > { %v6202_v62 = vstv %s8128_s8 }
0x2e3f   : > { %v6203_v1 = vmul.f32 0.00390625, %v6202_v62 }
0x2e41   : > { %v6204_v2 = vsub.f32 %v6189_v53, %v6203_v1 }
0x2e43   : > { %v6205_v3 = vmul.f32 %v6204_v2, %v6204_v2 }
0x2e45   : > { %v6206_v48 = vsel %vm1831_vm1, %v6205_v3, 0.0  ;;  %v6431_v3 = vshrl.u32 %v1814_v36, 7 }
0x2e46   : > { %6207 = vadd.xlane.f32.xlu1 %v6206_v48 }
0x2e47   : > { %v6432_v9 = vsub.s32 0, %v6431_v3  ;;  %v6451_v43 = vsub.s32 1, %v6431_v3  ;;  %v6489_v36 = vsub.s32 3, %v6431_v3 }
0x2ecf   : > { %v6208_v13 = vpop.xlane.xlu1 %6207 }
0x2ed0   : > { %v6209_v14 = vrot.slane %v6208_v13, 4 }
0x2ed2   : > { %v6210_v15 = vadd.f32 %v6209_v14, %v6208_v13  ;;  %v6470_v13 = vsub.s32 2, %v6431_v3 }
0x2ed4   : > { %v6211_v16 = vrot.slane %v6210_v15, 2 }
0x2ed6   : > { %v6212_v63 = vadd.f32 %v6211_v16, %v6210_v15  ;;  %v6508_v16 = vsub.s32 4, %v6431_v3 }
0x2ed8   : > { %v6213_v17 = vrot.slane %v6212_v63, 1 }
0x2eda   : > { %v6214_v18 = vadd.f32 %v6213_v17, %v6212_v63  ;;  %v6527_v17 = vsub.s32 5, %v6431_v3 }
0x2edc   : > { %8129 = vpush %v6214_v18 }
0x2f0d   : > { %s8130_s20 = spop %8129 }
0x2f0e   : > { %v6216_v61 = vstv %s8130_s20 }
0x2f0f   : > { %v6217_v19 = vmul.f32 0.00390625, %v6216_v61  ;;  %v6546_v61 = vsub.s32 6, %v6431_v3 }
0x2f11   : > { %v6218_v20 = vadd.f32 1e-05, %v6217_v19 }
0x2f13   : > { %8511 = vrsqrt.f32 %v6218_v20  ;;  %v6565_v20 = vsub.s32 7, %v6431_v3 }
0x2f20   : > { %v8512_v22 = vpop.eup %8511 }
0x2f21   : > { %v6220_v24 = vmul.f32 %v8512_v22, %v6204_v2 }
0x2f23   : > { %v6221_v21 = vmul.f32 %v6220_v24, %v6190_v23 }
0x2f25   : > { %v6222_v26 = vadd.f32 %v6221_v21, %v6191_v25 }
0x2f27   : > { %8074 = vmatmul.mubr.msk.f32.vlgmr.msra.gmra.mxu0 %vm1831_vm1, %v6222_v26 }
0x2fe7   : > { %v6303_v31 = vpop.f32.mrf.mxu0 }
0x2fe8   : > { %v6304_v32 = vadd.f32 %v7392_v30, %v6303_v31 }
0x2fe9   : > { %v8075_v33 = vpop.f32.mrf.mxu0 }
0x2fea   : > { %v6307_v34 = vmax.f32 %v6304_v32, 0.0 }
0x2fec   : > { %8093 = vmatmul.mubr.msk.f32.vlgmr.msra.gmra.mxu1 %vm2686_vm5, %v6307_v34 }
0x30ac   : > { %v6392_v37 = vpop.f32.mrf.mxu1 }
0x30ad   : > { %v6393_v38 = vadd.f32 %v7394_v35, %v6392_v37 }
0x30ae   : > { %v8094_v39 = vpop.f32.mrf.mxu1 }
0x30af   : > { %v6396_v40 = vadd.f32 %v6393_v38, %v6222_v26 }
0x30b1   : > { %v6399_v41 = vsel %vm1831_vm1, %v6396_v40, 0.0 }
0x30b2   : > { %6400 = vadd.xlane.f32.xlu0 %v6399_v41  ;;  %v6583_v41 = vld [vmem:[%s9761_s1 + $0x8] sm:$0xff] }
0x313b   : > { %v6401_v44 = vpop.xlane.xlu0 %6400 }
0x313c   : > { %v6402_v42 = vrot.slane %v6401_v44, 4 }
0x313e   : > { %v6403_v45 = vadd.f32 %v6402_v42, %v6401_v44  ;;  %v6586_v44 = vld [vmem:[%s9761_s1 + $0x20] sm:$0xff]  ;;  %v6587_v42 = vld [vmem:[%s9761_s1 + $0x28] sm:$0xff] }
0x3140   : > { %v6404_v0 = vrot.slane %v6403_v45, 2 }
0x3142   : > { %v6405_v46 = vadd.f32 %v6404_v0, %v6403_v45  ;;  %v6588_v45 = vld [vmem:[%s9761_s1 + $0x30] sm:$0xff] }
0x3144   : > { %v6406_v47 = vrot.slane %v6405_v46, 1 }
0x3146   : > { %v6407_v49 = vadd.f32 %v6406_v47, %v6405_v46  ;;  %v6582_v47 = vld [vmem:[%s9761_s1] sm:$0xff] }
0x3148   : > { %8131 = vpush %v6407_v49  ;;  %v6584_v49 = vld [vmem:[%s9761_s1 + $0x10] sm:$0xff] }
0x3179   : > { %s8132_s19 = spop %8131 }
0x317a   : > { %v6409_v50 = vstv %s8132_s19 }
0x317b   : > { %v6410_v51 = vmul.f32 0.00390625, %v6409_v50  ;;  %v6590_v50 = vld [vmem:[%s9761_s1 + $0x40] sm:$0xff] }
0x317d   : > { %v6411_v52 = vsub.f32 %v6396_v40, %v6410_v51 }
0x317f   : > { %v6412_v53 = vmul.f32 %v6411_v52, %v6411_v52 }
0x3181   : > { %v6413_v54 = vsel %vm1831_vm1, %v6412_v53, 0.0  ;;  %v6591_v53 = vld [vmem:[%s9761_s1 + $0x48] sm:$0xff] }
0x3182   : > { %6414 = vadd.xlane.f32.xlu0 %v6413_v54 }
0x320b   : > { %v6415_v55 = vpop.xlane.xlu0 %6414 }
0x320c   : > { %v6416_v56 = vrot.slane %v6415_v55, 4 }
0x320e   : > { %v6417_v57 = vadd.f32 %v6416_v56, %v6415_v55 }
0x3210   : > { %v6418_v58 = vrot.slane %v6417_v57, 2 }
0x3212   : > { %v6419_v59 = vadd.f32 %v6418_v58, %v6417_v57 }
0x3214   : > { %v6420_v8 = vrot.slane %v6419_v59, 1 }
0x3216   : > { %v6421_v60 = vadd.f32 %v6420_v8, %v6419_v59  ;;  %v6595_v8 = vld [vmem:[%s9761_s1 + $0x68] sm:$0xff] }
0x3218   : > { %8133 = vpush %v6421_v60 }
0x3249   : > { %s8134_s10 = spop %8133 }
0x324a   : > { %v6423_v62 = vstv %s8134_s10 }
0x324b   : > { %v6424_v1 = vmul.f32 0.00390625, %v6423_v62 }
0x324d   : > { %v6425_v2 = vadd.f32 1e-05, %v6424_v1  ;;  %v6585_v1 = vld [vmem:[%s9761_s1 + $0x18] sm:$0xff] }
0x324f   : > { %8513 = vrsqrt.f32 %v6425_v2 }
0x325c   : > { %v8514_v48 = vpop.eup %8513 }
0x325d   : > { %v6427_v5 = vmul.f32 %v8514_v48, %v6411_v52  ;;  %v6592_v52 = vld [vmem:[%s9761_s1 + $0x50] sm:$0xff] }
0x325f   : > { %v6428_v7 = vmul.f32 %v6427_v5, %v6397_v4  ;;  %v6589_v4 = vld [vmem:[%s9761_s1 + $0x38] sm:$0xff]  ;;  %v6594_v5 = vld [vmem:[%s9761_s1 + $0x60] sm:$0xff] }
0x3261   : > { %v6429_v10 = vadd.f32 %v6428_v7, %v6398_v6 }
0x3263   : > { %v6433_v11 = vrot.slane %v6429_v10, %v6432_v9  ;;  %v6452_v12 = vrot.slane %v6429_v10, %v6451_v43  ;;  %v6471_v14 = vrot.slane %v6429_v10, %v6470_v13  ;;  %v6490_v15 = vrot.slane %v6429_v10, %v6489_v36  ;;  %v6599_v36 = vld [vmem:[%s9761_s1 + $0x88] sm:$0xff] }
0x3264   : > { %v6509_v63 = vrot.slane %v6429_v10, %v6508_v16  ;;  %v6528_v18 = vrot.slane %v6429_v10, %v6527_v17  ;;  %v6547_v19 = vrot.slane %v6429_v10, %v6546_v61  ;;  %v6566_v22 = vrot.slane %v6429_v10, %v6565_v20 }
0x3265   : > { %6439 = vbcast.lane.b32.xlu0 %v6433_v11, 264  ;;  %6435 = vbcast.lane.b32.xlu1 %v6433_v11, 256 }
0x3269   : > { %6443 = vbcast.lane.b32.xlu0 %v6433_v11, 272  ;;  %6454 = vbcast.lane.b32.xlu1 %v6452_v12, 256 }
0x326d   : > { %6473 = vbcast.lane.b32.xlu0 %v6471_v14, 256  ;;  %6458 = vbcast.lane.b32.xlu1 %v6452_v12, 264 }
0x3271   : > { %6447 = vbcast.lane.b32.xlu0 %v6433_v11, 280  ;;  %6462 = vbcast.lane.b32.xlu1 %v6452_v12, 272  ;;  %v6596_v11 = vld [vmem:[%s9761_s1 + $0x70] sm:$0xff] }
0x3275   : > { %6481 = vbcast.lane.b32.xlu0 %v6471_v14, 272  ;;  %6477 = vbcast.lane.b32.xlu1 %v6471_v14, 264 }
0x3279   : > { %6496 = vbcast.lane.b32.xlu0 %v6490_v15, 264  ;;  %6466 = vbcast.lane.b32.xlu1 %v6452_v12, 280 }
0x327d   : > { %6500 = vbcast.lane.b32.xlu0 %v6490_v15, 272  ;;  %6492 = vbcast.lane.b32.xlu1 %v6490_v15, 256 }
0x3281   : > { %6515 = vbcast.lane.b32.xlu0 %v6509_v63, 264  ;;  %6485 = vbcast.lane.b32.xlu1 %v6471_v14, 280 }
0x3285   : > { %6519 = vbcast.lane.b32.xlu0 %v6509_v63, 272  ;;  %6511 = vbcast.lane.b32.xlu1 %v6509_v63, 256 }
0x3289   : > { %6534 = vbcast.lane.b32.xlu0 %v6528_v18, 264  ;;  %6504 = vbcast.lane.b32.xlu1 %v6490_v15, 280  ;;  %v6598_v15 = vld [vmem:[%s9761_s1 + $0x80] sm:$0xff] }
0x328d   : > { %6538 = vbcast.lane.b32.xlu0 %v6528_v18, 272  ;;  %6530 = vbcast.lane.b32.xlu1 %v6528_v18, 256 }
0x3291   : > { %6553 = vbcast.lane.b32.xlu0 %v6547_v19, 264  ;;  %6523 = vbcast.lane.b32.xlu1 %v6509_v63, 280 }
0x3295   : > { %6557 = vbcast.lane.b32.xlu0 %v6547_v19, 272  ;;  %6549 = vbcast.lane.b32.xlu1 %v6547_v19, 256 }
0x3299   : > { %6572 = vbcast.lane.b32.xlu0 %v6566_v22, 264  ;;  %6542 = vbcast.lane.b32.xlu1 %v6528_v18, 280 }
0x329d   : > { %6576 = vbcast.lane.b32.xlu0 %v6566_v22, 272  ;;  %6568 = vbcast.lane.b32.xlu1 %v6566_v22, 256 }
0x32a1   : > { %6561 = vbcast.lane.b32.xlu1 %v6547_v19, 280 }
0x32a5   : > { %6580 = vbcast.lane.b32.xlu1 %v6566_v22, 280 }
0x32d7   : > { %v6440_v23 = vpop.permute.xlu0 %6439  ;;  %v6436_v24 = vpop.permute.xlu1 %6435 }
0x32d8   : > { %v6615_v51 = vmul.f32 %v6583_v41, %v6440_v23  ;;  %v6614_v57 = vmul.f32 %v6582_v47, %v6436_v24  ;;  %v6607_v41 = vld [vmem:[%s9761_s1 + $0xc8] sm:$0xff] }
0x32da   : > { %v6662_v48 = vsel %vm6646_vm13, %v6615_v51, 0.0  ;;  %v6647_v43 = vsel %vm6646_vm13, %v6614_v57, 0.0 }
0x32db   : > { %v6444_v25 = vpop.permute.xlu0 %6443  ;;  %v6455_v21 = vpop.permute.xlu1 %6454 }
0x32dc   : > { %v6618_v54 = vmul.f32 %v6586_v44, %v6455_v21  ;;  %v6616_v58 = vmul.f32 %v6584_v49, %v6444_v25  ;;  %v6603_v25 = vld [vmem:[%s9761_s1 + $0xa8] sm:$0xff]  ;;  %v6602_v21 = vld [vmem:[%s9761_s1 + $0xa0] sm:$0xff] }
0x32de   : > { %v6648_v6 = vsel %vm6646_vm13, %v6618_v54, 0.0  ;;  %v6677_v12 = vsel %vm6646_vm13, %v6616_v58, 0.0 }
0x32df   : > { %v6474_v26 = vpop.permute.xlu0 %6473  ;;  %v6459_v27 = vpop.permute.xlu1 %6458  ;;  %v6649_v20 = vadd.f32 %v6648_v6, %v6647_v43  ;;  %v6605_v43 = vld [vmem:[%s9761_s1 + $0xb8] sm:$0xff] }
0x32e0   : > { %v6619_v55 = vmul.f32 %v6587_v42, %v6459_v27  ;;  %v6622_v59 = vmul.f32 %v6590_v50, %v6474_v26  ;;  %v6606_v42 = vld [vmem:[%s9761_s1 + $0xc0] sm:$0xff]  ;;  %v6604_v50 = vld [vmem:[%s9761_s1 + $0xb0] sm:$0xff] }
0x32e2   : > { %v6663_v7 = vsel %vm6646_vm13, %v6619_v55, 0.0  ;;  %v6650_v13 = vsel %vm6646_vm13, %v6622_v59, 0.0  ;;  %v6611_v55 = vld [vmem:[%s9761_s1 + $0xe8] sm:$0xff] }
0x32e3   : > { %v6448_v28 = vpop.permute.xlu0 %6447  ;;  %v6463_v29 = vpop.permute.xlu1 %6462  ;;  %v6664_v22 = vadd.f32 %v6663_v7, %v6662_v48 }
0x32e4   : > { %v6620_v56 = vmul.f32 %v6588_v45, %v6463_v29  ;;  %v6617_v14 = vmul.f32 %v6585_v1, %v6448_v28  ;;  %v6593_v28 = vld [vmem:[%s9761_s1 + $0x58] sm:$0xff]  ;;  %v6600_v29 = vld [vmem:[%s9761_s1 + $0x90] sm:$0xff] }
0x32e6   : > { %v6678_v9 = vsel %vm6646_vm13, %v6620_v56, 0.0 }
0x32e7   : > { %v6482_v30 = vpop.permute.xlu0 %6481  ;;  %v6478_v31 = vpop.permute.xlu1 %6477  ;;  %v6679_v23 = vadd.f32 %v6678_v9, %v6677_v12  ;;  %v6610_v12 = vld [vmem:[%s9761_s1 + $0xe0] sm:$0xff] }
0x32e8   : > { %v6624_v2 = vmul.f32 %v6592_v52, %v6482_v30  ;;  %v6623_v3 = vmul.f32 %v6591_v53, %v6478_v31  ;;  %v6651_v31 = vadd.f32 %v6650_v13, %v6649_v20 }
0x32ea   : > { %v6680_v17 = vsel %vm6646_vm13, %v6624_v2, 0.0  ;;  %v6665_v18 = vsel %vm6646_vm13, %v6623_v3, 0.0  ;;  %v6601_v2 = vld [vmem:[%s9761_s1 + $0x98] sm:$0xff]  ;;  %v6608_v3 = vld [vmem:[%s9761_s1 + $0xd0] sm:$0xff] }
0x32eb   : > { %v6497_v32 = vpop.permute.xlu0 %6496  ;;  %v6467_v33 = vpop.permute.xlu1 %6466 }
0x32ec   : > { %v6627_v10 = vmul.f32 %v6595_v8, %v6497_v32  ;;  %v6621_v61 = vmul.f32 %v6589_v4, %v6467_v33  ;;  %v6692_v32 = vsel %vm6646_vm13, %v6617_v14, 0.0  ;;  %v6681_v33 = vadd.f32 %v6680_v17, %v6679_v23 }
0x32ee   : > { %v6667_v26 = vsel %vm6646_vm13, %v6627_v10, 0.0  ;;  %v6693_v45 = vsel %vm6646_vm13, %v6621_v61, 0.0 }
0x32ef   : > { %v6501_v34 = vpop.permute.xlu0 %6500  ;;  %v6493_v35 = vpop.permute.xlu1 %6492 }
0x32f0   : > { %v6626_v19 = vmul.f32 %v6594_v5, %v6493_v35  ;;  %v6628_v24 = vmul.f32 %v6596_v11, %v6501_v34  ;;  %v6666_v35 = vadd.f32 %v6665_v18, %v6664_v22 }
0x32f2   : > { %v6652_v47 = vsel %vm6646_vm13, %v6626_v19, 0.0  ;;  %v6668_v51 = vadd.f32 %v6667_v26, %v6666_v35  ;;  %v6682_v52 = vsel %vm6646_vm13, %v6628_v24, 0.0 }
0x32f3   : > { %v6516_v37 = vpop.permute.xlu0 %6515  ;;  %v10701_v38 = vpop.permute.xlu1 %6485  ;;  %v6653_v8 = vadd.f32 %v6652_v47, %v6651_v31 }
0x32f4   : > { %v6631_v27 = vmul.f32 %v6599_v36, %v6516_v37  ;;  %v6597_v37 = vld [vmem:[%s9761_s1 + $0x78] sm:$0xff]  ;;  %v6625_v53 = vmul.f32 %v6593_v28, %v10701_v38 }
0x32f6   : > { %v6669_v56 = vsel %vm6646_vm13, %v6631_v27, 0.0  ;;  %v6695_v9 = vsel %vm6646_vm13, %v6625_v53, 0.0  ;;  %v6609_v27 = vld [vmem:[%s9761_s1 + $0xd8] sm:$0xff] }
0x32f7   : > { %v10703_v39 = vpop.permute.xlu0 %6519  ;;  %v6512_v40 = vpop.permute.xlu1 %6511  ;;  %v6670_v7 = vadd.f32 %v6669_v56, %v6668_v51 }
0x32f8   : > { %v6630_v30 = vmul.f32 %v6598_v15, %v6512_v40  ;;  %v6632_v54 = vmul.f32 %v6600_v29, %v10703_v39  ;;  %v6683_v39 = vadd.f32 %v6682_v52, %v6681_v33 }
0x32fa   : > { %v6654_v57 = vsel %vm6646_vm13, %v6630_v30, 0.0  ;;  %v6684_v10 = vsel %vm6646_vm13, %v6632_v54, 0.0 }
0x32fb   : > { %v6535_v0 = vpop.permute.xlu0 %6534  ;;  %v10709_v46 = vpop.permute.xlu1 %6504  ;;  %v6655_v11 = vadd.f32 %v6654_v57, %v6653_v8 }
0x32fc   : > { %v6635_v49 = vmul.f32 %v6603_v25, %v6535_v0  ;;  %v6694_v0 = vadd.f32 %v6693_v45, %v6692_v32 }
0x32fe   : > { %v6671_v4 = vsel %vm6646_vm13, %v6635_v49, 0.0  ;;  %v6696_v25 = vadd.f32 %v6695_v9, %v6694_v0 }
0x32ff   : > { %v6539_v60 = vpop.permute.xlu0 %6538  ;;  %v6531_v62 = vpop.permute.xlu1 %6530  ;;  %v6672_v15 = vadd.f32 %v6671_v4, %v6670_v7 }
0x3300   : > { %v6634_v40 = vmul.f32 %v6602_v21, %v6531_v62  ;;  %v6629_v62 = vmul.f32 %v6597_v37, %v10709_v46  ;;  %v6636_v1 = vmul.f32 %v6604_v50, %v6539_v60  ;;  %v6612_v46 = vld [vmem:[%s9761_s1 + $0xf0] sm:$0xff]  ;;  %v6685_v21 = vadd.f32 %v6684_v10, %v6683_v39  ;;  %v6613_v37 = vld [vmem:[%s9761_s1 + $0xf8] sm:$0xff]  ;;  %v6720_v39 = vld [vmem:[#allocation53] sm:$0x1] }
0x3302   : > { %v6656_v5 = vsel %vm6646_vm13, %v6634_v40, 0.0  ;;  %v6686_v17 = vsel %vm6646_vm13, %v6636_v1, 0.0 }
0x3303   : > { %v6554_v16 = vpop.permute.xlu0 %6553  ;;  %v6524_v63 = vpop.permute.xlu1 %6523  ;;  %v6657_v18 = vadd.f32 %v6656_v5, %v6655_v11  ;;  %v6687_v32 = vadd.f32 %v6686_v17, %v6685_v21 }
0x3304   : > { %v6639_v58 = vmul.f32 %v6607_v41, %v6554_v16  ;;  %v6633_v13 = vmul.f32 %v6601_v2, %v6524_v63  ;;  %v6697_v16 = vsel %vm6646_vm13, %v6629_v62, 0.0 }
0x3305   : > { %v6698_v31 = vadd.f32 %v6697_v16, %v6696_v25 }
0x3306   : > { %v6673_v60 = vsel %vm6646_vm13, %v6639_v58, 0.0  ;;  %v6699_v28 = vsel %vm6646_vm13, %v6633_v13, 0.0 }
0x3307   : > { %v6558_v44 = vpop.permute.xlu0 %6557  ;;  %v6550_v34 = vpop.permute.xlu1 %6549  ;;  %v6674_v63 = vadd.f32 %v6673_v60, %v6672_v15  ;;  %v6700_v45 = vadd.f32 %v6699_v28, %v6698_v31 }
0x3308   : > { %v6638_v59 = vmul.f32 %v6606_v42, %v6550_v34  ;;  %v6640_v14 = vmul.f32 %v6608_v3, %v6558_v44 }
0x330a   : > { %v6658_v36 = vsel %vm6646_vm13, %v6638_v59, 0.0  ;;  %v6688_v29 = vsel %vm6646_vm13, %v6640_v14, 0.0 }
0x330b   : > { %v6573_v38 = vpop.permute.xlu0 %6572  ;;  %v6543_v48 = vpop.permute.xlu1 %6542  ;;  %v6659_v26 = vadd.f32 %v6658_v36, %v6657_v18  ;;  %v6689_v47 = vadd.f32 %v6688_v29, %v6687_v32 }
0x330c   : > { %v6643_v6 = vmul.f32 %v6611_v55, %v6573_v38  ;;  %v6637_v22 = vmul.f32 %v6605_v43, %v6543_v48 }
0x330e   : > { %v6675_v20 = vsel %vm6646_vm13, %v6643_v6, 0.0  ;;  %v6701_v44 = vsel %vm6646_vm13, %v6637_v22, 0.0 }
0x330f   : > { %v6577_v61 = vpop.permute.xlu0 %6576  ;;  %v6569_v19 = vpop.permute.xlu1 %6568  ;;  %v6676_v33 = vadd.f32 %v6675_v20, %v6674_v63  ;;  %v6702_v51 = vadd.f32 %v6701_v44, %v6700_v45 }
0x3310   : > { %v6644_v23 = vmul.f32 %v6612_v46, %v6577_v61  ;;  %v6642_v24 = vmul.f32 %v6610_v12, %v6569_v19 }
0x3311   : > { %v6708_v40 = vsel %vm6646_vm13, %v6676_v33, 0.0 }
0x3312   : > { %v6660_v30 = vsel %vm6646_vm13, %v6642_v24, 0.0  ;;  %v6690_v42 = vsel %vm6646_vm13, %v6644_v23, 0.0 }
0x3313   : > { %v6661_v35 = vadd.f32 %v6660_v30, %v6659_v26  ;;  %v6562_v41 = vpop.permute.xlu1 %6561  ;;  %v6691_v52 = vadd.f32 %v6690_v42, %v6689_v47 }
0x3314   : > { %v6641_v34 = vmul.f32 %v6609_v27, %v6562_v41 }
0x3315   : > { %v6707_v49 = vsel %vm6646_vm13, %v6661_v35, 0.0  ;;  %v6710_v58 = vsel %vm6646_vm13, %v6691_v52, 0.0 }
0x3316   : > { %v6703_v50 = vsel %vm6646_vm13, %v6641_v34, 0.0  ;;  %v6709_v54 = vadd.f32 %v6708_v40, %v6707_v49 }
0x3317   : > { %v6581_v53 = vpop.permute.xlu1 %6580  ;;  %v6704_v56 = vadd.f32 %v6703_v50, %v6702_v51 }
0x3318   : > { %v6645_v55 = vmul.f32 %v6613_v37, %v6581_v53  ;;  %v6711_v0 = vadd.f32 %v6710_v58, %v6709_v54 }
0x331a   : > { %v6705_v57 = vsel %vm6646_vm13, %v6645_v55, 0.0 }
0x331b   : > { %v6706_v59 = vadd.f32 %v6705_v57, %v6704_v56 }
0x331d   : > { %v6712_v8 = vsel %vm6646_vm13, %v6706_v59, 0.0 }
0x331e   : > { %v6713_v62 = vadd.f32 %v6712_v8, %v6711_v0 }
0x3320   : > { %v6714_v1 = vrot.slane %v6713_v62, 4 }
0x3322   : > { %v6715_v2 = vadd.f32 %v6714_v1, %v6713_v62 }
0x3324   : > { %v6716_v3 = vrot.slane %v6715_v2, 2 }
0x3326   : > { %v6717_v38 = vadd.f32 %v6716_v3, %v6715_v2 }
0x3328   : > { %v6718_v48 = vrot.slane %v6717_v38, 1 }
0x332a   : > { %v6719_v4 = vadd.f32 %v6718_v48, %v6717_v38 }
0x332c   : > { %v6721_v5 = vadd.f32 %v6720_v39, %v6719_v4 }
0x332e   : > { %v6723_v6 = vsel %vm6722_vm14, %v6721_v5, -inf }
0x332f   : > { %6724 = vmax.xlane.f32.xlu0 %v6723_v6 }
0x33b8   : > { %v6725_v7 = vpop.xlane.xlu0 %6724 }
0x33b9   : > { %v6726_v9 = vsub.f32 %v6721_v5, %v6725_v7 }
0x33bb   : > { %v6727_v10 = vmul.f32 1.442695, %v6726_v9 }
0x33bd   : > { %8515 = vpow2.f32 %v6727_v10 }
0x33ca   : > { %v8516_v11 = vpop.eup %8515 }
0x33cb   : > { %v6729_v43 = vsel %vm6722_vm14, %v8516_v11, 0.0 }
0x33cc   : > { %6730 = vadd.xlane.f32.xlu1 %v6729_v43 }
0x3455   : > { %v6731_v46 = vpop.xlane.xlu1 %6730 }
0x3456   : > { %8517 = vrcp.f32 %v6731_v46 }
0x3463   : > { %v8518_v12 = vpop.eup %8517 }
0x3464   : > { %v6733_v60 = vmul.f32 %v8518_v12, %v8516_v11 }
0x3466   : > { %6734 = vst.msk [vmem:[%s1804_s17] sm:$0x1] %vm6722_vm14, %v6733_v60 }
0x3467   : > { %9324 = shalt.err (!%p9321_p2)
}
0x3468   : > { %s9325_s11 = scalar_lea.hbm %s6746_s2, 16  ;;  %s9329_s8 = scalar_lea.hbm %s9772_s30, 32 }
0x3469   : > { %p9326_p1 = scmp.ne.s32.totalorder %s6746_s2, %s9325_s11  ;;  %p9330_p12 = scmp.lt.s32.totalorder %s6746_s2, %s9772_s30 }
0x346a   : > { %p9331_p13 = scmp.lt.s32.totalorder %s9329_s8, %s9325_s11 }
0x346b   : > { %p9327_p10 = pnand %p9326_p1, %p10935_p0 }
0x346c   : > { %p9332_p5 = por %p9331_p13, %p9330_p12 }
0x346d   : > { %p9328_p11 = pneg %p9327_p10 }
0x346f   : > { %p9333_p6 = pnand %p9332_p5, %p9328_p11 }
0x3471   : > { %9336 = shalt.err (!%p9333_p6)
}
0x3472   : > { %8263 = dma.vmem_to_hbm [thread:$0]  (%p10935_p0), %s6749_s4, 16, %s6746_s2, %s6736_s15  }
0x3473 PF: > { %s10936_s20 = sld [smem:[#allocation118_spill]]  ;;  %p8333_p3 = scmp.ge.s32.totalorder %s9441_s29, 2 }
0x3474   : > { %s6760_s19 = sand.u32 1, %s9429_s0  }
0x3475   : > { %s6761_s10 = scalar_lea.sflag [#allocation7], %s6760_s19 }
0x3479   : > { %p10937_p4 = scmp.ne.s32.totalorder %s10936_s20, 0 }
0x347b   : > { %p8266_p7 = pnand %p8333_p3, %p10937_p4 }
0x347d   : > { %p8267_p8 = pneg %p8266_p7 }
0x347f   : > { %9424 = dma.done.wait (%p8267_p8), %s6761_s10, 16  }
0x3480   : > { %9426 = vsyncadd (%p8267_p8), %s6761_s10, 4294967280  ;;  %s10938_s29 = sld [smem:[#allocation116_spill]]  ;;  %s10941_s0 = smov %s9433_s14 }
0x3481   : > { %s10939_s7 = sld [smem:[#allocation115_spill]] }
0x3482   : > { %s10940_s2 = sld [smem:[#allocation117_spill]] }
0x3486   : > { %p132_p9 = scmp.ge.s32.totalorder %s10938_s29, 4  }
0x3487   : > { %s10942_s14 = smov %s10939_s7 }
0x3488   :  { %134 = sbr.rel (!%p132_p9) target bundleno = 133 (0x85), region = 450 }
0x348d   :  { %6765 = vsyncpa [#allocation6], 1 }
0x348e   :  { %6767 = vsyncpa [#allocation6 + $0x1], 1 }
0x348f   :  { %6768 = vsyncpa [#allocation9], 1 }
0x3490   :  { %6769 = vsyncpa [#allocation12], 1 }
0x3491   :  { %6770 = vsyncpa [#allocation15], 1 }
0x3492   :  { %6771 = vsyncpa [#allocation18], 1 }
0x3493   :  { %6772 = vsyncpa [#allocation21], 1 }
0x3494   :  { %6773 = vsyncpa [#allocation24], 1 }
0x3495   :  { %6774 = vsyncpa [#allocation27], 1 }
0x3496   :  { %6775 = vsyncpa [#allocation30], 1 }
0x3497   :  { %6776 = vsyncpa [#allocation33], 1 }
0x3498   :  { %6777 = vsyncpa [#allocation36], 1 }
0x3499   :  { %6778 = vsyncpa [#allocation39], 1 }
0x349a   :  { %6779 = vsyncpa [#allocation42], 1 }
0x349b   :  { %6780 = vsyncpa [#allocation45], 1 }
0x349c   :  { %6781 = vsyncpa [#allocation48], 1 }
0x349d   :  { %6782 = vsyncpa [#allocation51], 1 }
0x349e   :  { %6783 = vsyncpa [#allocation54], 1 }
0x349f   :  { %6784 = vsyncpa [#allocation7], 1 }
0x34a0   :  { %6786 = vsyncpa [#allocation7 + $0x1], 1 }

</bundles_post_ra>
